<compile_context>
chip_gen: v7x
topology: tpu7x:2x2x1
jax: 0.10.0
libtpu: 0.0.40
codegen_flags: <defaults>
</compile_context>

<pallas_src>
import functools

import jax
import jax.numpy as jnp
from jax.experimental import pallas as pl
from jax.experimental.pallas import tpu as pltpu

# LIF hyperparameters (BaseLIFLayer defaults).
ALPHA = 0.9
ALPHARP = 0.65
WRP = 1.0
BETA = 0.85
TAU_M = 1.0 / (1.0 - ALPHA)
TAU_S = 1.0 / (1.0 - BETA)


def _lif_rollout_kernel(sin_ref, p0_ref, q0_ref, r0_ref, s0_ref, w_ref, b_ref,
                        s_seq_ref, u_seq_ref, pf_ref, qf_ref, rf_ref, sf_ref,
                        p_scr, q_scr, r_scr, s_scr):
    tc = pl.program_id(1)
    n_tc = pl.num_programs(1)
    tt = sin_ref.shape[0]

    # First time chunk of this batch block: seed VMEM-resident state from the
    # initial-state inputs (fetched once per batch block).
    @pl.when(tc == 0)
    def _():
        p_scr[...] = p0_ref[...]
        q_scr[...] = q0_ref[...]
        r_scr[...] = r0_ref[...]
        s_scr[...] = s0_ref[...]

    # Pull state into registers for the whole chunk.
    p = p_scr[...]
    q = q_scr[...]
    r = r_scr[...]
    s = s_scr[...]
    w = w_ref[...]          # (Fin, Fout), resident in VMEM across the grid
    bias = b_ref[...]       # (1, Fout)

    # Unrolled recurrence over the tt timesteps of this chunk.
    for ti in range(tt):
        sin_t = sin_ref[ti]                          # (tb, Fin)

        # Synaptic / membrane / refractory traces (VPU elementwise).
        q_new = BETA * q + TAU_S * sin_t
        p_new = ALPHA * p + TAU_M * q
        r_new = ALPHARP * r - WRP * s

        # base_layer(P): dense matmul on the MXU, f32 accumulation.
        u = jnp.dot(p_new, w, preferred_element_type=jnp.float32)
        u = u + bias + r_new

        # FastSigmoid.forward: hard threshold.
        s_new = (u > 0.0).astype(u.dtype)

        u_seq_ref[ti] = u
        s_seq_ref[ti] = s_new

        p, q, r, s = p_new, q_new, r_new, s_new

    # Carry state to the next time chunk.
    p_scr[...] = p
    q_scr[...] = q
    r_scr[...] = r
    s_scr[...] = s

    # Emit the final NeuronState once per batch block.
    @pl.when(tc == n_tc - 1)
    def _():
        pf_ref[...] = p
        qf_ref[...] = q
        rf_ref[...] = r
        sf_ref[...] = s


def _pick_tb(batch):
    """Batch tile: <=64 (keeps in-register state within the 64-vreg file),
    dividing B, preferring >=2 blocks so both v7x TensorCores get work."""
    for cand in (64, 32, 16, 8):
        if batch % cand == 0 and batch // cand >= 2:
            return cand
    return batch


def _pick_tt(timesteps):
    """Timesteps per grid step: largest divisor of T up to 16 (amortizes the
    per-grid-step overhead while keeping the S/U output tiles small in VMEM)."""
    for cand in (16, 8, 4, 2):
        if timesteps % cand == 0:
            return cand
    return 1


@functools.partial(jax.jit, static_argnames=("tb", "tt"))
def lif_rollout(sin, p0, q0, r0, s0, w_t, b, *, tb, tt):
    """Fused T-step BaseLIFLayer rollout.

    sin: (T, B, Fin) spike inputs; p0/q0: (B, Fin); r0/s0: (B, Fout);
    w_t: (Fin, Fout) == PyTorch Linear weight transposed; b: (1, Fout).
    Returns (S_seq, U_seq, P_T, Q_T, R_T, S_T).
    """
    T, B, Fin = sin.shape
    Fout = w_t.shape[1]
    assert B % tb == 0, (B, tb)
    assert T % tt == 0, (T, tt)

    grid = (B // tb, T // tt)                       # time-chunk axis innermost

    sin_spec = pl.BlockSpec((tt, tb, Fin), lambda i, tc: (tc, i, 0))
    pin_spec = pl.BlockSpec((tb, Fin), lambda i, tc: (i, 0))
    rin_spec = pl.BlockSpec((tb, Fout), lambda i, tc: (i, 0))
    w_spec = pl.BlockSpec((Fin, Fout), lambda i, tc: (0, 0))
    b_spec = pl.BlockSpec((1, Fout), lambda i, tc: (0, 0))
    seq_spec = pl.BlockSpec((tt, tb, Fout), lambda i, tc: (tc, i, 0))

    out_shapes = (
        jax.ShapeDtypeStruct((T, B, Fout), jnp.float32),   # S sequence
        jax.ShapeDtypeStruct((T, B, Fout), jnp.float32),   # U sequence
        jax.ShapeDtypeStruct((B, Fin), jnp.float32),       # final P
        jax.ShapeDtypeStruct((B, Fin), jnp.float32),       # final Q
        jax.ShapeDtypeStruct((B, Fout), jnp.float32),      # final R
        jax.ShapeDtypeStruct((B, Fout), jnp.float32),      # final S
    )

    return pl.pallas_call(
        _lif_rollout_kernel,
        out_shape=out_shapes,
        grid_spec=pltpu.PrefetchScalarGridSpec(
            num_scalar_prefetch=0,
            grid=grid,
            in_specs=[sin_spec, pin_spec, pin_spec, rin_spec, rin_spec,
                      w_spec, b_spec],
            out_specs=[seq_spec, seq_spec, pin_spec, pin_spec,
                       rin_spec, rin_spec],
            scratch_shapes=[
                pltpu.VMEM((tb, Fin), jnp.float32),    # P carry
                pltpu.VMEM((tb, Fin), jnp.float32),    # Q carry
                pltpu.VMEM((tb, Fout), jnp.float32),   # R carry
                pltpu.VMEM((tb, Fout), jnp.float32),   # S carry
            ]),
        compiler_params=pltpu.CompilerParams(
            dimension_semantics=("parallel", "arbitrary")),
    )(sin, p0, q0, r0, s0, w_t, b)


def lif_rollout_reference(sin, p, q, r, s, w_t, b):
    """Pure-JAX reference: per-step BaseLIFLayer.forward semantics."""
    s_seq, u_seq = [], []
    for t in range(sin.shape[0]):
        q_new = BETA * q + TAU_S * sin[t]
        p_new = ALPHA * p + TAU_M * q
        r_new = ALPHARP * r - WRP * s
        u = p_new @ w_t + b + r_new
        s_new = (u > 0.0).astype(u.dtype)
        p, q, r, s = p_new, q_new, r_new, s_new
        s_seq.append(s_new)
        u_seq.append(u)
    return jnp.stack(s_seq), jnp.stack(u_seq), p, q, r, s


# TODO(synk): only the nn.Linear base layer is implemented (no Conv2d variant),
# and only FastSigmoid.forward (the surrogate-gradient backward is training-only).

if __name__ == "__main__":
    key = jax.random.PRNGKey(0)
    T, B, Fin, Fout = 8, 128, 64, 128

    kw, kb, kx = jax.random.split(key, 3)
    bound = float(Fin) ** -0.5
    # Weight stored transposed: (Fin, Fout) == W^T of PyTorch's (Fout, Fin).
    w_t = jax.random.uniform(kw, (Fin, Fout), jnp.float32, -bound, bound)
    b = jax.random.uniform(kb, (1, Fout), jnp.float32, -bound, bound)
    # Binary spike input over the whole rollout.
    sin = (jax.random.uniform(kx, (T, B, Fin), jnp.float32) > 0.7).astype(
        jnp.float32)

    # init_state: zero P, Q (input-shaped) and R, S (output-shaped).
    p0 = jnp.zeros((B, Fin), jnp.float32)
    q0 = jnp.zeros((B, Fin), jnp.float32)
    r0 = jnp.zeros((B, Fout), jnp.float32)
    s0 = jnp.zeros((B, Fout), jnp.float32)

    tb = _pick_tb(B)
    tt = _pick_tt(T)
    outs = lif_rollout(sin, p0, q0, r0, s0, w_t, b, tb=tb, tt=tt)
    jax.block_until_ready(outs)
    s_seq, u_seq, p_f, q_f, r_f, s_f = outs

    s_r, u_r, p_r, q_r, r_r, s_fr = lif_rollout_reference(
        sin, p0, q0, r0, s0, w_t, b)

    ok = True
    ok &= bool(jnp.allclose(u_seq, u_r, atol=2e-3, rtol=1e-4))
    # Spikes must match wherever U is not numerically on the threshold
    # (guards against f32 matmul rounding-order differences).
    safe = jnp.abs(u_r) > 1e-2
    ok &= bool(jnp.all(jnp.where(safe, s_seq == s_r, True)))
    ok &= bool(jnp.allclose(p_f, p_r, atol=1e-4))
    ok &= bool(jnp.allclose(q_f, q_r, atol=1e-4))
    ok &= bool(jnp.allclose(r_f, r_r, atol=1e-3))
    ok &= bool(jnp.all(jnp.where(jnp.abs(u_r[-1]) > 1e-2, s_f == s_fr, True)))

    if ok:
        print("KERNEL_OK")
    else:
        raise SystemExit("mismatch vs reference")
</pallas_src>

<mosaic_0001>
module attributes {stable_mosaic.version = 11 : i64} {
  func.func @_lif_rollout_kernel(%arg0: i32, %arg1: i32, %arg2: memref<8x64x64xf32, #tpu.memory_space<vmem>>, %arg3: memref<64x64xf32, #tpu.memory_space<vmem>>, %arg4: memref<64x64xf32, #tpu.memory_space<vmem>>, %arg5: memref<64x128xf32, #tpu.memory_space<vmem>>, %arg6: memref<64x128xf32, #tpu.memory_space<vmem>>, %arg7: memref<64x128xf32, #tpu.memory_space<vmem>>, %arg8: memref<1x128xf32, #tpu.memory_space<vmem>>, %arg9: memref<8x64x128xf32, #tpu.memory_space<vmem>>, %arg10: memref<8x64x128xf32, #tpu.memory_space<vmem>>, %arg11: memref<64x64xf32, #tpu.memory_space<vmem>>, %arg12: memref<64x64xf32, #tpu.memory_space<vmem>>, %arg13: memref<64x128xf32, #tpu.memory_space<vmem>>, %arg14: memref<64x128xf32, #tpu.memory_space<vmem>>, %arg15: memref<64x64xf32, #tpu.memory_space<vmem>>, %arg16: memref<64x64xf32, #tpu.memory_space<vmem>>, %arg17: memref<64x128xf32, #tpu.memory_space<vmem>>, %arg18: memref<64x128xf32, #tpu.memory_space<vmem>>) attributes {dimension_semantics = [#tpu.dimension_semantics<parallel>, #tpu.dimension_semantics<arbitrary>], iteration_bounds = array<i64: 2, 1>, scalar_prefetch = 0 : i64, scratch_operands = 4 : i64, tpu.core_type = #tpu.core_type<tc>, window_params = [{transform_indices = @transform_0, window_bounds = array<i64: 8, 64, 64>}, {transform_indices = @transform_1, window_bounds = array<i64: 64, 64>}, {transform_indices = @transform_2, window_bounds = array<i64: 64, 64>}, {transform_indices = @transform_3, window_bounds = array<i64: 64, 128>}, {transform_indices = @transform_4, window_bounds = array<i64: 64, 128>}, {pipeline_mode = #tpu.pipeline_mode<synchronous>, transform_indices = @transform_5, window_bounds = array<i64: 64, 128>}, {pipeline_mode = #tpu.pipeline_mode<synchronous>, transform_indices = @transform_6, window_bounds = array<i64: 1, 128>}, {transform_indices = @transform_7, window_bounds = array<i64: 8, 64, 128>}, {transform_indices = @transform_8, window_bounds = array<i64: 8, 64, 128>}, {transform_indices = @transform_9, window_bounds = array<i64: 64, 64>}, {transform_indices = @transform_10, window_bounds = array<i64: 64, 64>}, {transform_indices = @transform_11, window_bounds = array<i64: 64, 128>}, {transform_indices = @transform_12, window_bounds = array<i64: 64, 128>}]} {
    %c0_i32 = arith.constant 0 : i32
    %0 = arith.cmpi eq, %arg1, %c0_i32 : i32
    %1 = arith.extui %0 : i1 to i32
    %c0_i32_0 = arith.constant 0 : i32
    %2 = arith.cmpi ne, %1, %c0_i32_0 : i32
    scf.if %2 {
      %c0_150 = arith.constant 0 : index
      %c0_151 = arith.constant 0 : index
      %264 = vector.load %arg3[%c0_150, %c0_151] : memref<64x64xf32, #tpu.memory_space<vmem>>, vector<64x64xf32>
      %c0_152 = arith.constant 0 : index
      %c0_153 = arith.constant 0 : index
      %265 = vector.load %arg15[%c0_152, %c0_153] : memref<64x64xf32, #tpu.memory_space<vmem>>, vector<64x64xf32>
      tpu.vector_store %arg15[%c0_152, %c0_153], %264 {strides = array<i32>} : memref<64x64xf32, #tpu.memory_space<vmem>>, vector<64x64xf32>,
      %c0_154 = arith.constant 0 : index
      %c0_155 = arith.constant 0 : index
      %266 = vector.load %arg4[%c0_154, %c0_155] : memref<64x64xf32, #tpu.memory_space<vmem>>, vector<64x64xf32>
      %c0_156 = arith.constant 0 : index
      %c0_157 = arith.constant 0 : index
      %267 = vector.load %arg16[%c0_156, %c0_157] : memref<64x64xf32, #tpu.memory_space<vmem>>, vector<64x64xf32>
      tpu.vector_store %arg16[%c0_156, %c0_157], %266 {strides = array<i32>} : memref<64x64xf32, #tpu.memory_space<vmem>>, vector<64x64xf32>,
      %c0_158 = arith.constant 0 : index
      %c0_159 = arith.constant 0 : index
      %268 = vector.load %arg5[%c0_158, %c0_159] : memref<64x128xf32, #tpu.memory_space<vmem>>, vector<64x128xf32>
      %c0_160 = arith.constant 0 : index
      %c0_161 = arith.constant 0 : index
      %269 = vector.load %arg17[%c0_160, %c0_161] : memref<64x128xf32, #tpu.memory_space<vmem>>, vector<64x128xf32>
      tpu.vector_store %arg17[%c0_160, %c0_161], %268 {strides = array<i32>} : memref<64x128xf32, #tpu.memory_space<vmem>>, vector<64x128xf32>,
      %c0_162 = arith.constant 0 : index
      %c0_163 = arith.constant 0 : index
      %270 = vector.load %arg6[%c0_162, %c0_163] : memref<64x128xf32, #tpu.memory_space<vmem>>, vector<64x128xf32>
      %c0_164 = arith.constant 0 : index
      %c0_165 = arith.constant 0 : index
      %271 = vector.load %arg18[%c0_164, %c0_165] : memref<64x128xf32, #tpu.memory_space<vmem>>, vector<64x128xf32>
      tpu.vector_store %arg18[%c0_164, %c0_165], %270 {strides = array<i32>} : memref<64x128xf32, #tpu.memory_space<vmem>>, vector<64x128xf32>,
    } else {
    }
    %c0 = arith.constant 0 : index
    %c0_1 = arith.constant 0 : index
    %3 = vector.load %arg15[%c0, %c0_1] : memref<64x64xf32, #tpu.memory_space<vmem>>, vector<64x64xf32>
    %c0_2 = arith.constant 0 : index
    %c0_3 = arith.constant 0 : index
    %4 = vector.load %arg16[%c0_2, %c0_3] : memref<64x64xf32, #tpu.memory_space<vmem>>, vector<64x64xf32>
    %c0_4 = arith.constant 0 : index
    %c0_5 = arith.constant 0 : index
    %5 = vector.load %arg17[%c0_4, %c0_5] : memref<64x128xf32, #tpu.memory_space<vmem>>, vector<64x128xf32>
    %c0_6 = arith.constant 0 : index
    %c0_7 = arith.constant 0 : index
    %6 = vector.load %arg18[%c0_6, %c0_7] : memref<64x128xf32, #tpu.memory_space<vmem>>, vector<64x128xf32>
    %c0_8 = arith.constant 0 : index
    %c0_9 = arith.constant 0 : index
    %7 = vector.load %arg7[%c0_8, %c0_9] : memref<64x128xf32, #tpu.memory_space<vmem>>, vector<64x128xf32>
    %c0_10 = arith.constant 0 : index
    %c0_11 = arith.constant 0 : index
    %8 = vector.load %arg8[%c0_10, %c0_11] : memref<1x128xf32, #tpu.memory_space<vmem>>, vector<1x128xf32>
    %c0_12 = arith.constant 0 : index
    %c0_13 = arith.constant 0 : index
    %c0_14 = arith.constant 0 : index
    %9 = vector.load %arg2[%c0_12, %c0_13, %c0_14] : memref<8x64x64xf32, #tpu.memory_space<vmem>>, vector<1x64x64xf32>
    %10 = vector.shape_cast %9 : vector<1x64x64xf32> to vector<64x64xf32>
    %cst = arith.constant 8.500000e-01 : f32
    %11 = vector.broadcast %cst : f32 to vector<64x64xf32>
    %12 = arith.mulf %11, %4 : vector<64x64xf32>
    %cst_15 = arith.constant 6.66666651 : f32
    %13 = vector.broadcast %cst_15 : f32 to vector<64x64xf32>
    %14 = arith.mulf %13, %10 : vector<64x64xf32>
    %15 = arith.addf %12, %14 : vector<64x64xf32>
    %cst_16 = arith.constant 0.899999976 : f32
    %16 = vector.broadcast %cst_16 : f32 to vector<64x64xf32>
    %17 = arith.mulf %16, %3 : vector<64x64xf32>
    %cst_17 = arith.constant 1.000000e+01 : f32
    %18 = vector.broadcast %cst_17 : f32 to vector<64x64xf32>
    %19 = arith.mulf %18, %4 : vector<64x64xf32>
    %20 = arith.addf %17, %19 : vector<64x64xf32>
    %cst_18 = arith.constant 6.500000e-01 : f32
    %21 = vector.broadcast %cst_18 : f32 to vector<64x128xf32>
    %22 = arith.mulf %21, %5 : vector<64x128xf32>
    %cst_19 = arith.constant 1.000000e+00 : f32
    %23 = vector.broadcast %cst_19 : f32 to vector<64x128xf32>
    %24 = arith.mulf %23, %6 : vector<64x128xf32>
    %25 = arith.subf %22, %24 : vector<64x128xf32>
    %cst_20 = arith.constant dense<0.000000e+00> : vector<64x128xf32>
    %26 = tpu.matmul %20, %7, %cst_20 {dimension_numbers = #tpu.dot_dimension_numbers<[1], [0], [0], [1], [0, 0, 1, 1], [], []>} : vector<64x64xf32>, vector<64x128xf32>, vector<64x128xf32> -> vector<64x128xf32>
    %27 = vector.broadcast %8 : vector<1x128xf32> to vector<64x128xf32>
    %28 = arith.addf %26, %27 : vector<64x128xf32>
    %29 = arith.addf %28, %25 : vector<64x128xf32>
    %cst_21 = arith.constant 0.000000e+00 : f32
    %30 = vector.broadcast %cst_21 : f32 to vector<64x128xf32>
    %31 = arith.cmpf ogt, %29, %30 : vector<64x128xf32>
    %32 = arith.extui %31 : vector<64x128xi1> to vector<64x128xi32>
    %33 = arith.sitofp %32 : vector<64x128xi32> to vector<64x128xf32>
    %c0_22 = arith.constant 0 : index
    %c0_23 = arith.constant 0 : index
    %c0_24 = arith.constant 0 : index
    %34 = vector.load %arg10[%c0_22, %c0_23, %c0_24] : memref<8x64x128xf32, #tpu.memory_space<vmem>>, vector<1x64x128xf32>
    %35 = vector.shape_cast %34 : vector<1x64x128xf32> to vector<64x128xf32>
    %36 = vector.shape_cast %29 : vector<64x128xf32> to vector<1x64x128xf32>
    tpu.vector_store %arg10[%c0_22, %c0_23, %c0_24], %36 {strides = array<i32>} : memref<8x64x128xf32, #tpu.memory_space<vmem>>, vector<1x64x128xf32>,
    %c0_25 = arith.constant 0 : index
    %c0_26 = arith.constant 0 : index
    %c0_27 = arith.constant 0 : index
    %37 = vector.load %arg9[%c0_25, %c0_26, %c0_27] : memref<8x64x128xf32, #tpu.memory_space<vmem>>, vector<1x64x128xf32>
    %38 = vector.shape_cast %37 : vector<1x64x128xf32> to vector<64x128xf32>
    %39 = vector.shape_cast %33 : vector<64x128xf32> to vector<1x64x128xf32>
    tpu.vector_store %arg9[%c0_25, %c0_26, %c0_27], %39 {strides = array<i32>} : memref<8x64x128xf32, #tpu.memory_space<vmem>>, vector<1x64x128xf32>,
    %c1 = arith.constant 1 : index
    %c0_28 = arith.constant 0 : index
    %c0_29 = arith.constant 0 : index
    %40 = vector.load %arg2[%c1, %c0_28, %c0_29] : memref<8x64x64xf32, #tpu.memory_space<vmem>>, vector<1x64x64xf32>
    %41 = vector.shape_cast %40 : vector<1x64x64xf32> to vector<64x64xf32>
    %cst_30 = arith.constant 8.500000e-01 : f32
    %42 = vector.broadcast %cst_30 : f32 to vector<64x64xf32>
    %43 = arith.mulf %42, %15 : vector<64x64xf32>
    %cst_31 = arith.constant 6.66666651 : f32
    %44 = vector.broadcast %cst_31 : f32 to vector<64x64xf32>
    %45 = arith.mulf %44, %41 : vector<64x64xf32>
    %46 = arith.addf %43, %45 : vector<64x64xf32>
    %cst_32 = arith.constant 0.899999976 : f32
    %47 = vector.broadcast %cst_32 : f32 to vector<64x64xf32>
    %48 = arith.mulf %47, %20 : vector<64x64xf32>
    %cst_33 = arith.constant 1.000000e+01 : f32
    %49 = vector.broadcast %cst_33 : f32 to vector<64x64xf32>
    %50 = arith.mulf %49, %15 : vector<64x64xf32>
    %51 = arith.addf %48, %50 : vector<64x64xf32>
    %cst_34 = arith.constant 6.500000e-01 : f32
    %52 = vector.broadcast %cst_34 : f32 to vector<64x128xf32>
    %53 = arith.mulf %52, %25 : vector<64x128xf32>
    %cst_35 = arith.constant 1.000000e+00 : f32
    %54 = vector.broadcast %cst_35 : f32 to vector<64x128xf32>
    %55 = arith.mulf %54, %33 : vector<64x128xf32>
    %56 = arith.subf %53, %55 : vector<64x128xf32>
    %cst_36 = arith.constant dense<0.000000e+00> : vector<64x128xf32>
    %57 = tpu.matmul %51, %7, %cst_36 {dimension_numbers = #tpu.dot_dimension_numbers<[1], [0], [0], [1], [0, 0, 1, 1], [], []>} : vector<64x64xf32>, vector<64x128xf32>, vector<64x128xf32> -> vector<64x128xf32>
    %58 = vector.broadcast %8 : vector<1x128xf32> to vector<64x128xf32>
    %59 = arith.addf %57, %58 : vector<64x128xf32>
    %60 = arith.addf %59, %56 : vector<64x128xf32>
    %cst_37 = arith.constant 0.000000e+00 : f32
    %61 = vector.broadcast %cst_37 : f32 to vector<64x128xf32>
    %62 = arith.cmpf ogt, %60, %61 : vector<64x128xf32>
    %63 = arith.extui %62 : vector<64x128xi1> to vector<64x128xi32>
    %64 = arith.sitofp %63 : vector<64x128xi32> to vector<64x128xf32>
    %c1_38 = arith.constant 1 : index
    %c0_39 = arith.constant 0 : index
    %c0_40 = arith.constant 0 : index
    %65 = vector.load %arg10[%c1_38, %c0_39, %c0_40] : memref<8x64x128xf32, #tpu.memory_space<vmem>>, vector<1x64x128xf32>
    %66 = vector.shape_cast %65 : vector<1x64x128xf32> to vector<64x128xf32>
    %67 = vector.shape_cast %60 : vector<64x128xf32> to vector<1x64x128xf32>
    tpu.vector_store %arg10[%c1_38, %c0_39, %c0_40], %67 {strides = array<i32>} : memref<8x64x128xf32, #tpu.memory_space<vmem>>, vector<1x64x128xf32>,
    %c1_41 = arith.constant 1 : index
    %c0_42 = arith.constant 0 : index
    %c0_43 = arith.constant 0 : index
    %68 = vector.load %arg9[%c1_41, %c0_42, %c0_43] : memref<8x64x128xf32, #tpu.memory_space<vmem>>, vector<1x64x128xf32>
    %69 = vector.shape_cast %68 : vector<1x64x128xf32> to vector<64x128xf32>
    %70 = vector.shape_cast %64 : vector<64x128xf32> to vector<1x64x128xf32>
    tpu.vector_store %arg9[%c1_41, %c0_42, %c0_43], %70 {strides = array<i32>} : memref<8x64x128xf32, #tpu.memory_space<vmem>>, vector<1x64x128xf32>,
    %c2 = arith.constant 2 : index
    %c0_44 = arith.constant 0 : index
    %c0_45 = arith.constant 0 : index
    %71 = vector.load %arg2[%c2, %c0_44, %c0_45] : memref<8x64x64xf32, #tpu.memory_space<vmem>>, vector<1x64x64xf32>
    %72 = vector.shape_cast %71 : vector<1x64x64xf32> to vector<64x64xf32>
    %cst_46 = arith.constant 8.500000e-01 : f32
    %73 = vector.broadcast %cst_46 : f32 to vector<64x64xf32>
    %74 = arith.mulf %73, %46 : vector<64x64xf32>
    %cst_47 = arith.constant 6.66666651 : f32
    %75 = vector.broadcast %cst_47 : f32 to vector<64x64xf32>
    %76 = arith.mulf %75, %72 : vector<64x64xf32>
    %77 = arith.addf %74, %76 : vector<64x64xf32>
    %cst_48 = arith.constant 0.899999976 : f32
    %78 = vector.broadcast %cst_48 : f32 to vector<64x64xf32>
    %79 = arith.mulf %78, %51 : vector<64x64xf32>
    %cst_49 = arith.constant 1.000000e+01 : f32
    %80 = vector.broadcast %cst_49 : f32 to vector<64x64xf32>
    %81 = arith.mulf %80, %46 : vector<64x64xf32>
    %82 = arith.addf %79, %81 : vector<64x64xf32>
    %cst_50 = arith.constant 6.500000e-01 : f32
    %83 = vector.broadcast %cst_50 : f32 to vector<64x128xf32>
    %84 = arith.mulf %83, %56 : vector<64x128xf32>
    %cst_51 = arith.constant 1.000000e+00 : f32
    %85 = vector.broadcast %cst_51 : f32 to vector<64x128xf32>
    %86 = arith.mulf %85, %64 : vector<64x128xf32>
    %87 = arith.subf %84, %86 : vector<64x128xf32>
    %cst_52 = arith.constant dense<0.000000e+00> : vector<64x128xf32>
    %88 = tpu.matmul %82, %7, %cst_52 {dimension_numbers = #tpu.dot_dimension_numbers<[1], [0], [0], [1], [0, 0, 1, 1], [], []>} : vector<64x64xf32>, vector<64x128xf32>, vector<64x128xf32> -> vector<64x128xf32>
    %89 = vector.broadcast %8 : vector<1x128xf32> to vector<64x128xf32>
    %90 = arith.addf %88, %89 : vector<64x128xf32>
    %91 = arith.addf %90, %87 : vector<64x128xf32>
    %cst_53 = arith.constant 0.000000e+00 : f32
    %92 = vector.broadcast %cst_53 : f32 to vector<64x128xf32>
    %93 = arith.cmpf ogt, %91, %92 : vector<64x128xf32>
    %94 = arith.extui %93 : vector<64x128xi1> to vector<64x128xi32>
    %95 = arith.sitofp %94 : vector<64x128xi32> to vector<64x128xf32>
    %c2_54 = arith.constant 2 : index
    %c0_55 = arith.constant 0 : index
    %c0_56 = arith.constant 0 : index
    %96 = vector.load %arg10[%c2_54, %c0_55, %c0_56] : memref<8x64x128xf32, #tpu.memory_space<vmem>>, vector<1x64x128xf32>
    %97 = vector.shape_cast %96 : vector<1x64x128xf32> to vector<64x128xf32>
    %98 = vector.shape_cast %91 : vector<64x128xf32> to vector<1x64x128xf32>
    tpu.vector_store %arg10[%c2_54, %c0_55, %c0_56], %98 {strides = array<i32>} : memref<8x64x128xf32, #tpu.memory_space<vmem>>, vector<1x64x128xf32>,
    %c2_57 = arith.constant 2 : index
    %c0_58 = arith.constant 0 : index
    %c0_59 = arith.constant 0 : index
    %99 = vector.load %arg9[%c2_57, %c0_58, %c0_59] : memref<8x64x128xf32, #tpu.memory_space<vmem>>, vector<1x64x128xf32>
    %100 = vector.shape_cast %99 : vector<1x64x128xf32> to vector<64x128xf32>
    %101 = vector.shape_cast %95 : vector<64x128xf32> to vector<1x64x128xf32>
    tpu.vector_store %arg9[%c2_57, %c0_58, %c0_59], %101 {strides = array<i32>} : memref<8x64x128xf32, #tpu.memory_space<vmem>>, vector<1x64x128xf32>,
    %c3 = arith.constant 3 : index
    %c0_60 = arith.constant 0 : index
    %c0_61 = arith.constant 0 : index
    %102 = vector.load %arg2[%c3, %c0_60, %c0_61] : memref<8x64x64xf32, #tpu.memory_space<vmem>>, vector<1x64x64xf32>
    %103 = vector.shape_cast %102 : vector<1x64x64xf32> to vector<64x64xf32>
    %cst_62 = arith.constant 8.500000e-01 : f32
    %104 = vector.broadcast %cst_62 : f32 to vector<64x64xf32>
    %105 = arith.mulf %104, %77 : vector<64x64xf32>
    %cst_63 = arith.constant 6.66666651 : f32
    %106 = vector.broadcast %cst_63 : f32 to vector<64x64xf32>
    %107 = arith.mulf %106, %103 : vector<64x64xf32>
    %108 = arith.addf %105, %107 : vector<64x64xf32>
    %cst_64 = arith.constant 0.899999976 : f32
    %109 = vector.broadcast %cst_64 : f32 to vector<64x64xf32>
    %110 = arith.mulf %109, %82 : vector<64x64xf32>
    %cst_65 = arith.constant 1.000000e+01 : f32
    %111 = vector.broadcast %cst_65 : f32 to vector<64x64xf32>
    %112 = arith.mulf %111, %77 : vector<64x64xf32>
    %113 = arith.addf %110, %112 : vector<64x64xf32>
    %cst_66 = arith.constant 6.500000e-01 : f32
    %114 = vector.broadcast %cst_66 : f32 to vector<64x128xf32>
    %115 = arith.mulf %114, %87 : vector<64x128xf32>
    %cst_67 = arith.constant 1.000000e+00 : f32
    %116 = vector.broadcast %cst_67 : f32 to vector<64x128xf32>
    %117 = arith.mulf %116, %95 : vector<64x128xf32>
    %118 = arith.subf %115, %117 : vector<64x128xf32>
    %cst_68 = arith.constant dense<0.000000e+00> : vector<64x128xf32>
    %119 = tpu.matmul %113, %7, %cst_68 {dimension_numbers = #tpu.dot_dimension_numbers<[1], [0], [0], [1], [0, 0, 1, 1], [], []>} : vector<64x64xf32>, vector<64x128xf32>, vector<64x128xf32> -> vector<64x128xf32>
    %120 = vector.broadcast %8 : vector<1x128xf32> to vector<64x128xf32>
    %121 = arith.addf %119, %120 : vector<64x128xf32>
    %122 = arith.addf %121, %118 : vector<64x128xf32>
    %cst_69 = arith.constant 0.000000e+00 : f32
    %123 = vector.broadcast %cst_69 : f32 to vector<64x128xf32>
    %124 = arith.cmpf ogt, %122, %123 : vector<64x128xf32>
    %125 = arith.extui %124 : vector<64x128xi1> to vector<64x128xi32>
    %126 = arith.sitofp %125 : vector<64x128xi32> to vector<64x128xf32>
    %c3_70 = arith.constant 3 : index
    %c0_71 = arith.constant 0 : index
    %c0_72 = arith.constant 0 : index
    %127 = vector.load %arg10[%c3_70, %c0_71, %c0_72] : memref<8x64x128xf32, #tpu.memory_space<vmem>>, vector<1x64x128xf32>
    %128 = vector.shape_cast %127 : vector<1x64x128xf32> to vector<64x128xf32>
    %129 = vector.shape_cast %122 : vector<64x128xf32> to vector<1x64x128xf32>
    tpu.vector_store %arg10[%c3_70, %c0_71, %c0_72], %129 {strides = array<i32>} : memref<8x64x128xf32, #tpu.memory_space<vmem>>, vector<1x64x128xf32>,
    %c3_73 = arith.constant 3 : index
    %c0_74 = arith.constant 0 : index
    %c0_75 = arith.constant 0 : index
    %130 = vector.load %arg9[%c3_73, %c0_74, %c0_75] : memref<8x64x128xf32, #tpu.memory_space<vmem>>, vector<1x64x128xf32>
    %131 = vector.shape_cast %130 : vector<1x64x128xf32> to vector<64x128xf32>
    %132 = vector.shape_cast %126 : vector<64x128xf32> to vector<1x64x128xf32>
    tpu.vector_store %arg9[%c3_73, %c0_74, %c0_75], %132 {strides = array<i32>} : memref<8x64x128xf32, #tpu.memory_space<vmem>>, vector<1x64x128xf32>,
    %c4 = arith.constant 4 : index
    %c0_76 = arith.constant 0 : index
    %c0_77 = arith.constant 0 : index
    %133 = vector.load %arg2[%c4, %c0_76, %c0_77] : memref<8x64x64xf32, #tpu.memory_space<vmem>>, vector<1x64x64xf32>
    %134 = vector.shape_cast %133 : vector<1x64x64xf32> to vector<64x64xf32>
    %cst_78 = arith.constant 8.500000e-01 : f32
    %135 = vector.broadcast %cst_78 : f32 to vector<64x64xf32>
    %136 = arith.mulf %135, %108 : vector<64x64xf32>
    %cst_79 = arith.constant 6.66666651 : f32
    %137 = vector.broadcast %cst_79 : f32 to vector<64x64xf32>
    %138 = arith.mulf %137, %134 : vector<64x64xf32>
    %139 = arith.addf %136, %138 : vector<64x64xf32>
    %cst_80 = arith.constant 0.899999976 : f32
    %140 = vector.broadcast %cst_80 : f32 to vector<64x64xf32>
    %141 = arith.mulf %140, %113 : vector<64x64xf32>
    %cst_81 = arith.constant 1.000000e+01 : f32
    %142 = vector.broadcast %cst_81 : f32 to vector<64x64xf32>
    %143 = arith.mulf %142, %108 : vector<64x64xf32>
    %144 = arith.addf %141, %143 : vector<64x64xf32>
    %cst_82 = arith.constant 6.500000e-01 : f32
    %145 = vector.broadcast %cst_82 : f32 to vector<64x128xf32>
    %146 = arith.mulf %145, %118 : vector<64x128xf32>
    %cst_83 = arith.constant 1.000000e+00 : f32
    %147 = vector.broadcast %cst_83 : f32 to vector<64x128xf32>
    %148 = arith.mulf %147, %126 : vector<64x128xf32>
    %149 = arith.subf %146, %148 : vector<64x128xf32>
    %cst_84 = arith.constant dense<0.000000e+00> : vector<64x128xf32>
    %150 = tpu.matmul %144, %7, %cst_84 {dimension_numbers = #tpu.dot_dimension_numbers<[1], [0], [0], [1], [0, 0, 1, 1], [], []>} : vector<64x64xf32>, vector<64x128xf32>, vector<64x128xf32> -> vector<64x128xf32>
    %151 = vector.broadcast %8 : vector<1x128xf32> to vector<64x128xf32>
    %152 = arith.addf %150, %151 : vector<64x128xf32>
    %153 = arith.addf %152, %149 : vector<64x128xf32>
    %cst_85 = arith.constant 0.000000e+00 : f32
    %154 = vector.broadcast %cst_85 : f32 to vector<64x128xf32>
    %155 = arith.cmpf ogt, %153, %154 : vector<64x128xf32>
    %156 = arith.extui %155 : vector<64x128xi1> to vector<64x128xi32>
    %157 = arith.sitofp %156 : vector<64x128xi32> to vector<64x128xf32>
    %c4_86 = arith.constant 4 : index
    %c0_87 = arith.constant 0 : index
    %c0_88 = arith.constant 0 : index
    %158 = vector.load %arg10[%c4_86, %c0_87, %c0_88] : memref<8x64x128xf32, #tpu.memory_space<vmem>>, vector<1x64x128xf32>
    %159 = vector.shape_cast %158 : vector<1x64x128xf32> to vector<64x128xf32>
    %160 = vector.shape_cast %153 : vector<64x128xf32> to vector<1x64x128xf32>
    tpu.vector_store %arg10[%c4_86, %c0_87, %c0_88], %160 {strides = array<i32>} : memref<8x64x128xf32, #tpu.memory_space<vmem>>, vector<1x64x128xf32>,
    %c4_89 = arith.constant 4 : index
    %c0_90 = arith.constant 0 : index
    %c0_91 = arith.constant 0 : index
    %161 = vector.load %arg9[%c4_89, %c0_90, %c0_91] : memref<8x64x128xf32, #tpu.memory_space<vmem>>, vector<1x64x128xf32>
    %162 = vector.shape_cast %161 : vector<1x64x128xf32> to vector<64x128xf32>
    %163 = vector.shape_cast %157 : vector<64x128xf32> to vector<1x64x128xf32>
    tpu.vector_store %arg9[%c4_89, %c0_90, %c0_91], %163 {strides = array<i32>} : memref<8x64x128xf32, #tpu.memory_space<vmem>>, vector<1x64x128xf32>,
    %c5 = arith.constant 5 : index
    %c0_92 = arith.constant 0 : index
    %c0_93 = arith.constant 0 : index
    %164 = vector.load %arg2[%c5, %c0_92, %c0_93] : memref<8x64x64xf32, #tpu.memory_space<vmem>>, vector<1x64x64xf32>
    %165 = vector.shape_cast %164 : vector<1x64x64xf32> to vector<64x64xf32>
    %cst_94 = arith.constant 8.500000e-01 : f32
    %166 = vector.broadcast %cst_94 : f32 to vector<64x64xf32>
    %167 = arith.mulf %166, %139 : vector<64x64xf32>
    %cst_95 = arith.constant 6.66666651 : f32
    %168 = vector.broadcast %cst_95 : f32 to vector<64x64xf32>
    %169 = arith.mulf %168, %165 : vector<64x64xf32>
    %170 = arith.addf %167, %169 : vector<64x64xf32>
    %cst_96 = arith.constant 0.899999976 : f32
    %171 = vector.broadcast %cst_96 : f32 to vector<64x64xf32>
    %172 = arith.mulf %171, %144 : vector<64x64xf32>
    %cst_97 = arith.constant 1.000000e+01 : f32
    %173 = vector.broadcast %cst_97 : f32 to vector<64x64xf32>
    %174 = arith.mulf %173, %139 : vector<64x64xf32>
    %175 = arith.addf %172, %174 : vector<64x64xf32>
    %cst_98 = arith.constant 6.500000e-01 : f32
    %176 = vector.broadcast %cst_98 : f32 to vector<64x128xf32>
    %177 = arith.mulf %176, %149 : vector<64x128xf32>
    %cst_99 = arith.constant 1.000000e+00 : f32
    %178 = vector.broadcast %cst_99 : f32 to vector<64x128xf32>
    %179 = arith.mulf %178, %157 : vector<64x128xf32>
    %180 = arith.subf %177, %179 : vector<64x128xf32>
    %cst_100 = arith.constant dense<0.000000e+00> : vector<64x128xf32>
    %181 = tpu.matmul %175, %7, %cst_100 {dimension_numbers = #tpu.dot_dimension_numbers<[1], [0], [0], [1], [0, 0, 1, 1], [], []>} : vector<64x64xf32>, vector<64x128xf32>, vector<64x128xf32> -> vector<64x128xf32>
    %182 = vector.broadcast %8 : vector<1x128xf32> to vector<64x128xf32>
    %183 = arith.addf %181, %182 : vector<64x128xf32>
    %184 = arith.addf %183, %180 : vector<64x128xf32>
    %cst_101 = arith.constant 0.000000e+00 : f32
    %185 = vector.broadcast %cst_101 : f32 to vector<64x128xf32>
    %186 = arith.cmpf ogt, %184, %185 : vector<64x128xf32>
    %187 = arith.extui %186 : vector<64x128xi1> to vector<64x128xi32>
    %188 = arith.sitofp %187 : vector<64x128xi32> to vector<64x128xf32>
    %c5_102 = arith.constant 5 : index
    %c0_103 = arith.constant 0 : index
    %c0_104 = arith.constant 0 : index
    %189 = vector.load %arg10[%c5_102, %c0_103, %c0_104] : memref<8x64x128xf32, #tpu.memory_space<vmem>>, vector<1x64x128xf32>
    %190 = vector.shape_cast %189 : vector<1x64x128xf32> to vector<64x128xf32>
    %191 = vector.shape_cast %184 : vector<64x128xf32> to vector<1x64x128xf32>
    tpu.vector_store %arg10[%c5_102, %c0_103, %c0_104], %191 {strides = array<i32>} : memref<8x64x128xf32, #tpu.memory_space<vmem>>, vector<1x64x128xf32>,
    %c5_105 = arith.constant 5 : index
    %c0_106 = arith.constant 0 : index
    %c0_107 = arith.constant 0 : index
    %192 = vector.load %arg9[%c5_105, %c0_106, %c0_107] : memref<8x64x128xf32, #tpu.memory_space<vmem>>, vector<1x64x128xf32>
    %193 = vector.shape_cast %192 : vector<1x64x128xf32> to vector<64x128xf32>
    %194 = vector.shape_cast %188 : vector<64x128xf32> to vector<1x64x128xf32>
    tpu.vector_store %arg9[%c5_105, %c0_106, %c0_107], %194 {strides = array<i32>} : memref<8x64x128xf32, #tpu.memory_space<vmem>>, vector<1x64x128xf32>,
    %c6 = arith.constant 6 : index
    %c0_108 = arith.constant 0 : index
    %c0_109 = arith.constant 0 : index
    %195 = vector.load %arg2[%c6, %c0_108, %c0_109] : memref<8x64x64xf32, #tpu.memory_space<vmem>>, vector<1x64x64xf32>
    %196 = vector.shape_cast %195 : vector<1x64x64xf32> to vector<64x64xf32>
    %cst_110 = arith.constant 8.500000e-01 : f32
    %197 = vector.broadcast %cst_110 : f32 to vector<64x64xf32>
    %198 = arith.mulf %197, %170 : vector<64x64xf32>
    %cst_111 = arith.constant 6.66666651 : f32
    %199 = vector.broadcast %cst_111 : f32 to vector<64x64xf32>
    %200 = arith.mulf %199, %196 : vector<64x64xf32>
    %201 = arith.addf %198, %200 : vector<64x64xf32>
    %cst_112 = arith.constant 0.899999976 : f32
    %202 = vector.broadcast %cst_112 : f32 to vector<64x64xf32>
    %203 = arith.mulf %202, %175 : vector<64x64xf32>
    %cst_113 = arith.constant 1.000000e+01 : f32
    %204 = vector.broadcast %cst_113 : f32 to vector<64x64xf32>
    %205 = arith.mulf %204, %170 : vector<64x64xf32>
    %206 = arith.addf %203, %205 : vector<64x64xf32>
    %cst_114 = arith.constant 6.500000e-01 : f32
    %207 = vector.broadcast %cst_114 : f32 to vector<64x128xf32>
    %208 = arith.mulf %207, %180 : vector<64x128xf32>
    %cst_115 = arith.constant 1.000000e+00 : f32
    %209 = vector.broadcast %cst_115 : f32 to vector<64x128xf32>
    %210 = arith.mulf %209, %188 : vector<64x128xf32>
    %211 = arith.subf %208, %210 : vector<64x128xf32>
    %cst_116 = arith.constant dense<0.000000e+00> : vector<64x128xf32>
    %212 = tpu.matmul %206, %7, %cst_116 {dimension_numbers = #tpu.dot_dimension_numbers<[1], [0], [0], [1], [0, 0, 1, 1], [], []>} : vector<64x64xf32>, vector<64x128xf32>, vector<64x128xf32> -> vector<64x128xf32>
    %213 = vector.broadcast %8 : vector<1x128xf32> to vector<64x128xf32>
    %214 = arith.addf %212, %213 : vector<64x128xf32>
    %215 = arith.addf %214, %211 : vector<64x128xf32>
    %cst_117 = arith.constant 0.000000e+00 : f32
    %216 = vector.broadcast %cst_117 : f32 to vector<64x128xf32>
    %217 = arith.cmpf ogt, %215, %216 : vector<64x128xf32>
    %218 = arith.extui %217 : vector<64x128xi1> to vector<64x128xi32>
    %219 = arith.sitofp %218 : vector<64x128xi32> to vector<64x128xf32>
    %c6_118 = arith.constant 6 : index
    %c0_119 = arith.constant 0 : index
    %c0_120 = arith.constant 0 : index
    %220 = vector.load %arg10[%c6_118, %c0_119, %c0_120] : memref<8x64x128xf32, #tpu.memory_space<vmem>>, vector<1x64x128xf32>
    %221 = vector.shape_cast %220 : vector<1x64x128xf32> to vector<64x128xf32>
    %222 = vector.shape_cast %215 : vector<64x128xf32> to vector<1x64x128xf32>
    tpu.vector_store %arg10[%c6_118, %c0_119, %c0_120], %222 {strides = array<i32>} : memref<8x64x128xf32, #tpu.memory_space<vmem>>, vector<1x64x128xf32>,
    %c6_121 = arith.constant 6 : index
    %c0_122 = arith.constant 0 : index
    %c0_123 = arith.constant 0 : index
    %223 = vector.load %arg9[%c6_121, %c0_122, %c0_123] : memref<8x64x128xf32, #tpu.memory_space<vmem>>, vector<1x64x128xf32>
    %224 = vector.shape_cast %223 : vector<1x64x128xf32> to vector<64x128xf32>
    %225 = vector.shape_cast %219 : vector<64x128xf32> to vector<1x64x128xf32>
    tpu.vector_store %arg9[%c6_121, %c0_122, %c0_123], %225 {strides = array<i32>} : memref<8x64x128xf32, #tpu.memory_space<vmem>>, vector<1x64x128xf32>,
    %c7 = arith.constant 7 : index
    %c0_124 = arith.constant 0 : index
    %c0_125 = arith.constant 0 : index
    %226 = vector.load %arg2[%c7, %c0_124, %c0_125] : memref<8x64x64xf32, #tpu.memory_space<vmem>>, vector<1x64x64xf32>
    %227 = vector.shape_cast %226 : vector<1x64x64xf32> to vector<64x64xf32>
    %cst_126 = arith.constant 8.500000e-01 : f32
    %228 = vector.broadcast %cst_126 : f32 to vector<64x64xf32>
    %229 = arith.mulf %228, %201 : vector<64x64xf32>
    %cst_127 = arith.constant 6.66666651 : f32
    %230 = vector.broadcast %cst_127 : f32 to vector<64x64xf32>
    %231 = arith.mulf %230, %227 : vector<64x64xf32>
    %232 = arith.addf %229, %231 : vector<64x64xf32>
    %cst_128 = arith.constant 0.899999976 : f32
    %233 = vector.broadcast %cst_128 : f32 to vector<64x64xf32>
    %234 = arith.mulf %233, %206 : vector<64x64xf32>
    %cst_129 = arith.constant 1.000000e+01 : f32
    %235 = vector.broadcast %cst_129 : f32 to vector<64x64xf32>
    %236 = arith.mulf %235, %201 : vector<64x64xf32>
    %237 = arith.addf %234, %236 : vector<64x64xf32>
    %cst_130 = arith.constant 6.500000e-01 : f32
    %238 = vector.broadcast %cst_130 : f32 to vector<64x128xf32>
    %239 = arith.mulf %238, %211 : vector<64x128xf32>
    %cst_131 = arith.constant 1.000000e+00 : f32
    %240 = vector.broadcast %cst_131 : f32 to vector<64x128xf32>
    %241 = arith.mulf %240, %219 : vector<64x128xf32>
    %242 = arith.subf %239, %241 : vector<64x128xf32>
    %cst_132 = arith.constant dense<0.000000e+00> : vector<64x128xf32>
    %243 = tpu.matmul %237, %7, %cst_132 {dimension_numbers = #tpu.dot_dimension_numbers<[1], [0], [0], [1], [0, 0, 1, 1], [], []>} : vector<64x64xf32>, vector<64x128xf32>, vector<64x128xf32> -> vector<64x128xf32>
    %244 = vector.broadcast %8 : vector<1x128xf32> to vector<64x128xf32>
    %245 = arith.addf %243, %244 : vector<64x128xf32>
    %246 = arith.addf %245, %242 : vector<64x128xf32>
    %cst_133 = arith.constant 0.000000e+00 : f32
    %247 = vector.broadcast %cst_133 : f32 to vector<64x128xf32>
    %248 = arith.cmpf ogt, %246, %247 : vector<64x128xf32>
    %249 = arith.extui %248 : vector<64x128xi1> to vector<64x128xi32>
    %250 = arith.sitofp %249 : vector<64x128xi32> to vector<64x128xf32>
    %c7_134 = arith.constant 7 : index
    %c0_135 = arith.constant 0 : index
    %c0_136 = arith.constant 0 : index
    %251 = vector.load %arg10[%c7_134, %c0_135, %c0_136] : memref<8x64x128xf32, #tpu.memory_space<vmem>>, vector<1x64x128xf32>
    %252 = vector.shape_cast %251 : vector<1x64x128xf32> to vector<64x128xf32>
    %253 = vector.shape_cast %246 : vector<64x128xf32> to vector<1x64x128xf32>
    tpu.vector_store %arg10[%c7_134, %c0_135, %c0_136], %253 {strides = array<i32>} : memref<8x64x128xf32, #tpu.memory_space<vmem>>, vector<1x64x128xf32>,
    %c7_137 = arith.constant 7 : index
    %c0_138 = arith.constant 0 : index
    %c0_139 = arith.constant 0 : index
    %254 = vector.load %arg9[%c7_137, %c0_138, %c0_139] : memref<8x64x128xf32, #tpu.memory_space<vmem>>, vector<1x64x128xf32>
    %255 = vector.shape_cast %254 : vector<1x64x128xf32> to vector<64x128xf32>
    %256 = vector.shape_cast %250 : vector<64x128xf32> to vector<1x64x128xf32>
    tpu.vector_store %arg9[%c7_137, %c0_138, %c0_139], %256 {strides = array<i32>} : memref<8x64x128xf32, #tpu.memory_space<vmem>>, vector<1x64x128xf32>,
    %c0_140 = arith.constant 0 : index
    %c0_141 = arith.constant 0 : index
    %257 = vector.load %arg15[%c0_140, %c0_141] : memref<64x64xf32, #tpu.memory_space<vmem>>, vector<64x64xf32>
    tpu.vector_store %arg15[%c0_140, %c0_141], %237 {strides = array<i32>} : memref<64x64xf32, #tpu.memory_space<vmem>>, vector<64x64xf32>,
    %c0_142 = arith.constant 0 : index
    %c0_143 = arith.constant 0 : index
    %258 = vector.load %arg16[%c0_142, %c0_143] : memref<64x64xf32, #tpu.memory_space<vmem>>, vector<64x64xf32>
    tpu.vector_store %arg16[%c0_142, %c0_143], %232 {strides = array<i32>} : memref<64x64xf32, #tpu.memory_space<vmem>>, vector<64x64xf32>,
    %c0_144 = arith.constant 0 : index
    %c0_145 = arith.constant 0 : index
    %259 = vector.load %arg17[%c0_144, %c0_145] : memref<64x128xf32, #tpu.memory_space<vmem>>, vector<64x128xf32>
    tpu.vector_store %arg17[%c0_144, %c0_145], %242 {strides = array<i32>} : memref<64x128xf32, #tpu.memory_space<vmem>>, vector<64x128xf32>,
    %c0_146 = arith.constant 0 : index
    %c0_147 = arith.constant 0 : index
    %260 = vector.load %arg18[%c0_146, %c0_147] : memref<64x128xf32, #tpu.memory_space<vmem>>, vector<64x128xf32>
    tpu.vector_store %arg18[%c0_146, %c0_147], %250 {strides = array<i32>} : memref<64x128xf32, #tpu.memory_space<vmem>>, vector<64x128xf32>,
    %c0_i32_148 = arith.constant 0 : i32
    %261 = arith.cmpi eq, %arg1, %c0_i32_148 : i32
    %262 = arith.extui %261 : i1 to i32
    %c0_i32_149 = arith.constant 0 : i32
    %263 = arith.cmpi ne, %262, %c0_i32_149 : i32
    scf.if %263 {
      %c0_150 = arith.constant 0 : index
      %c0_151 = arith.constant 0 : index
      %264 = vector.load %arg11[%c0_150, %c0_151] : memref<64x64xf32, #tpu.memory_space<vmem>>, vector<64x64xf32>
      tpu.vector_store %arg11[%c0_150, %c0_151], %237 {strides = array<i32>} : memref<64x64xf32, #tpu.memory_space<vmem>>, vector<64x64xf32>,
      %c0_152 = arith.constant 0 : index
      %c0_153 = arith.constant 0 : index
      %265 = vector.load %arg12[%c0_152, %c0_153] : memref<64x64xf32, #tpu.memory_space<vmem>>, vector<64x64xf32>
      tpu.vector_store %arg12[%c0_152, %c0_153], %232 {strides = array<i32>} : memref<64x64xf32, #tpu.memory_space<vmem>>, vector<64x64xf32>,
      %c0_154 = arith.constant 0 : index
      %c0_155 = arith.constant 0 : index
      %266 = vector.load %arg13[%c0_154, %c0_155] : memref<64x128xf32, #tpu.memory_space<vmem>>, vector<64x128xf32>
      tpu.vector_store %arg13[%c0_154, %c0_155], %242 {strides = array<i32>} : memref<64x128xf32, #tpu.memory_space<vmem>>, vector<64x128xf32>,
      %c0_156 = arith.constant 0 : index
      %c0_157 = arith.constant 0 : index
      %267 = vector.load %arg14[%c0_156, %c0_157] : memref<64x128xf32, #tpu.memory_space<vmem>>, vector<64x128xf32>
      tpu.vector_store %arg14[%c0_156, %c0_157], %250 {strides = array<i32>} : memref<64x128xf32, #tpu.memory_space<vmem>>, vector<64x128xf32>,
    } else {
    }
    return
  }
  func.func @transform_0(%arg0: i32, %arg1: i32) -> (i32, i32, i32) {
    %c0_i32 = arith.constant 0 : i32
    %c0_i32_0 = arith.constant 0 : i32
    return %arg1, %arg0, %c0_i32 : i32, i32, i32
  }
  func.func @transform_1(%arg0: i32, %arg1: i32) -> (i32, i32) {
    %c0_i32 = arith.constant 0 : i32
    %c0_i32_0 = arith.constant 0 : i32
    return %arg0, %c0_i32 : i32, i32
  }
  func.func @transform_2(%arg0: i32, %arg1: i32) -> (i32, i32) {
    %c0_i32 = arith.constant 0 : i32
    %c0_i32_0 = arith.constant 0 : i32
    return %arg0, %c0_i32 : i32, i32
  }
  func.func @transform_3(%arg0: i32, %arg1: i32) -> (i32, i32) {
    %c0_i32 = arith.constant 0 : i32
    %c0_i32_0 = arith.constant 0 : i32
    return %arg0, %c0_i32 : i32, i32
  }
  func.func @transform_4(%arg0: i32, %arg1: i32) -> (i32, i32) {
    %c0_i32 = arith.constant 0 : i32
    %c0_i32_0 = arith.constant 0 : i32
    return %arg0, %c0_i32 : i32, i32
  }
  func.func @transform_5(%arg0: i32, %arg1: i32) -> (i32, i32) {
    %c0_i32 = arith.constant 0 : i32
    %c0_i32_0 = arith.constant 0 : i32
    %c0_i32_1 = arith.constant 0 : i32
    return %c0_i32, %c0_i32_0 : i32, i32
  }
  func.func @transform_6(%arg0: i32, %arg1: i32) -> (i32, i32) {
    %c0_i32 = arith.constant 0 : i32
    %c0_i32_0 = arith.constant 0 : i32
    %c0_i32_1 = arith.constant 0 : i32
    return %c0_i32, %c0_i32_0 : i32, i32
  }
  func.func @transform_7(%arg0: i32, %arg1: i32) -> (i32, i32, i32) {
    %c0_i32 = arith.constant 0 : i32
    %c0_i32_0 = arith.constant 0 : i32
    return %arg1, %arg0, %c0_i32 : i32, i32, i32
  }
  func.func @transform_8(%arg0: i32, %arg1: i32) -> (i32, i32, i32) {
    %c0_i32 = arith.constant 0 : i32
    %c0_i32_0 = arith.constant 0 : i32
    return %arg1, %arg0, %c0_i32 : i32, i32, i32
  }
  func.func @transform_9(%arg0: i32, %arg1: i32) -> (i32, i32) {
    %c0_i32 = arith.constant 0 : i32
    %c0_i32_0 = arith.constant 0 : i32
    return %arg0, %c0_i32 : i32, i32
  }
  func.func @transform_10(%arg0: i32, %arg1: i32) -> (i32, i32) {
    %c0_i32 = arith.constant 0 : i32
    %c0_i32_0 = arith.constant 0 : i32
    return %arg0, %c0_i32 : i32, i32
  }
  func.func @transform_11(%arg0: i32, %arg1: i32) -> (i32, i32) {
    %c0_i32 = arith.constant 0 : i32
    %c0_i32_0 = arith.constant 0 : i32
    return %arg0, %c0_i32 : i32, i32
  }
  func.func @transform_12(%arg0: i32, %arg1: i32) -> (i32, i32) {
    %c0_i32 = arith.constant 0 : i32
    %c0_i32_0 = arith.constant 0 : i32
    return %arg0, %c0_i32 : i32, i32
  }
}

</mosaic_0001>

<bundles_post_ra>
// kernel: lif_rollout.1
= control target key start
LH: loop header
LB: loop body
LE: loop exit
PB: predicated region body
PF: predicated region fallthrough
CT: control target
= control target key end

     0   :  { %s5989_s0 = inlined_call_operand.vmem [shape: f32[8,128,64], index: 0, kind: input, shape index: {}]   ;;  %s5990_s1 = inlined_call_operand.vmem [shape: f32[128,64], index: 1, kind: input, shape index: {}]   ;;  %s5991_s2 = inlined_call_operand.vmem [shape: f32[128,64], index: 2, kind: input, shape index: {}]   ;;  %s5992_s3 = inlined_call_operand.vmem [shape: f32[128,128], index: 3, kind: input, shape index: {}]   ;;  %s5993_s4 = inlined_call_operand.vmem [shape: f32[128,128], index: 4, kind: input, shape index: {}]   ;;  %s5994_s5 = inlined_call_operand.vmem [shape: f32[64,128], index: 5, kind: input, shape index: {}]   ;;  %s5995_s6 = inlined_call_operand.vmem [shape: f32[1,128], index: 6, kind: input, shape index: {}]   ;;  %s5996_s7 = inlined_call_operand.hbm [shape: f32[8,128,128], index: 7, kind: output, shape index: {0}]   ;;  %s5997_s8 = inlined_call_operand.hbm [shape: f32[8,128,128], index: 8, kind: output, shape index: {1}]   ;;  %s5998_s9 = inlined_call_operand.vmem [shape: f32[128,64], index: 9, kind: output, shape index: {2}]   ;;  %s5999_s10 = inlined_call_operand.vmem [shape: f32[128,64], index: 10, kind: output, shape index: {3}]   ;;  %s6000_s11 = inlined_call_operand.hbm [shape: f32[128,128], index: 11, kind: output, shape index: {4}]   ;;  %s6001_s12 = inlined_call_operand.hbm [shape: f32[128,128], index: 12, kind: output, shape index: {5}]  }
   0x1   :  { %6007 = sst [smem:[#allocation25_spill]] %s5989_s0 }
   0x2   :  { %6008 = sst [smem:[#allocation26_spill]] %s5990_s1 }
   0x3   :  { %6009 = sst [smem:[#allocation27_spill]] %s5991_s2 }
   0x4   :  { %6010 = sst [smem:[#allocation28_spill]] %s5992_s3 }
   0x5   :  { %18 = vsyncpa [#allocation8], 0 }
   0x6   :  { %20 = vsyncpa [#allocation8 + $0x1], 0 }
   0x7   :  { %21 = vsyncpa [#allocation10], 0 }
   0x8   :  { %23 = vsyncpa [#allocation10 + $0x1], 0 }
   0x9   :  { %24 = vsyncpa [#allocation13], 0 }
   0xa   :  { %26 = vsyncpa [#allocation13 + $0x1], 0  ;;  %s4619_s21 = smov 0   ;;  %s4621_s22 = smov 0  }
   0xb   :  { %s4623_s23 = smov 0   ;;  %s4625_s24 = smov 0  }
   0xc   :  { %s4627_s25 = smov 0   ;;  %s4629_s26 = smov 0  }
   0xd LB: > { %6011 = sst [smem:[#allocation21_spill]] %s4523_s23  ;;  %s6003_s27 = sadd.s32 4294967295, %s4535_s26   ;;  %s4535_s26 = sphi %s4629_s26, %s32_s26   ;;  %s4531_s25 = sphi %s4627_s25, %s6029_s25   ;;  %s4527_s24 = sphi %s4625_s24, %s6028_s24   ;;  %s4523_s23 = sphi %s4623_s23, %s6027_s23   ;;  %s4519_s22 = sphi %s4621_s22, %s6031_s22   ;;  %s4515_s21 = sphi %s4619_s21, %s6030_s21  }
   0xe   : > { %6012 = sst [smem:[#allocation22_spill]] %s4531_s25  ;;  %s6002_s28 = sadd.s32 4294967294, %s4535_s26  }
   0xf   : > { %s44_s29 = sadd.s32 1, %s4531_s25  ;;  %s53_s30 = sadd.s32 1, %s4523_s23 }
  0x10   : > { %p46_p0 = scmp.ge.s32.totalorder %s44_s29, 2  ;;  %p60_p1 = scmp.ne.s32.totalorder %s4523_s23, %s4519_s22 }
  0x11   : > { %p61_p2 = scmp.eq.s32.totalorder %s4535_s26, 0  ;;  %p238_p3 = scmp.eq.s32.totalorder %s6003_s27, 1 }
  0x12   : > { %s6033_s29 = smov (%p46_p0, %s44_s29), 0  ;;  %p243_p6 = scmp.ne.s32.totalorder %s4519_s22, %s4515_s21 }
  0x13   : > { %6013 = sst [smem:[#allocation23_spill]] %s6033_s29  ;;  %p62_p4 = por %p61_p2, %p60_p1 }
  0x14   : > { %p4660_p5 = por %p238_p3, %p60_p1  ;;  %s49_s14 = ssub.s32 %s4531_s25, %s6033_s29 }
  0x15   : > { %p51_p7 = scmp.eq.s32.totalorder %s49_s14, 0  ;;  %p244_p8 = scmp.eq.s32.totalorder %s6002_s28, 1 }
  0x16   : > { %p3505_p10 = scmp.ge.s32.totalorder %s4535_s26, 2 }
  0x17   : > { %s4671_s15 = scalar_select %p51_p7, %s4523_s23, %s53_s30  }
  0x18   : > { %p4673_p9 = por %p244_p8, %p243_p6  ;;  %398 = sbr.rel (%p3505_p10) target bundleno = 73 (0x49), region = 24 }
  0x19   : > { %6015 = sst [smem:[#allocation24_spill]] %s4671_s15 }
  0x1f   : > { %401 = sbr.rel (!%p62_p4) target bundleno = 73 (0x49), region = 28  ;;  %s403_s17 = sand.u32 (%p62_p4), 1, %s4523_s23  }
  0x20   : > { %s3838_s18 = sshll.u32 (%p62_p4), %s4531_s25, 6  ;;  %s3506_s19 = sshll.u32 (%p62_p4), %s403_s17, 9 }
  0x21   : > { %s6017_s0 = sld [smem:[#allocation25_spill]] (%p62_p4)  ;;  %s4690_s28 = scalar_lea.vmem (%p62_p4), [#allocation6], %s3506_s19 }
  0x27   : > { %s4685_s30 = scalar_lea.vmem %s6017_s0, %s3838_s18 }
  0x28   : > { %v565_v0 = vld [vmem:[%s4685_s30] sm:$0xff]  ;;  %v567_v1 = vld [vmem:[%s4685_s30 + $0x8] sm:$0xff]  ;;  %v569_v2 = vld [vmem:[%s4685_s30 + $0x10] sm:$0xff] }
  0x29   : > { %566 = vst [vmem:[%s4690_s28] sm:$0xff] %v565_v0  ;;  %568 = vst [vmem:[%s4690_s28 + $0x8] sm:$0xff] %v567_v1  ;;  %v571_v3 = vld [vmem:[%s4685_s30 + $0x18] sm:$0xff]  ;;  %v573_v4 = vld [vmem:[%s4685_s30 + $0x20] sm:$0xff] }
  0x2a   : > { %570 = vst [vmem:[%s4690_s28 + $0x10] sm:$0xff] %v569_v2  ;;  %v575_v5 = vld [vmem:[%s4685_s30 + $0x28] sm:$0xff]  ;;  %572 = vst [vmem:[%s4690_s28 + $0x18] sm:$0xff] %v571_v3  ;;  %v577_v6 = vld [vmem:[%s4685_s30 + $0x30] sm:$0xff] }
  0x2b   : > { %574 = vst [vmem:[%s4690_s28 + $0x20] sm:$0xff] %v573_v4  ;;  %576 = vst [vmem:[%s4690_s28 + $0x28] sm:$0xff] %v575_v5  ;;  %v579_v7 = vld [vmem:[%s4685_s30 + $0x38] sm:$0xff]  ;;  %v581_v8 = vld [vmem:[%s4685_s30 + $0x80] sm:$0xff] }
  0x2c   : > { %578 = vst [vmem:[%s4690_s28 + $0x30] sm:$0xff] %v577_v6  ;;  %580 = vst [vmem:[%s4690_s28 + $0x38] sm:$0xff] %v579_v7  ;;  %v583_v9 = vld [vmem:[%s4685_s30 + $0x88] sm:$0xff]  ;;  %v585_v10 = vld [vmem:[%s4685_s30 + $0x90] sm:$0xff] }
  0x2d   : > { %582 = vst [vmem:[%s4690_s28 + $0x40] sm:$0xff] %v581_v8  ;;  %v587_v11 = vld [vmem:[%s4685_s30 + $0x98] sm:$0xff]  ;;  %584 = vst [vmem:[%s4690_s28 + $0x48] sm:$0xff] %v583_v9  ;;  %v589_v12 = vld [vmem:[%s4685_s30 + $0xa0] sm:$0xff] }
  0x2e   : > { %586 = vst [vmem:[%s4690_s28 + $0x50] sm:$0xff] %v585_v10  ;;  %588 = vst [vmem:[%s4690_s28 + $0x58] sm:$0xff] %v587_v11  ;;  %v591_v13 = vld [vmem:[%s4685_s30 + $0xa8] sm:$0xff]  ;;  %v593_v14 = vld [vmem:[%s4685_s30 + $0xb0] sm:$0xff] }
  0x2f   : > { %590 = vst [vmem:[%s4690_s28 + $0x60] sm:$0xff] %v589_v12  ;;  %592 = vst [vmem:[%s4690_s28 + $0x68] sm:$0xff] %v591_v13  ;;  %v595_v15 = vld [vmem:[%s4685_s30 + $0xb8] sm:$0xff]  ;;  %v597_v16 = vld [vmem:[%s4685_s30 + $0x100] sm:$0xff] }
  0x30   : > { %594 = vst [vmem:[%s4690_s28 + $0x70] sm:$0xff] %v593_v14  ;;  %v599_v17 = vld [vmem:[%s4685_s30 + $0x108] sm:$0xff]  ;;  %596 = vst [vmem:[%s4690_s28 + $0x78] sm:$0xff] %v595_v15  ;;  %v601_v18 = vld [vmem:[%s4685_s30 + $0x110] sm:$0xff] }
  0x31   : > { %598 = vst [vmem:[%s4690_s28 + $0x80] sm:$0xff] %v597_v16  ;;  %600 = vst [vmem:[%s4690_s28 + $0x88] sm:$0xff] %v599_v17  ;;  %v603_v19 = vld [vmem:[%s4685_s30 + $0x118] sm:$0xff]  ;;  %v605_v20 = vld [vmem:[%s4685_s30 + $0x120] sm:$0xff] }
  0x32   : > { %602 = vst [vmem:[%s4690_s28 + $0x90] sm:$0xff] %v601_v18  ;;  %604 = vst [vmem:[%s4690_s28 + $0x98] sm:$0xff] %v603_v19  ;;  %v607_v21 = vld [vmem:[%s4685_s30 + $0x128] sm:$0xff]  ;;  %v609_v22 = vld [vmem:[%s4685_s30 + $0x130] sm:$0xff] }
  0x33   : > { %606 = vst [vmem:[%s4690_s28 + $0xa0] sm:$0xff] %v605_v20  ;;  %v611_v23 = vld [vmem:[%s4685_s30 + $0x138] sm:$0xff]  ;;  %608 = vst [vmem:[%s4690_s28 + $0xa8] sm:$0xff] %v607_v21  ;;  %v613_v24 = vld [vmem:[%s4685_s30 + $0x180] sm:$0xff] }
  0x34   : > { %610 = vst [vmem:[%s4690_s28 + $0xb0] sm:$0xff] %v609_v22  ;;  %612 = vst [vmem:[%s4690_s28 + $0xb8] sm:$0xff] %v611_v23  ;;  %v615_v25 = vld [vmem:[%s4685_s30 + $0x188] sm:$0xff]  ;;  %v617_v26 = vld [vmem:[%s4685_s30 + $0x190] sm:$0xff] }
  0x35   : > { %614 = vst [vmem:[%s4690_s28 + $0xc0] sm:$0xff] %v613_v24  ;;  %616 = vst [vmem:[%s4690_s28 + $0xc8] sm:$0xff] %v615_v25  ;;  %v619_v27 = vld [vmem:[%s4685_s30 + $0x198] sm:$0xff]  ;;  %v621_v28 = vld [vmem:[%s4685_s30 + $0x1a0] sm:$0xff] }
  0x36   : > { %618 = vst [vmem:[%s4690_s28 + $0xd0] sm:$0xff] %v617_v26  ;;  %v623_v29 = vld [vmem:[%s4685_s30 + $0x1a8] sm:$0xff]  ;;  %620 = vst [vmem:[%s4690_s28 + $0xd8] sm:$0xff] %v619_v27  ;;  %v625_v30 = vld [vmem:[%s4685_s30 + $0x1b0] sm:$0xff] }
  0x37   : > { %622 = vst [vmem:[%s4690_s28 + $0xe0] sm:$0xff] %v621_v28  ;;  %624 = vst [vmem:[%s4690_s28 + $0xe8] sm:$0xff] %v623_v29  ;;  %v627_v31 = vld [vmem:[%s4685_s30 + $0x1b8] sm:$0xff]  ;;  %v629_v32 = vld [vmem:[%s4685_s30 + $0x200] sm:$0xff] }
  0x38   : > { %626 = vst [vmem:[%s4690_s28 + $0xf0] sm:$0xff] %v625_v30  ;;  %628 = vst [vmem:[%s4690_s28 + $0xf8] sm:$0xff] %v627_v31  ;;  %v631_v33 = vld [vmem:[%s4685_s30 + $0x208] sm:$0xff]  ;;  %v633_v34 = vld [vmem:[%s4685_s30 + $0x210] sm:$0xff] }
  0x39   : > { %630 = vst [vmem:[%s4690_s28 + $0x100] sm:$0xff] %v629_v32  ;;  %v635_v35 = vld [vmem:[%s4685_s30 + $0x218] sm:$0xff]  ;;  %632 = vst [vmem:[%s4690_s28 + $0x108] sm:$0xff] %v631_v33  ;;  %v637_v36 = vld [vmem:[%s4685_s30 + $0x220] sm:$0xff] }
  0x3a   : > { %634 = vst [vmem:[%s4690_s28 + $0x110] sm:$0xff] %v633_v34  ;;  %636 = vst [vmem:[%s4690_s28 + $0x118] sm:$0xff] %v635_v35  ;;  %v639_v37 = vld [vmem:[%s4685_s30 + $0x228] sm:$0xff]  ;;  %v641_v38 = vld [vmem:[%s4685_s30 + $0x230] sm:$0xff] }
  0x3b   : > { %638 = vst [vmem:[%s4690_s28 + $0x120] sm:$0xff] %v637_v36  ;;  %640 = vst [vmem:[%s4690_s28 + $0x128] sm:$0xff] %v639_v37  ;;  %v643_v39 = vld [vmem:[%s4685_s30 + $0x238] sm:$0xff]  ;;  %v645_v40 = vld [vmem:[%s4685_s30 + $0x280] sm:$0xff] }
  0x3c   : > { %642 = vst [vmem:[%s4690_s28 + $0x130] sm:$0xff] %v641_v38  ;;  %v647_v41 = vld [vmem:[%s4685_s30 + $0x288] sm:$0xff]  ;;  %644 = vst [vmem:[%s4690_s28 + $0x138] sm:$0xff] %v643_v39  ;;  %v649_v42 = vld [vmem:[%s4685_s30 + $0x290] sm:$0xff] }
  0x3d   : > { %646 = vst [vmem:[%s4690_s28 + $0x140] sm:$0xff] %v645_v40  ;;  %648 = vst [vmem:[%s4690_s28 + $0x148] sm:$0xff] %v647_v41  ;;  %v651_v43 = vld [vmem:[%s4685_s30 + $0x298] sm:$0xff]  ;;  %v653_v44 = vld [vmem:[%s4685_s30 + $0x2a0] sm:$0xff] }
  0x3e   : > { %650 = vst [vmem:[%s4690_s28 + $0x150] sm:$0xff] %v649_v42  ;;  %652 = vst [vmem:[%s4690_s28 + $0x158] sm:$0xff] %v651_v43  ;;  %v655_v45 = vld [vmem:[%s4685_s30 + $0x2a8] sm:$0xff]  ;;  %v657_v46 = vld [vmem:[%s4685_s30 + $0x2b0] sm:$0xff] }
  0x3f   : > { %654 = vst [vmem:[%s4690_s28 + $0x160] sm:$0xff] %v653_v44  ;;  %v659_v47 = vld [vmem:[%s4685_s30 + $0x2b8] sm:$0xff]  ;;  %656 = vst [vmem:[%s4690_s28 + $0x168] sm:$0xff] %v655_v45  ;;  %v661_v48 = vld [vmem:[%s4685_s30 + $0x300] sm:$0xff] }
  0x40   : > { %658 = vst [vmem:[%s4690_s28 + $0x170] sm:$0xff] %v657_v46  ;;  %660 = vst [vmem:[%s4690_s28 + $0x178] sm:$0xff] %v659_v47  ;;  %v663_v49 = vld [vmem:[%s4685_s30 + $0x308] sm:$0xff]  ;;  %v665_v50 = vld [vmem:[%s4685_s30 + $0x310] sm:$0xff] }
  0x41   : > { %662 = vst [vmem:[%s4690_s28 + $0x180] sm:$0xff] %v661_v48  ;;  %664 = vst [vmem:[%s4690_s28 + $0x188] sm:$0xff] %v663_v49  ;;  %v667_v51 = vld [vmem:[%s4685_s30 + $0x318] sm:$0xff]  ;;  %v669_v52 = vld [vmem:[%s4685_s30 + $0x320] sm:$0xff] }
  0x42   : > { %666 = vst [vmem:[%s4690_s28 + $0x190] sm:$0xff] %v665_v50  ;;  %v671_v53 = vld [vmem:[%s4685_s30 + $0x328] sm:$0xff]  ;;  %668 = vst [vmem:[%s4690_s28 + $0x198] sm:$0xff] %v667_v51  ;;  %v673_v54 = vld [vmem:[%s4685_s30 + $0x330] sm:$0xff] }
  0x43   : > { %670 = vst [vmem:[%s4690_s28 + $0x1a0] sm:$0xff] %v669_v52  ;;  %672 = vst [vmem:[%s4690_s28 + $0x1a8] sm:$0xff] %v671_v53  ;;  %v675_v55 = vld [vmem:[%s4685_s30 + $0x338] sm:$0xff]  ;;  %v677_v56 = vld [vmem:[%s4685_s30 + $0x380] sm:$0xff] }
  0x44   : > { %674 = vst [vmem:[%s4690_s28 + $0x1b0] sm:$0xff] %v673_v54  ;;  %676 = vst [vmem:[%s4690_s28 + $0x1b8] sm:$0xff] %v675_v55  ;;  %v679_v57 = vld [vmem:[%s4685_s30 + $0x388] sm:$0xff]  ;;  %v681_v58 = vld [vmem:[%s4685_s30 + $0x390] sm:$0xff] }
  0x45   : > { %678 = vst [vmem:[%s4690_s28 + $0x1c0] sm:$0xff] %v677_v56  ;;  %v683_v59 = vld [vmem:[%s4685_s30 + $0x398] sm:$0xff]  ;;  %680 = vst [vmem:[%s4690_s28 + $0x1c8] sm:$0xff] %v679_v57  ;;  %v685_v60 = vld [vmem:[%s4685_s30 + $0x3a0] sm:$0xff] }
  0x46   : > { %682 = vst [vmem:[%s4690_s28 + $0x1d0] sm:$0xff] %v681_v58  ;;  %684 = vst [vmem:[%s4690_s28 + $0x1d8] sm:$0xff] %v683_v59  ;;  %v687_v61 = vld [vmem:[%s4685_s30 + $0x3a8] sm:$0xff]  ;;  %v689_v62 = vld [vmem:[%s4685_s30 + $0x3b0] sm:$0xff] }
  0x47   : > { %686 = vst [vmem:[%s4690_s28 + $0x1e0] sm:$0xff] %v685_v60  ;;  %688 = vst [vmem:[%s4690_s28 + $0x1e8] sm:$0xff] %v687_v61  ;;  %v691_v63 = vld [vmem:[%s4685_s30 + $0x3b8] sm:$0xff] }
  0x48   : > { %690 = vst [vmem:[%s4690_s28 + $0x1f0] sm:$0xff] %v689_v62  ;;  %692 = vst [vmem:[%s4690_s28 + $0x1f8] sm:$0xff] %v691_v63 }
  0x49 PF: > { %p3509_p11 = scmp.ge.s32.totalorder %s4535_s26, 1  ;;  %p733_p12 = scmp.lt.s32.totalorder %s4535_s26, 3 }
  0x4b   : > { %p734_p13 = pnand %p3509_p11, %p733_p12 }
  0x4c   : > { %v971_v0 = vld [vmem:[%s5994_s5] sm:$0xff] (!%p734_p13)  ;;  %v972_v1 = vld [vmem:[%s5994_s5 + $0x8] sm:$0xff] (!%p734_p13)  ;;  %v973_v2 = vld [vmem:[%s5994_s5 + $0x10] sm:$0xff] (!%p734_p13)  ;;  %s3515_s30 = sshll.u32 (!%p734_p13), %s4527_s24, 3  ;;  %s4830_s27 = sand.u32 (!%p734_p13), 1, %s4519_s22   ;;  %vm882_vm0 = vcmask (!%p734_p13), 523264  }
  0x4d   : > { %737 = sbr.rel (%p734_p13) target bundleno = 482 (0x1e2), region = 82  ;;  %v4832_v3 = vpack.c.bf16 (!%p734_p13), %v972_v1, %v971_v0  ;;  %v974_v4 = vld [vmem:[%s5994_s5 + $0x18] sm:$0xff] (!%p734_p13)  ;;  %p829_p0 = scmp.lt.s32.totalorder (!%p734_p13), %s3515_s30, 15  ;;  %v975_v6 = vld [vmem:[%s5994_s5 + $0x20] sm:$0xff] (!%p734_p13)  ;;  %v976_v7 = vld [vmem:[%s5994_s5 + $0x28] sm:$0xff] (!%p734_p13) }
  0x4e   : > { %s4838_s17 = sshll.u32 (!%p734_p13), %s4830_s27, 9  ;;  %v4840_v5 = vpack.c.bf16 (!%p734_p13), %v974_v4, %v973_v2  ;;  %v4859_v11 = vpack.c.bf16 (!%p734_p13), %v976_v7, %v975_v6  ;;  %v977_v12 = vld [vmem:[%s5994_s5 + $0x30] sm:$0xff] (!%p734_p13)  ;;  %v978_v13 = vld [vmem:[%s5994_s5 + $0x38] sm:$0xff] (!%p734_p13)  ;;  %s6018_s1 = sld [smem:[#allocation26_spill]] (!%p734_p13) }
  0x4f   : > { %4196 = vmatprep.subr.bf16.mxu0 (!%p734_p13), %v4832_v3  ;;  %4212 = vmatprep.subr.bf16.mxu1 (!%p734_p13), %v4832_v3  ;;  %s4851_s0 = scalar_lea.vmem (!%p734_p13), [#allocation6], %s4838_s17  ;;  %s6019_s2 = sld [smem:[#allocation27_spill]] (!%p734_p13)  ;;  %v4907_v29 = vpack.c.bf16 (!%p734_p13), %v978_v13, %v977_v12 }
  0x50   : > { %v980_v8 = vld [vmem:[%s4851_s0] sm:$0xff] (!%p734_p13)  ;;  %4198 = vmatpush3.bf16.msra.mxu0 (!%p734_p13), %v4832_v3  ;;  %4214 = vmatpush3.bf16.msra.mxu1 (!%p734_p13), %v4832_v3  ;;  %v981_v10 = vld [vmem:[%s4851_s0 + $0x8] sm:$0xff] (!%p734_p13)  ;;  %v982_v18 = vld [vmem:[%s4851_s0 + $0x10] sm:$0xff] (!%p734_p13)  ;;  %s6021_s3 = sld [smem:[#allocation28_spill]] (!%p734_p13) }
  0x51   : > { %v3544_v9 = vld [vmem:[%s4851_s0 + $0x40] sm:$0xff] (!%p734_p13)  ;;  %4200 = vmatprep.subr.bf16.mxu0 (!%p734_p13), %v4840_v5  ;;  %4216 = vmatprep.subr.bf16.mxu1 (!%p734_p13), %v4840_v5  ;;  %v4870_v14 = vmul.f32 (!%p734_p13), 6.6666665, %v980_v8  ;;  %v3545_v15 = vld [vmem:[%s4851_s0 + $0x48] sm:$0xff] (!%p734_p13)  ;;  %v983_v19 = vld [vmem:[%s4851_s0 + $0x18] sm:$0xff] (!%p734_p13) }
  0x52   : > { %v4885_v16 = vmul.f32 (!%p734_p13), 6.6666665, %v3544_v9  ;;  %v3585_v17 = vld [vmem:[%s4851_s0 + $0x88] sm:$0xff] (!%p734_p13)  ;;  %v4893_v23 = vmul.f32 (!%p734_p13), 6.6666665, %v981_v10  ;;  %v984_v24 = vld [vmem:[%s4851_s0 + $0x20] sm:$0xff] (!%p734_p13) }
  0x53   : > { %v4904_v28 = vmul.f32 (!%p734_p13), 6.6666665, %v3545_v15  ;;  %v4915_v32 = vmul.f32 (!%p734_p13), 6.6666665, %v3585_v17  ;;  %v4924_v37 = vmul.f32 (!%p734_p13), 6.6666665, %v982_v18 }
  0x54   : > { %s6035_s30 = smov (!%p829_p0, %s3515_s30), 15  ;;  %4202 = vmatpush3.bf16.msra.mxu0 %v4840_v5  ;;  %4218 = vmatpush3.bf16.msra.mxu1 %v4840_v5  ;;  %v4929_v38 = vmul.f32 6.6666665, %v983_v19  ;;  %v4940_v43 = vmul.f32 6.6666665, %v984_v24  ;;  %v985_v44 = vld [vmem:[%s4851_s0 + $0x28] sm:$0xff] }
  0x55   : > { %s4868_s20 = sshll.u32 %s6035_s30, 3  ;;  %4204 = vmatprep.subr.bf16.mxu0 %v4859_v11  ;;  %4220 = vmatprep.subr.bf16.mxu1 %v4859_v11  ;;  %v986_v45 = vld [vmem:[%s4851_s0 + $0x30] sm:$0xff]  ;;  %v4947_v46 = vmul.f32 6.6666665, %v985_v44  ;;  %v987_v48 = vld [vmem:[%s4851_s0 + $0x38] sm:$0xff]  ;;  %s3068_s30 = scalar_lea.sflag [#allocation8], %s4830_s27 }
  0x56   : > { %s4877_s15 = scalar_lea.vmem %s6018_s1, %s4868_s20  ;;  %s4883_s28 = scalar_lea.vmem %s6019_s2, %s4868_s20  ;;  %v4949_v47 = vmul.f32 6.6666665, %v986_v45  ;;  %v3546_v49 = vld [vmem:[%s4851_s0 + $0x50] sm:$0xff]  ;;  %v4953_v50 = vmul.f32 6.6666665, %v987_v48  ;;  %v3547_v52 = vld [vmem:[%s4851_s0 + $0x58] sm:$0xff] }
  0x57   : > { %v874_v20 = vld [vmem:[%s4877_s15] sm:$0xff]  ;;  %v875_v22 = vld [vmem:[%s4877_s15 + $0x8] sm:$0xff]  ;;  %v876_v26 = vld [vmem:[%s4877_s15 + $0x10] sm:$0xff]  ;;  %v4955_v51 = vmul.f32 6.6666665, %v3546_v49  ;;  %s5248_s19 = scalar_lea.vmem %s5999_s10, %s4868_s20  ;;  %s844_s23 = scalar_lea.vmem %s6021_s3, %s4868_s20 }
  0x58   : > { %v891_v21 = vld [vmem:[%s4883_s28] sm:$0xff]  ;;  %883 = vst.msk [vmem:[#allocation2] sm:$0xff] %vm882_vm0, %v874_v20  ;;  %884 = vst.msk [vmem:[#allocation2 + $0x8] sm:$0xff] %vm882_vm0, %v875_v22  ;;  %v892_v25 = vld [vmem:[%s4883_s28 + $0x8] sm:$0xff]  ;;  %4206 = vmatpush3.bf16.msra.mxu0 %v4859_v11  ;;  %4222 = vmatpush3.bf16.msra.mxu1 %v4859_v11  ;;  %v4958_v56 = vmul.f32 6.6666665, %v3547_v52  ;;  %s5342_s18 = scalar_lea.vmem %s5993_s4, %s4868_s20 }
  0x59   : > { %899 = vst.msk [vmem:[#allocation3] sm:$0xff] %vm882_vm0, %v891_v21  ;;  %v893_v27 = vld [vmem:[%s4883_s28 + $0x10] sm:$0xff]  ;;  %900 = vst.msk [vmem:[#allocation3 + $0x8] sm:$0xff] %vm882_vm0, %v892_v25  ;;  %v877_v30 = vld [vmem:[%s4877_s15 + $0x18] sm:$0xff]  ;;  %4208 = vmatprep.subr.bf16.mxu0 %v4907_v29  ;;  %4224 = vmatprep.subr.bf16.mxu1 %v4907_v29 }
  0x5a   : > { %885 = vst.msk [vmem:[#allocation2 + $0x10] sm:$0xff] %vm882_vm0, %v876_v26  ;;  %901 = vst.msk [vmem:[#allocation3 + $0x10] sm:$0xff] %vm882_vm0, %v893_v27  ;;  %v894_v31 = vld [vmem:[%s4883_s28 + $0x18] sm:$0xff]  ;;  %v878_v33 = vld [vmem:[%s4877_s15 + $0x20] sm:$0xff] }
  0x5b   : > { %886 = vst.msk [vmem:[#allocation2 + $0x18] sm:$0xff] %vm882_vm0, %v877_v30  ;;  %902 = vst.msk [vmem:[#allocation3 + $0x18] sm:$0xff] %vm882_vm0, %v894_v31  ;;  %v895_v34 = vld [vmem:[%s4883_s28 + $0x20] sm:$0xff]  ;;  %v879_v35 = vld [vmem:[%s4877_s15 + $0x28] sm:$0xff] }
  0x5c   : > { %887 = vst.msk [vmem:[#allocation2 + $0x20] sm:$0xff] %vm882_vm0, %v878_v33  ;;  %v896_v36 = vld [vmem:[%s4883_s28 + $0x28] sm:$0xff]  ;;  %903 = vst.msk [vmem:[#allocation3 + $0x20] sm:$0xff] %vm882_vm0, %v895_v34  ;;  %v880_v39 = vld [vmem:[%s4877_s15 + $0x30] sm:$0xff]  ;;  %4210 = vmatpush3.bf16.msra.mxu0 %v4907_v29  ;;  %4226 = vmatpush3.bf16.msra.mxu1 %v4907_v29 }
  0x5d   : > { %888 = vst.msk [vmem:[#allocation2 + $0x28] sm:$0xff] %vm882_vm0, %v879_v35  ;;  %904 = vst.msk [vmem:[#allocation3 + $0x28] sm:$0xff] %vm882_vm0, %v896_v36  ;;  %v897_v40 = vld [vmem:[%s4883_s28 + $0x30] sm:$0xff]  ;;  %v881_v41 = vld [vmem:[%s4877_s15 + $0x38] sm:$0xff]  ;;  %4228 = vmatprep.subr.bf16.mxu0 %v4832_v3  ;;  %4244 = vmatprep.subr.bf16.mxu1 %v4832_v3  ;;  %s5242_s15 = scalar_lea.vmem %s5998_s9, %s4868_s20  ;;  %s5362_s20 = scalar_lea.vmem [#allocation9], %s4838_s17 }
  0x5e   : > { %889 = vst.msk [vmem:[#allocation2 + $0x30] sm:$0xff] %vm882_vm0, %v880_v39  ;;  %905 = vst.msk [vmem:[#allocation3 + $0x30] sm:$0xff] %vm882_vm0, %v897_v40  ;;  %v898_v42 = vld [vmem:[%s4883_s28 + $0x38] sm:$0xff] }
  0x5f   : > { %890 = vst.msk [vmem:[#allocation2 + $0x38] sm:$0xff] %vm882_vm0, %v881_v41  ;;  %906 = vst.msk [vmem:[#allocation3 + $0x38] sm:$0xff] %vm882_vm0, %v898_v42  ;;  %v939_v53 = vld [vmem:[#allocation2] sm:$0xff]  ;;  %v940_v55 = vld [vmem:[#allocation2 + $0x8] sm:$0xff] }
  0x60   : > { %v947_v54 = vld [vmem:[#allocation3] sm:$0xff]  ;;  %v1012_v57 = vmul.f32 0.9, %v939_v53  ;;  %v948_v59 = vld [vmem:[#allocation3 + $0x8] sm:$0xff]  ;;  %v1013_v60 = vmul.f32 0.9, %v940_v55 }
  0x61   : > { %v1020_v58 = vmul.f32 10.0, %v947_v54  ;;  %v1021_v61 = vmul.f32 10.0, %v948_v59  ;;  %v941_v62 = vld [vmem:[#allocation2 + $0x10] sm:$0xff]  ;;  %v988_v1 = vmul.f32 0.85, %v947_v54 }
  0x62   : > { %v949_v63 = vld [vmem:[#allocation3 + $0x10] sm:$0xff]  ;;  %v942_v0 = vld [vmem:[#allocation2 + $0x18] sm:$0xff]  ;;  %v1014_v4 = vmul.f32 0.9, %v941_v62  ;;  %v989_v13 = vmul.f32 0.85, %v948_v59 }
  0x63   : > { %v1028_v2 = vadd.f32 %v1020_v58, %v1012_v57  ;;  %v1022_v6 = vmul.f32 10.0, %v949_v63  ;;  %v950_v7 = vld [vmem:[#allocation3 + $0x18] sm:$0xff]  ;;  %v1015_v8 = vmul.f32 0.9, %v942_v0  ;;  %v1029_v9 = vadd.f32 %v1021_v61, %v1013_v60  ;;  %v943_v15 = vld [vmem:[#allocation2 + $0x20] sm:$0xff] }
  0x64   : > { %v1023_v10 = vmul.f32 10.0, %v950_v7  ;;  %v1004_v12 = vadd.f32 %v4870_v14, %v988_v1  ;;  %v4965_v17 = vld [vmem:[#allocation3 + $0x20] sm:$0xff]  ;;  %v944_v18 = vld [vmem:[#allocation2 + $0x28] sm:$0xff]  ;;  %v1016_v21 = vmul.f32 0.9, %v943_v15  ;;  %v1005_v14 = vadd.f32 %v4893_v23, %v989_v13 }
  0x65   : > { %3987 = vmatprep.mubr.msk.f32.mxu0 %vm882_vm0, %v1028_v2  ;;  %v1030_v19 = vadd.f32 %v1022_v6, %v1014_v4  ;;  %v1269_v20 = vmul.f32 0.9, %v1028_v2  ;;  %v1024_v22 = vmul.f32 10.0, %v4965_v17  ;;  %v4969_v24 = vld [vmem:[#allocation3 + $0x28] sm:$0xff]  ;;  %v1270_v30 = vmul.f32 0.9, %v1029_v9 }
  0x66   : > { %3988 = vmatmul.mubr.msk.f32.vlgmr.msra.gmra.mrb[0].mxu0 %vm882_vm0, %v1029_v9  ;;  %v1031_v25 = vadd.f32 %v1023_v10, %v1015_v8  ;;  %v1245_v26 = vmul.f32 0.85, %v1004_v12  ;;  %v1277_v27 = vmul.f32 10.0, %v1004_v12  ;;  %v1017_v33 = vmul.f32 0.9, %v944_v18  ;;  %v945_v41 = vld [vmem:[#allocation2 + $0x30] sm:$0xff] }
  0x67   : > { %4230 = vmatpush3.bf16.msra.mxu0 %v4832_v3  ;;  %3990 = vmatprep.mubr.msk.f32.mxu0 %vm882_vm0, %v1030_v19  ;;  %v1032_v31 = vadd.f32 %v1024_v22, %v1016_v21  ;;  %v1025_v34 = vmul.f32 10.0, %v4969_v24  ;;  %v1246_v39 = vmul.f32 0.85, %v1005_v14  ;;  %v1278_v40 = vmul.f32 10.0, %v1005_v14  ;;  %v953_v54 = vld [vmem:[#allocation3 + $0x30] sm:$0xff]  ;;  %v946_v59 = vld [vmem:[#allocation2 + $0x38] sm:$0xff] }
  0x68   : > { %4232 = vmatprep.subr.bf16.mxu0 %v4840_v5  ;;  %v1261_v35 = vadd.f32 %v4885_v16, %v1245_v26  ;;  %v1285_v36 = vadd.f32 %v1277_v27, %v1269_v20  ;;  %v990_v44 = vmul.f32 0.85, %v949_v63  ;;  %v1271_v23 = vmul.f32 0.9, %v1030_v19  ;;  %v954_v60 = vld [vmem:[#allocation3 + $0x38] sm:$0xff] }
  0x69   : > { %v1033_v42 = vadd.f32 %v1025_v34, %v1017_v33  ;;  %v991_v45 = vmul.f32 0.85, %v950_v7  ;;  %v1262_v53 = vadd.f32 %v4904_v28, %v1246_v39  ;;  %v1286_v16 = vadd.f32 %v1278_v40, %v1270_v30 }
  0x6a   : > { %3991 = vmatmul.mubr.msk.f32.gmra.mrb[2].mxu0 %vm882_vm0, %v1031_v25  ;;  %4015 = vmatprep.mubr.msk.f32.mxu1 %vm882_vm0, %v1285_v36  ;;  %v4980_v48 = vmul.f32 0.85, %v1261_v35  ;;  %v1521_v49 = vmul.f32 0.9, %v1285_v36  ;;  %v1529_v52 = vmul.f32 10.0, %v1261_v35  ;;  %v1006_v55 = vadd.f32 %v4924_v37, %v990_v44 }
  0x6b   : > { %4234 = vmatpush3.bf16.msra.mxu0 %v4840_v5  ;;  %3993 = vmatprep.mubr.msk.f32.mxu0 %vm882_vm0, %v1032_v31  ;;  %v4987_v57 = vadd.f32 %v4929_v38, %v991_v45  ;;  %v1272_v58 = vmul.f32 0.9, %v1031_v25  ;;  %v1498_v62 = vmul.f32 0.85, %v1262_v53  ;;  %v1530_v63 = vmul.f32 10.0, %v1262_v53 }
  0x6c   : > { %v1537_v61 = vadd.f32 %v1529_v52, %v1521_v49  ;;  %4236 = vmatprep.subr.bf16.mxu0 %v4859_v11  ;;  %v1018_v28 = vmul.f32 0.9, %v945_v41  ;;  %4016 = vmatmul.mubr.msk.f32.vlgmr.msra.gmra.mrb[0].mxu1 %vm882_vm0, %v1286_v16  ;;  %v1522_v0 = vmul.f32 0.9, %v1286_v16  ;;  %v1279_v1 = vmul.f32 10.0, %v1006_v55  ;;  %v3548_v41 = vld [vmem:[%s4851_s0 + $0x60] sm:$0xff] }
  0x6d   : > { %v1280_v2 = vmul.f32 10.0, %v4987_v57  ;;  %v1026_v4 = vmul.f32 10.0, %v953_v54  ;;  %v1514_v38 = vadd.f32 %v4915_v32, %v1498_v62  ;;  %4246 = vmatpush3.bf16.msra.mxu1 %v4832_v3  ;;  %v1019_v6 = vmul.f32 0.9, %v946_v59 }
  0x6e   : > { %v4992_v37 = vmul.f32 0.9, %v1537_v61  ;;  %3994 = vmatmul.mubr.msk.f32.gmra.mrb[4].mxu0 %vm882_vm0, %v1033_v42  ;;  %v1027_v7 = vmul.f32 10.0, %v954_v60  ;;  %v1538_v8 = vadd.f32 %v1530_v63, %v1522_v0  ;;  %v1287_v9 = vadd.f32 %v1279_v1, %v1271_v23  ;;  %4248 = vmatprep.subr.bf16.mxu1 %v4840_v5  ;;  %v3587_v0 = vld [vmem:[%s4851_s0 + $0x98] sm:$0xff] }
  0x6f   : > { %4238 = vmatpush3.bf16.msra.mxu0 %v4859_v11  ;;  %v1288_v10 = vadd.f32 %v1280_v2, %v1272_v58  ;;  %v992_v12 = vmul.f32 0.85, %v4965_v17  ;;  %v5000_v13 = vmul.f32 0.85, %v1514_v38  ;;  %v1782_v15 = vmul.f32 10.0, %v1514_v38 }
  0x70   : > { %v1034_v18 = vadd.f32 %v1026_v4, %v1018_v28  ;;  %4240 = vmatprep.subr.bf16.mxu0 %v4907_v29  ;;  %v1035_v32 = vadd.f32 %v1027_v7, %v1019_v6  ;;  %v1774_v19 = vmul.f32 0.9, %v1538_v8  ;;  %4018 = vmatprep.mubr.msk.f32.mxu1 %vm882_vm0, %v1287_v9  ;;  %v1273_v21 = vmul.f32 0.9, %v1032_v31  ;;  %v3584_v31 = vld [vmem:[%s4851_s0 + $0x80] sm:$0xff] }
  0x71   : > { %v1008_v20 = vadd.f32 %v4940_v43, %v992_v12  ;;  %v993_v22 = vmul.f32 0.85, %v4969_v24  ;;  %4019 = vmatmul.mubr.msk.f32.gmra.mrb[2].mxu1 %vm882_vm0, %v1288_v10  ;;  %v1274_v17 = vmul.f32 0.9, %v1033_v42  ;;  %v994_v25 = vmul.f32 0.85, %v953_v54 }
  0x72   : > { %3996 = vmatprep.mubr.msk.f32.mxu0 %vm882_vm0, %v1034_v18  ;;  %v1275_v26 = vmul.f32 0.9, %v1034_v18  ;;  %v5008_v27 = vadd.f32 %v1782_v15, %v1774_v19  ;;  %4250 = vmatpush3.bf16.msra.mxu1 %v4840_v5  ;;  %v995_v30 = vmul.f32 0.85, %v954_v60  ;;  %v1276_v33 = vmul.f32 0.9, %v1035_v32 }
  0x73   : > { %3997 = vmatmul.mubr.msk.f32.gmra.mrb[6].mxu0 %vm882_vm0, %v1035_v32  ;;  %v1281_v14 = vmul.f32 10.0, %v1008_v20  ;;  %v1009_v43 = vadd.f32 %v4947_v46, %v993_v22  ;;  %4252 = vmatprep.subr.bf16.mxu1 %v4859_v11  ;;  %v5017_v24 = vadd.f32 %v4949_v47, %v994_v25  ;;  %v1247_v34 = vmul.f32 0.85, %v1006_v55  ;;  %v3588_v22 = vld [vmem:[%s4851_s0 + $0xa0] sm:$0xff] }
  0x74   : > { %4242 = vmatpush3.bf16.msra.mxu0 %v4907_v29  ;;  %v1523_v35 = vmul.f32 0.9, %v1287_v9  ;;  %v5020_v36 = vmul.f32 0.9, %v5008_v27  ;;  %4043 = vmatprep.mubr.msk.f32.mxu0 %vm882_vm0, %v1537_v61  ;;  %v5025_v46 = vadd.f32 %v4953_v50, %v995_v30  ;;  %v1248_v44 = vmul.f32 0.85, %v4987_v57 }
  0x75   : > { %v1289_v39 = vadd.f32 %v1281_v14, %v1273_v21  ;;  %v1282_v40 = vmul.f32 10.0, %v1009_v43  ;;  %4260 = vmatprep.subr.bf16.mxu0 %v4832_v3  ;;  %v1283_v47 = vmul.f32 10.0, %v5017_v24  ;;  %v1263_v42 = vadd.f32 %v4955_v51, %v1247_v34  ;;  %v3549_v50 = vld [vmem:[%s4851_s0 + $0x68] sm:$0xff]  ;;  %v3586_v61 = vld [vmem:[%s4851_s0 + $0x90] sm:$0xff]  ;;  %v3551_v9 = vld [vmem:[%s4851_s0 + $0x78] sm:$0xff] }
  0x76   : > { %v1524_v23 = vmul.f32 0.9, %v1288_v10  ;;  %4254 = vmatpush3.bf16.msra.mxu1 %v4859_v11  ;;  %v1284_v49 = vmul.f32 10.0, %v5025_v46  ;;  %v1505_v52 = vmul.f32 6.6666665, %v3584_v31  ;;  %v1264_v16 = vadd.f32 %v4958_v56, %v1248_v44 }
  0x77   : > { %4021 = vmatprep.mubr.msk.f32.mxu1 %vm882_vm0, %v1289_v39  ;;  %v1290_v45 = vadd.f32 %v1282_v40, %v1274_v17  ;;  %v1249_v53 = vmul.f32 0.85, %v1008_v20  ;;  %v1291_v54 = vadd.f32 %v1283_v47, %v1275_v26  ;;  %4044 = vmatmul.mubr.msk.f32.vlgmr.msra.gmra.mrb[8].mxu0 %vm882_vm0, %v1538_v8  ;;  %v1531_v51 = vmul.f32 10.0, %v1263_v42  ;;  %v3550_v8 = vld [vmem:[%s4851_s0 + $0x70] sm:$0xff] }
  0x78   : > { %4256 = vmatprep.subr.bf16.mxu1 %v4907_v29  ;;  %v1257_v55 = vmul.f32 6.6666665, %v3548_v41  ;;  %4262 = vmatpush3.bf16.msra.mxu0 %v4832_v3  ;;  %v1292_v57 = vadd.f32 %v1284_v49, %v1276_v33  ;;  %v5041_v58 = vadd.f32 %v1505_v52, %v4980_v48  ;;  %v1525_v59 = vmul.f32 0.9, %v1289_v39  ;;  %v3589_v33 = vld [vmem:[%s4851_s0 + $0xa8] sm:$0xff]  ;;  %v3590_v49 = vld [vmem:[%s4851_s0 + $0xb0] sm:$0xff] }
  0x79   : > { %4022 = vmatmul.mubr.msk.f32.gmra.mrb[4].mxu1 %vm882_vm0, %v1290_v45  ;;  %v1250_v60 = vmul.f32 0.85, %v1009_v43  ;;  %v1539_v62 = vadd.f32 %v1531_v51, %v1523_v35  ;;  %4264 = vmatprep.subr.bf16.mxu0 %v4840_v5  ;;  %v1532_v56 = vmul.f32 10.0, %v1264_v16  ;;  %v1258_v28 = vmul.f32 6.6666665, %v3549_v50  ;;  %v3625_v51 = vld [vmem:[%s4851_s0 + $0xc8] sm:$0xff] }
  0x7a   : > { %4024 = vmatprep.mubr.msk.f32.mxu1 %vm882_vm0, %v1291_v54  ;;  %v1265_v63 = vadd.f32 %v1257_v55, %v1249_v53  ;;  %4258 = vmatpush3.bf16.msra.mxu1 %v4907_v29  ;;  %v1781_v1 = vmul.f32 10.0, %v5041_v58  ;;  %v1526_v48 = vmul.f32 0.9, %v1290_v45  ;;  %v1499_v2 = vmul.f32 0.85, %v1263_v42  ;;  %v3624_v42 = vld [vmem:[%s4851_s0 + $0xc0] sm:$0xff] }
  0x7b   : > { %4046 = vmatprep.mubr.msk.f32.mxu0 %vm882_vm0, %v1539_v62  ;;  %v1540_v4 = vadd.f32 %v1532_v56, %v1524_v23  ;;  %4276 = vmatprep.subr.bf16.mxu1 %v4832_v3  ;;  %v1266_v6 = vadd.f32 %v1258_v28, %v1250_v60  ;;  %v1507_v7 = vmul.f32 6.6666665, %v3586_v61  ;;  %v1775_v12 = vmul.f32 0.9, %v1539_v62  ;;  %v3591_v60 = vld [vmem:[%s4851_s0 + $0xb8] sm:$0xff] }
  0x7c   : > { %v1533_v38 = vmul.f32 10.0, %v1265_v63  ;;  %v1789_v10 = vadd.f32 %v1781_v1, %v4992_v37  ;;  %4266 = vmatpush3.bf16.msra.mxu0 %v4840_v5  ;;  %v1500_v15 = vmul.f32 0.85, %v1264_v16  ;;  %v1508_v18 = vmul.f32 6.6666665, %v3587_v0 }
  0x7d   : > { %4025 = vmatmul.mubr.msk.f32.gmra.mrb[6].mxu1 %vm882_vm0, %v1292_v57  ;;  %4047 = vmatmul.mubr.msk.f32.gmra.mrb[10].mxu0 %vm882_vm0, %v1540_v4  ;;  %v1534_v19 = vmul.f32 10.0, %v1266_v6  ;;  %v5058_v20 = vadd.f32 %v1507_v7, %v1499_v2  ;;  %v1776_v21 = vmul.f32 0.9, %v1540_v4  ;;  %v1251_v37 = vmul.f32 0.85, %v5017_v24 }
  0x7e   : > { %v1541_v32 = vadd.f32 %v1533_v38, %v1525_v59  ;;  %4268 = vmatprep.subr.bf16.mxu0 %v4859_v11  ;;  %4071 = vmatprep.mubr.msk.f32.mxu1 %vm882_vm0, %v1789_v10  ;;  %v5062_v17 = vadd.f32 %v1508_v18, %v1500_v15  ;;  %v1259_v25 = vmul.f32 6.6666665, %v3550_v8  ;;  %v1527_v26 = vmul.f32 0.9, %v1291_v54 }
  0x7f   : > { %v1542_v14 = vadd.f32 %v1534_v19, %v1526_v48  ;;  %v1783_v43 = vmul.f32 10.0, %v5058_v20  ;;  %v1252_v30 = vmul.f32 0.85, %v5025_v46  ;;  %v1260_v31 = vmul.f32 6.6666665, %v3551_v9  ;;  %v3626_v48 = vld [vmem:[%s4851_s0 + $0xd0] sm:$0xff] }
  0x80   : > { %4049 = vmatprep.mubr.msk.f32.mxu0 %vm882_vm0, %v1541_v32  ;;  %4270 = vmatpush3.bf16.msra.mxu0 %v4859_v11  ;;  %v1784_v34 = vmul.f32 10.0, %v5062_v17  ;;  %v1267_v24 = vadd.f32 %v1259_v25, %v1251_v37  ;;  %v1528_v35 = vmul.f32 0.9, %v1292_v57  ;;  %v1501_v39 = vmul.f32 0.85, %v1265_v63 }
  0x81   : > { %4072 = vmatmul.mubr.msk.f32.vlgmr.msra.gmra.mrb[8].mxu1 %vm882_vm0, %v5008_v27  ;;  %4050 = vmatmul.mubr.msk.f32.gmra.mrb[12].mxu0 %vm882_vm0, %v1542_v14  ;;  %v1791_v40 = vadd.f32 %v1783_v43, %v1775_v12  ;;  %v1268_v41 = vadd.f32 %v1260_v31, %v1252_v30  ;;  %v1509_v46 = vmul.f32 6.6666665, %v3588_v22  ;;  %v1777_v47 = vmul.f32 0.9, %v1541_v32  ;;  %v3627_v12 = vld [vmem:[%s4851_s0 + $0xd8] sm:$0xff]  ;;  %v3665_v31 = vld [vmem:[%s4851_s0 + $0x108] sm:$0xff] }
  0x82   : > { %4278 = vmatpush3.bf16.msra.mxu1 %v4832_v3  ;;  %v5076_v44 = vadd.f32 %v1784_v34, %v1776_v21  ;;  %v1535_v27 = vmul.f32 10.0, %v1267_v24  ;;  %4272 = vmatprep.subr.bf16.mxu0 %v4907_v29  ;;  %v1502_v23 = vmul.f32 0.85, %v1266_v6  ;;  %v1510_v45 = vmul.f32 6.6666665, %v3589_v33  ;;  %v3664_v21 = vld [vmem:[%s4851_s0 + $0x100] sm:$0xff] }
  0x83   : > { %4280 = vmatprep.subr.bf16.mxu1 %v4840_v5  ;;  %4074 = vmatprep.mubr.msk.f32.mxu1 %vm882_vm0, %v1791_v40  ;;  %v1536_v52 = vmul.f32 10.0, %v1268_v41  ;;  %v5082_v53 = vadd.f32 %v1509_v46, %v1501_v39  ;;  %v1778_v50 = vmul.f32 0.9, %v1542_v14  ;;  %v1749_v54 = vmul.f32 0.85, %v5041_v58  ;;  %v3629_v46 = vld [vmem:[%s4851_s0 + $0xe8] sm:$0xff] }
  0x84   : > { %v1543_v16 = vadd.f32 %v1535_v27, %v1527_v26  ;;  %4274 = vmatpush3.bf16.msra.mxu0 %v4907_v29  ;;  %v5089_v55 = vadd.f32 %v1510_v45, %v1502_v23  ;;  %v1757_v57 = vmul.f32 6.6666665, %v3624_v42  ;;  %v2025_v59 = vmul.f32 0.9, %v1789_v10 }
  0x85   : > { %4075 = vmatmul.mubr.msk.f32.gmra.mrb[10].mxu1 %vm882_vm0, %v5076_v44  ;;  %v1544_v61 = vadd.f32 %v1536_v52, %v1528_v35  ;;  %v1785_v62 = vmul.f32 10.0, %v5082_v53  ;;  %4292 = vmatprep.subr.bf16.mxu0 %v4832_v3  ;;  %v1503_v58 = vmul.f32 0.85, %v1267_v24  ;;  %v1511_v56 = vmul.f32 6.6666665, %v3590_v49  ;;  %v3666_v52 = vld [vmem:[%s4851_s0 + $0x110] sm:$0xff] }
  0x86   : > { %4282 = vmatpush3.bf16.msra.mxu1 %v4840_v5  ;;  %4052 = vmatprep.mubr.msk.f32.mxu0 %vm882_vm0, %v1543_v16  ;;  %v1786_v63 = vmul.f32 10.0, %v5089_v55  ;;  %v1765_v28 = vadd.f32 %v1757_v57, %v1749_v54  ;;  %v1779_v0 = vmul.f32 0.9, %v1543_v16  ;;  %v1758_v1 = vmul.f32 6.6666665, %v3625_v51 }
  0x87   : > { %4284 = vmatprep.subr.bf16.mxu1 %v4859_v11  ;;  %4053 = vmatmul.mubr.msk.f32.gmra.mrb[14].mxu0 %vm882_vm0, %v1544_v61  ;;  %v1793_v2 = vadd.f32 %v1785_v62, %v1777_v47  ;;  %v5100_v4 = vadd.f32 %v1511_v56, %v1503_v58  ;;  %v1504_v38 = vmul.f32 0.85, %v1268_v41  ;;  %v1512_v6 = vmul.f32 6.6666665, %v3591_v60  ;;  %v3667_v62 = vld [vmem:[%s4851_s0 + $0x118] sm:$0xff] }
  0x88   : > { %v1794_v7 = vadd.f32 %v1786_v63, %v1778_v50  ;;  %v2033_v8 = vmul.f32 10.0, %v1765_v28  ;;  %v1766_v9 = vadd.f32 %v1758_v1, %v5000_v13  ;;  %v1780_v10 = vmul.f32 0.9, %v1544_v61 }
  0x89   : > { %4077 = vmatprep.mubr.msk.f32.mxu1 %vm882_vm0, %v1793_v2  ;;  %v1787_v15 = vmul.f32 10.0, %v5100_v4  ;;  %v5107_v18 = vadd.f32 %v1512_v6, %v1504_v38  ;;  %v1751_v32 = vmul.f32 0.85, %v5058_v20  ;;  %v1759_v19 = vmul.f32 6.6666665, %v3626_v48  ;;  %v3628_v20 = vld [vmem:[%s4851_s0 + $0xe0] sm:$0xff] }
  0x8a   : > { %4286 = vmatpush3.bf16.msra.mxu1 %v4859_v11  ;;  %v2041_v22 = vadd.f32 %v2033_v8, %v2025_v59  ;;  %v2034_v13 = vmul.f32 10.0, %v1766_v9  ;;  %v2027_v37 = vmul.f32 0.9, %v1791_v40  ;;  %v1752_v25 = vmul.f32 0.85, %v5062_v17  ;;  %v3631_v8 = vld [vmem:[%s4851_s0 + $0xf8] sm:$0xff] }
  0x8b   : > { %4078 = vmatmul.mubr.msk.f32.gmra.mrb[12].mxu1 %vm882_vm0, %v1794_v7  ;;  %4288 = vmatprep.subr.bf16.mxu1 %v4907_v29  ;;  %v5114_v26 = vadd.f32 %v1787_v15, %v1779_v0  ;;  %v1788_v14 = vmul.f32 10.0, %v5107_v18  ;;  %v1767_v43 = vadd.f32 %v1759_v19, %v1751_v32  ;;  %v1760_v30 = vmul.f32 6.6666665, %v3627_v12  ;;  %v3668_v32 = vld [vmem:[%s4851_s0 + $0x120] sm:$0xff] }
  0x8c   : > { %4099 = vmatprep.mubr.msk.f32.mxu0 %vm882_vm0, %v2041_v22  ;;  %v2042_v33 = vadd.f32 %v2034_v13, %v5020_v36  ;;  %v2028_v34 = vmul.f32 0.9, %v5076_v44  ;;  %v2001_v24 = vmul.f32 0.85, %v1765_v28  ;;  %v2009_v35 = vmul.f32 6.6666665, %v3664_v21 }
  0x8d   : > { %4080 = vmatprep.mubr.msk.f32.mxu1 %vm882_vm0, %v5114_v26  ;;  %v1796_v17 = vadd.f32 %v1788_v14, %v1780_v10  ;;  %v2035_v39 = vmul.f32 10.0, %v1767_v43  ;;  %v1768_v40 = vadd.f32 %v1760_v30, %v1752_v25  ;;  %v2277_v41 = vmul.f32 0.9, %v2041_v22  ;;  %v3630_v28 = vld [vmem:[%s4851_s0 + $0xf0] sm:$0xff] }
  0x8e   : > { %4290 = vmatpush3.bf16.msra.mxu1 %v4907_v29  ;;  %4100 = vmatmul.mubr.msk.f32.vlgmr.msra.gmra.mrb[16].mxu0 %vm882_vm0, %v2042_v33  ;;  %v5127_v47 = vadd.f32 %v2009_v35, %v2001_v24  ;;  %v2002_v36 = vmul.f32 0.85, %v1766_v9  ;;  %v2010_v42 = vmul.f32 6.6666665, %v3665_v31  ;;  %v2278_v44 = vmul.f32 0.9, %v2042_v33 }
  0x8f   : > { %4308 = vmatprep.subr.bf16.mxu1 %v4832_v3  ;;  %4294 = vmatpush3.bf16.msra.mxu0 %v4832_v3  ;;  %v2043_v27 = vadd.f32 %v2035_v39, %v2027_v37  ;;  %v2036_v23 = vmul.f32 10.0, %v1768_v40  ;;  %v1753_v45 = vmul.f32 0.85, %v5082_v53  ;;  %v1761_v49 = vmul.f32 6.6666665, %v3628_v20  ;;  %v3704_v20 = vld [vmem:[%s4851_s0 + $0x140] sm:$0xff] }
  0x90   : > { %4081 = vmatmul.mubr.msk.f32.gmra.mrb[14].mxu1 %vm882_vm0, %v1796_v17  ;;  %4296 = vmatprep.subr.bf16.mxu0 %v4840_v5  ;;  %v2285_v50 = vmul.f32 10.0, %v5127_v47  ;;  %v5136_v54 = vadd.f32 %v2010_v42, %v2002_v36  ;;  %v2029_v51 = vmul.f32 0.9, %v1793_v2  ;;  %v1754_v16 = vmul.f32 0.85, %v5089_v55 }
  0x91   : > { %4102 = vmatprep.mubr.msk.f32.mxu0 %vm882_vm0, %v2043_v27  ;;  %v2044_v57 = vadd.f32 %v2036_v23, %v2028_v34  ;;  %v1769_v59 = vadd.f32 %v1761_v49, %v1753_v45  ;;  %v1762_v60 = vmul.f32 6.6666665, %v3629_v46  ;;  %v2030_v61 = vmul.f32 0.9, %v1794_v7 }
  0x92   : > { %v5141_v53 = vadd.f32 %v2285_v50, %v2277_v41  ;;  %v2286_v58 = vmul.f32 10.0, %v5136_v54  ;;  %v2003_v56 = vmul.f32 0.85, %v1767_v43  ;;  %v2011_v63 = vmul.f32 6.6666665, %v3666_v52  ;;  %v3669_v43 = vld [vmem:[%s4851_s0 + $0x128] sm:$0xff] }
  0x93   : > { %4103 = vmatmul.mubr.msk.f32.gmra.mrb[18].mxu0 %vm882_vm0, %v2044_v57  ;;  %v2037_v0 = vmul.f32 10.0, %v1769_v59  ;;  %v1770_v55 = vadd.f32 %v1762_v60, %v1754_v16  ;;  %v2279_v1 = vmul.f32 0.9, %v2043_v27  ;;  %v2004_v48 = vmul.f32 0.85, %v1768_v40  ;;  %v3670_v41 = vld [vmem:[%s4851_s0 + $0x130] sm:$0xff] }
  0x94   : > { %4127 = vmatprep.mubr.msk.f32.mxu1 %vm882_vm0, %v5141_v53  ;;  %4298 = vmatpush3.bf16.msra.mxu0 %v4840_v5  ;;  %v5149_v2 = vadd.f32 %v2286_v58, %v2278_v44  ;;  %v5151_v38 = vadd.f32 %v2011_v63, %v2003_v56  ;;  %v2012_v6 = vmul.f32 6.6666665, %v3667_v62  ;;  %v2280_v7 = vmul.f32 0.9, %v2044_v57  ;;  %v3705_v27 = vld [vmem:[%s4851_s0 + $0x148] sm:$0xff]  ;;  %v3671_v16 = vld [vmem:[%s4851_s0 + $0x138] sm:$0xff] }
  0x95   : > { %v2045_v9 = vadd.f32 %v2037_v0, %v2029_v51  ;;  %4300 = vmatprep.subr.bf16.mxu0 %v4859_v11  ;;  %v2038_v10 = vmul.f32 10.0, %v1770_v55  ;;  %v1755_v12 = vmul.f32 0.85, %v5100_v4  ;;  %v1763_v15 = vmul.f32 6.6666665, %v3630_v28  ;;  %v3706_v62 = vld [vmem:[%s4851_s0 + $0x150] sm:$0xff] }
  0x96   : > { %4128 = vmatmul.mubr.msk.f32.vlgmr.msra.gmra.mrb[16].mxu1 %vm882_vm0, %v5149_v2  ;;  %v2287_v19 = vmul.f32 10.0, %v5151_v38  ;;  %v5160_v21 = vadd.f32 %v2012_v6, %v2004_v48  ;;  %v2031_v22 = vmul.f32 0.9, %v5114_v26  ;;  %v1756_v13 = vmul.f32 0.85, %v5107_v18 }
  0x97   : > { %4310 = vmatpush3.bf16.msra.mxu1 %v4832_v3  ;;  %4105 = vmatprep.mubr.msk.f32.mxu0 %vm882_vm0, %v2045_v9  ;;  %v2046_v37 = vadd.f32 %v2038_v10, %v2030_v61  ;;  %v1771_v4 = vadd.f32 %v1763_v15, %v1755_v12  ;;  %v1764_v25 = vmul.f32 6.6666665, %v3631_v8  ;;  %v2032_v14 = vmul.f32 0.9, %v1796_v17  ;;  %v3784_v15 = vld [vmem:[%s4851_s0 + $0x1c0] sm:$0xff] }
  0x98   : > { %v5167_v30 = vadd.f32 %v2287_v19, %v2279_v1  ;;  %4302 = vmatpush3.bf16.msra.mxu0 %v4859_v11  ;;  %v2288_v31 = vmul.f32 10.0, %v5160_v21  ;;  %4312 = vmatprep.subr.bf16.mxu1 %v4840_v5  ;;  %v2005_v26 = vmul.f32 0.85, %v1769_v59  ;;  %v2013_v18 = vmul.f32 6.6666665, %v3668_v32  ;;  %v3707_v1 = vld [vmem:[%s4851_s0 + $0x158] sm:$0xff] }
  0x99   : > { %4106 = vmatmul.mubr.msk.f32.gmra.mrb[20].mxu0 %vm882_vm0, %v2046_v37  ;;  %v2039_v3 = vmul.f32 10.0, %v1771_v4  ;;  %4304 = vmatprep.subr.bf16.mxu0 %v4907_v29  ;;  %v1772_v33 = vadd.f32 %v1764_v25, %v1756_v13  ;;  %v2281_v34 = vmul.f32 0.9, %v2045_v9  ;;  %v2006_v24 = vmul.f32 0.85, %v1770_v55  ;;  %v3745_v13 = vld [vmem:[%s4851_s0 + $0x188] sm:$0xff] }
  0x9a   : > { %4130 = vmatprep.mubr.msk.f32.mxu1 %vm882_vm0, %v5167_v30  ;;  %v2296_v35 = vadd.f32 %v2288_v31, %v2280_v7  ;;  %v5177_v17 = vadd.f32 %v2013_v18, %v2005_v26  ;;  %v2014_v39 = vmul.f32 6.6666665, %v3669_v43  ;;  %v2282_v40 = vmul.f32 0.9, %v2046_v37  ;;  %v3744_v7 = vld [vmem:[%s4851_s0 + $0x180] sm:$0xff]  ;;  %v3785_v43 = vld [vmem:[%s4851_s0 + $0x1c8] sm:$0xff] }
  0x9b   : > { %4314 = vmatpush3.bf16.msra.mxu1 %v4840_v5  ;;  %v2047_v46 = vadd.f32 %v2039_v3, %v2031_v22  ;;  %v2040_v36 = vmul.f32 10.0, %v1772_v33  ;;  %v2253_v42 = vmul.f32 0.85, %v5127_v47  ;;  %v2261_v44 = vmul.f32 6.6666665, %v3704_v20 }
  0x9c   : > { %4131 = vmatmul.mubr.msk.f32.gmra.mrb[18].mxu1 %vm882_vm0, %v2296_v35  ;;  %v2289_v23 = vmul.f32 10.0, %v5177_v17  ;;  %4306 = vmatpush3.bf16.msra.mxu0 %v4907_v29  ;;  %v5186_v45 = vadd.f32 %v2014_v39, %v2006_v24  ;;  %v2529_v49 = vmul.f32 0.9, %v5141_v53  ;;  %v2007_v52 = vmul.f32 0.85, %v1771_v4 }
  0x9d   : > { %4108 = vmatprep.mubr.msk.f32.mxu0 %vm882_vm0, %v2047_v46  ;;  %v2048_v5 = vadd.f32 %v2040_v36, %v2032_v14  ;;  %4316 = vmatprep.subr.bf16.mxu1 %v4859_v11  ;;  %v2269_v47 = vadd.f32 %v2261_v44, %v2253_v42  ;;  %v2015_v50 = vmul.f32 6.6666665, %v3670_v41  ;;  %v2283_v51 = vmul.f32 0.9, %v2047_v46  ;;  %v3746_v41 = vld [vmem:[%s4851_s0 + $0x190] sm:$0xff] }
  0x9e   : > { %v5192_v57 = vadd.f32 %v2289_v23, %v2281_v34  ;;  %v2290_v59 = vmul.f32 10.0, %v5186_v45  ;;  %v2254_v60 = vmul.f32 0.85, %v5136_v54  ;;  %v2262_v61 = vmul.f32 6.6666665, %v3705_v27  ;;  %v3709_v34 = vld [vmem:[%s4851_s0 + $0x168] sm:$0xff] }
  0x9f   : > { %4109 = vmatmul.mubr.msk.f32.gmra.mrb[22].mxu0 %vm882_vm0, %v2048_v5  ;;  %4318 = vmatpush3.bf16.msra.mxu1 %v4859_v11  ;;  %v2537_v53 = vmul.f32 10.0, %v2269_v47  ;;  %v5199_v58 = vadd.f32 %v2015_v50, %v2007_v52  ;;  %v2530_v56 = vmul.f32 0.9, %v5149_v2  ;;  %v2008_v63 = vmul.f32 0.85, %v1772_v33  ;;  %v3708_v33 = vld [vmem:[%s4851_s0 + $0x160] sm:$0xff] }
  0xa0   : > { %4133 = vmatprep.mubr.msk.f32.mxu1 %vm882_vm0, %v5192_v57  ;;  %v5204_v28 = vadd.f32 %v2290_v59, %v2282_v40  ;;  %v2270_v54 = vadd.f32 %v2262_v61, %v2254_v60  ;;  %v2016_v0 = vmul.f32 6.6666665, %v3671_v16  ;;  %v2284_v55 = vmul.f32 0.9, %v2048_v5  ;;  %4320 = vmatprep.subr.bf16.mxu1 %v4907_v29  ;;  %v3786_v27 = vld [vmem:[%s4851_s0 + $0x1d0] sm:$0xff]  ;;  %v3747_v16 = vld [vmem:[%s4851_s0 + $0x198] sm:$0xff] }
  0xa1   : > { %v2545_v11 = vadd.f32 %v2537_v53, %v2529_v49  ;;  %v2291_v48 = vmul.f32 10.0, %v5199_v58  ;;  %v2255_v6 = vmul.f32 0.85, %v5151_v38  ;;  %v2263_v2 = vmul.f32 6.6666665, %v3706_v62  ;;  %v3787_v59 = vld [vmem:[%s4851_s0 + $0x1d8] sm:$0xff] }
  0xa2   : > { %4134 = vmatmul.mubr.msk.f32.gmra.mrb[20].mxu1 %vm882_vm0, %v5204_v28  ;;  %v2538_v8 = vmul.f32 10.0, %v2270_v54  ;;  %v5213_v9 = vadd.f32 %v2016_v0, %v2008_v63  ;;  %v2531_v10 = vmul.f32 0.9, %v5167_v30  ;;  %v2256_v12 = vmul.f32 0.85, %v5160_v21 }
  0xa3   : > { %4155 = vmatprep.mubr.msk.f32.mxu0 %vm882_vm0, %v2545_v11  ;;  %v5219_v32 = vadd.f32 %v2291_v48, %v2283_v51  ;;  %4322 = vmatpush3.bf16.msra.mxu1 %v4907_v29  ;;  %v2271_v38 = vadd.f32 %v2263_v2, %v2255_v6  ;;  %v2264_v19 = vmul.f32 6.6666665, %v3707_v1  ;;  %v2532_v22 = vmul.f32 0.9, %v2296_v35 }
  0xa4   : > { %v2546_v37 = vadd.f32 %v2538_v8, %v2530_v56  ;;  %v2292_v4 = vmul.f32 10.0, %v5213_v9  ;;  %v2505_v25 = vmul.f32 0.85, %v2269_v47  ;;  %v2513_v14 = vmul.f32 6.6666665, %v3744_v7 }
  0xa5   : > { %4136 = vmatprep.mubr.msk.f32.mxu1 %vm882_vm0, %v5219_v32  ;;  %v2539_v21 = vmul.f32 10.0, %v2271_v38  ;;  %v2272_v30 = vadd.f32 %v2264_v19, %v2256_v12  ;;  %v2765_v31 = vmul.f32 6.6666665, %v3784_v15  ;;  %v2781_v29 = vmul.f32 0.9, %v2545_v11  ;;  %v3711_v11 = vld [vmem:[%s4851_s0 + $0x178] sm:$0xff] }
  0xa6   : > { %4156 = vmatmul.mubr.msk.f32.vlgmr.msra.gmra.mrb[24].mxu0 %vm882_vm0, %v2546_v37  ;;  %v5228_v26 = vadd.f32 %v2292_v4, %v2284_v55  ;;  %v2521_v18 = vadd.f32 %v2513_v14, %v2505_v25  ;;  %v2506_v20 = vmul.f32 0.85, %v2270_v54  ;;  %v2514_v3 = vmul.f32 6.6666665, %v3745_v13  ;;  %v3710_v54 = vld [vmem:[%s4851_s0 + $0x170] sm:$0xff] }
  0xa7   : > { %v2547_v24 = vadd.f32 %v2539_v21, %v2531_v10  ;;  %v2540_v35 = vmul.f32 10.0, %v2272_v30  ;;  %v2766_v39 = vmul.f32 6.6666665, %v3785_v43  ;;  %v2782_v40 = vmul.f32 0.9, %v2546_v37  ;;  %v3748_v43 = vld [vmem:[%s4851_s0 + $0x1a0] sm:$0xff] }
  0xa8   : > { %4137 = vmatmul.mubr.msk.f32.gmra.mrb[22].mxu1 %vm882_vm0, %v5228_v26  ;;  %v2757_v46 = vmul.f32 0.85, %v2521_v18  ;;  %v2789_v36 = vmul.f32 10.0, %v2521_v18  ;;  %v2522_v42 = vadd.f32 %v2514_v3, %v2506_v20  ;;  %v2257_v44 = vmul.f32 0.85, %v5177_v17  ;;  %v3788_v21 = vld [vmem:[%s4851_s0 + $0x1e0] sm:$0xff] }
  0xa9   : > { %4158 = vmatprep.mubr.msk.f32.mxu0 %vm882_vm0, %v2547_v24  ;;  %v2548_v23 = vadd.f32 %v2540_v35, %v2532_v22  ;;  %v2265_v49 = vmul.f32 6.6666665, %v3708_v33  ;;  %v2533_v52 = vmul.f32 0.9, %v5192_v57  ;;  %v2258_v17 = vmul.f32 0.85, %v5186_v45 }
  0xaa   : > { %v2773_v5 = vadd.f32 %v2765_v31, %v2757_v46  ;;  %v2797_v47 = vadd.f32 %v2789_v36, %v2781_v29  ;;  %v2758_v50 = vmul.f32 0.85, %v2522_v42  ;;  %v2790_v51 = vmul.f32 10.0, %v2522_v42  ;;  %v3749_v18 = vld [vmem:[%s4851_s0 + $0x1a8] sm:$0xff] }
  0xab   : > { %4159 = vmatmul.mubr.msk.f32.gmra.mrb[26].mxu0 %vm882_vm0, %v2548_v23  ;;  %v2273_v60 = vadd.f32 %v2265_v49, %v2257_v44  ;;  %v2266_v61 = vmul.f32 6.6666665, %v3709_v34  ;;  %v2534_v62 = vmul.f32 0.9, %v5204_v28  ;;  %v2507_v53 = vmul.f32 0.85, %v2271_v38 }
  0xac   : > { %4183 = vmatprep.mubr.msk.f32.mxu1 %vm882_vm0, %v2797_v47  ;;  %3000 = vst.msk [vmem:[#allocation2] sm:$0xff] %vm882_vm0, %v2797_v47  ;;  %3008 = vst.msk [vmem:[#allocation3] sm:$0xff] %vm882_vm0, %v2773_v5  ;;  %v2774_v45 = vadd.f32 %v2766_v39, %v2758_v50  ;;  %v2798_v57 = vadd.f32 %v2790_v51, %v2782_v40  ;;  %v2515_v56 = vmul.f32 6.6666665, %v3746_v41  ;;  %v2767_v63 = vmul.f32 6.6666665, %v3786_v27 }
  0xad   : > { %3035 = vst.msk [vmem:[%s5242_s15] sm:$0xff] %vm882_vm0, %v2797_v47  ;;  %3043 = vst.msk [vmem:[%s5248_s19] sm:$0xff] %vm882_vm0, %v2773_v5  ;;  %v2541_v28 = vmul.f32 10.0, %v2273_v60  ;;  %v2274_v0 = vadd.f32 %v2266_v61, %v2258_v17  ;;  %v2783_v55 = vmul.f32 0.9, %v2547_v24  ;;  %v3789_v20 = vld [vmem:[%s4851_s0 + $0x1e8] sm:$0xff] }
  0xae   : > { %v2508_v1 = vmul.f32 0.85, %v2272_v30  ;;  %4184 = vmatmul.mubr.msk.f32.vlgmr.msra.gmra.mrb[24].mxu1 %vm882_vm0, %v2798_v57  ;;  %3001 = vst.msk [vmem:[#allocation2 + $0x8] sm:$0xff] %vm882_vm0, %v2798_v57  ;;  %3009 = vst.msk [vmem:[#allocation3 + $0x8] sm:$0xff] %vm882_vm0, %v2774_v45  ;;  %v2523_v48 = vadd.f32 %v2515_v56, %v2507_v53  ;;  %v2516_v6 = vmul.f32 6.6666665, %v3747_v16 }
  0xaf   : > { %3036 = vst.msk [vmem:[%s5242_s15 + $0x8] sm:$0xff] %vm882_vm0, %v2798_v57  ;;  %3044 = vst.msk [vmem:[%s5248_s19 + $0x8] sm:$0xff] %vm882_vm0, %v2774_v45  ;;  %v2768_v2 = vmul.f32 6.6666665, %v3787_v59  ;;  %v2784_v7 = vmul.f32 0.9, %v2548_v23  ;;  %v2549_v8 = vadd.f32 %v2541_v28, %v2533_v52 }
  0xb0   : > { %v2542_v10 = vmul.f32 10.0, %v2274_v0  ;;  %v2259_v12 = vmul.f32 0.85, %v5199_v58  ;;  %v2267_v15 = vmul.f32 6.6666665, %v3710_v54  ;;  %v2791_v19 = vmul.f32 10.0, %v2523_v48 }
  0xb1   : > { %v2759_v38 = vmul.f32 0.85, %v2523_v48  ;;  %v2524_v22 = vadd.f32 %v2516_v6, %v2508_v1  ;;  %v2535_v13 = vmul.f32 0.9, %v5219_v32  ;;  %4161 = vmatprep.mubr.msk.f32.mxu0 %vm882_vm0, %v2549_v8  ;;  %v2260_v25 = vmul.f32 0.85, %v5213_v9 }
  0xb2   : > { %v2550_v37 = vadd.f32 %v2542_v10, %v2534_v62  ;;  %v2275_v4 = vadd.f32 %v2267_v15, %v2259_v12  ;;  %v2268_v14 = vmul.f32 6.6666665, %v3711_v11  ;;  %v2799_v30 = vadd.f32 %v2791_v19, %v2783_v55  ;;  %v3750_v34 = vld [vmem:[%s4851_s0 + $0x1b0] sm:$0xff]  ;;  %v3751_v41 = vld [vmem:[%s4851_s0 + $0x1b8] sm:$0xff]  ;;  %v907_v19 = vld [vmem:[%s844_s23] sm:$0xff] }
  0xb3   : > { %v2775_v58 = vadd.f32 %v2767_v63, %v2759_v38  ;;  %v2760_v31 = vmul.f32 0.85, %v2524_v22  ;;  %v2792_v29 = vmul.f32 10.0, %v2524_v22  ;;  %v2536_v33 = vmul.f32 0.9, %v5228_v26  ;;  %v3790_v26 = vld [vmem:[%s4851_s0 + $0x1f0] sm:$0xff] }
  0xb4   : > { %4162 = vmatmul.mubr.msk.f32.gmra.mrb[28].mxu0 %vm882_vm0, %v2550_v37  ;;  %v2543_v32 = vmul.f32 10.0, %v2275_v4  ;;  %v2276_v3 = vadd.f32 %v2268_v14, %v2260_v25  ;;  %v2509_v9 = vmul.f32 0.85, %v2273_v60  ;;  %4186 = vmatprep.mubr.msk.f32.mxu1 %vm882_vm0, %v2799_v30  ;;  %3002 = vst.msk [vmem:[#allocation2 + $0x10] sm:$0xff] %vm882_vm0, %v2799_v30  ;;  %3037 = vst.msk [vmem:[%s5242_s15 + $0x10] sm:$0xff] %vm882_vm0, %v2799_v30  ;;  %v3791_v27 = vld [vmem:[%s4851_s0 + $0x1f8] sm:$0xff] }
  0xb5   : > { %3010 = vst.msk [vmem:[#allocation3 + $0x10] sm:$0xff] %vm882_vm0, %v2775_v58  ;;  %3045 = vst.msk [vmem:[%s5248_s19 + $0x10] sm:$0xff] %vm882_vm0, %v2775_v58  ;;  %v2776_v24 = vadd.f32 %v2768_v2, %v2760_v31  ;;  %v2800_v35 = vadd.f32 %v2792_v29, %v2784_v7  ;;  %v2517_v39 = vmul.f32 6.6666665, %v3748_v43  ;;  %v2769_v40 = vmul.f32 6.6666665, %v3788_v21 }
  0xb6   : > { %v2551_v46 = vadd.f32 %v2543_v32, %v2535_v13  ;;  %v2544_v36 = vmul.f32 10.0, %v2276_v3  ;;  %v2785_v42 = vmul.f32 0.9, %v2549_v8  ;;  %v2510_v44 = vmul.f32 0.85, %v2274_v0  ;;  %s6020_s0 = sadd.s32 4294967295, %s4535_s26  }
  0xb7   : > { %4187 = vmatmul.mubr.msk.f32.gmra.mrb[26].mxu1 %vm882_vm0, %v2800_v35  ;;  %3003 = vst.msk [vmem:[#allocation2 + $0x18] sm:$0xff] %vm882_vm0, %v2800_v35  ;;  %3011 = vst.msk [vmem:[#allocation3 + $0x18] sm:$0xff] %vm882_vm0, %v2776_v24  ;;  %v2525_v23 = vadd.f32 %v2517_v39, %v2509_v9  ;;  %v2518_v49 = vmul.f32 6.6666665, %v3749_v18  ;;  %v2770_v52 = vmul.f32 6.6666665, %v3789_v20 }
  0xb8   : > { %3038 = vst.msk [vmem:[%s5242_s15 + $0x18] sm:$0xff] %vm882_vm0, %v2800_v35  ;;  %3046 = vst.msk [vmem:[%s5248_s19 + $0x18] sm:$0xff] %vm882_vm0, %v2776_v24  ;;  %v2786_v17 = vmul.f32 0.9, %v2550_v37  ;;  %4164 = vmatprep.mubr.msk.f32.mxu0 %vm882_vm0, %v2551_v46  ;;  %v2552_v5 = vadd.f32 %v2544_v36, %v2536_v33  ;;  %v2511_v47 = vmul.f32 0.85, %v2275_v4 }
  0xb9   : > { %v2519_v50 = vmul.f32 6.6666665, %v3750_v34  ;;  %v2771_v51 = vmul.f32 6.6666665, %v3790_v26  ;;  %v2761_v16 = vmul.f32 0.85, %v2525_v23  ;;  %v2526_v60 = vadd.f32 %v2518_v49, %v2510_v44 }
  0xba   : > { %v2793_v59 = vmul.f32 10.0, %v2525_v23  ;;  %v2787_v61 = vmul.f32 0.9, %v2551_v46  ;;  %4165 = vmatmul.mubr.msk.f32.gmra.mrb[30].mxu0 %vm882_vm0, %v2552_v5  ;;  %v2512_v53 = vmul.f32 0.85, %v2276_v3  ;;  %s5332_s14 = sand.u32 1, %s6020_s0  }
  0xbb   : > { %v2527_v62 = vadd.f32 %v2519_v50, %v2511_v47  ;;  %v2520_v45 = vmul.f32 6.6666665, %v3751_v41  ;;  %v2772_v57 = vmul.f32 6.6666665, %v3791_v27  ;;  %v2777_v56 = vadd.f32 %v2769_v40, %v2761_v16  ;;  %v908_v38 = vld [vmem:[%s844_s23 + $0x8] sm:$0xff]  ;;  %v910_v22 = vld [vmem:[%s844_s23 + $0x18] sm:$0xff] }
  0xbc   : > { %v2801_v63 = vadd.f32 %v2793_v59, %v2785_v42  ;;  %v2762_v54 = vmul.f32 0.85, %v2526_v60  ;;  %v2794_v28 = vmul.f32 10.0, %v2526_v60  ;;  %v2788_v11 = vmul.f32 0.9, %v2552_v5  ;;  %v909_v37 = vld [vmem:[%s844_s23 + $0x10] sm:$0xff] }
  0xbd   : > { %v2763_v0 = vmul.f32 0.85, %v2527_v62  ;;  %v2795_v55 = vmul.f32 10.0, %v2527_v62  ;;  %v2528_v1 = vadd.f32 %v2520_v45, %v2512_v53  ;;  %3012 = vst.msk [vmem:[#allocation3 + $0x20] sm:$0xff] %vm882_vm0, %v2777_v56  ;;  %3047 = vst.msk [vmem:[%s5248_s19 + $0x20] sm:$0xff] %vm882_vm0, %v2777_v56  ;;  %v912_v4 = vld [vmem:[%s844_s23 + $0x28] sm:$0xff] }
  0xbe   : > { %4189 = vmatprep.mubr.msk.f32.mxu1 %vm882_vm0, %v2801_v63  ;;  %3004 = vst.msk [vmem:[#allocation2 + $0x20] sm:$0xff] %vm882_vm0, %v2801_v63  ;;  %3039 = vst.msk [vmem:[%s5242_s15 + $0x20] sm:$0xff] %vm882_vm0, %v2801_v63  ;;  %v2778_v48 = vadd.f32 %v2770_v52, %v2762_v54  ;;  %v2802_v6 = vadd.f32 %v2794_v28, %v2786_v17  ;;  %v1037_v13 = vmul.f32 0.65, %v908_v38  ;;  %v924_v25 = vld [vmem:[%s5342_s18 + $0x8] sm:$0xff]  ;;  %v923_v21 = vld [vmem:[%s5342_s18] sm:$0xff] }
  0xbf   : > { %v2779_v2 = vadd.f32 %v2771_v51, %v2763_v0  ;;  %v2803_v7 = vadd.f32 %v2795_v55, %v2787_v61  ;;  %v2764_v8 = vmul.f32 0.85, %v2528_v1  ;;  %v2796_v10 = vmul.f32 10.0, %v2528_v1  ;;  %v5348_v14 = vld [vmem:[%s5995_s6] ss:$0 sm:$0xff]  ;;  %v926_v58 = vld [vmem:[%s5342_s18 + $0x18] sm:$0xff] }
  0xc0   : > { %4190 = vmatmul.mubr.msk.f32.gmra.mrb[28].mxu1 %vm882_vm0, %v2802_v6  ;;  %3005 = vst.msk [vmem:[#allocation2 + $0x28] sm:$0xff] %vm882_vm0, %v2802_v6  ;;  %3013 = vst.msk [vmem:[#allocation3 + $0x28] sm:$0xff] %vm882_vm0, %v2778_v48  ;;  %v1036_v43 = vmul.f32 0.65, %v907_v19  ;;  %v1039_v30 = vmul.f32 0.65, %v910_v22  ;;  %v1045_v3 = vsub.f32 %v1037_v13, %v924_v25 }
  0xc1   : > { %3040 = vst.msk [vmem:[%s5242_s15 + $0x28] sm:$0xff] %vm882_vm0, %v2802_v6  ;;  %3048 = vst.msk [vmem:[%s5248_s19 + $0x28] sm:$0xff] %vm882_vm0, %v2778_v48  ;;  %4192 = vmatprep.mubr.msk.f32.mxu1 %vm882_vm0, %v2803_v7  ;;  %v2780_v12 = vadd.f32 %v2772_v57, %v2764_v8  ;;  %v2804_v15 = vadd.f32 %v2796_v10, %v2788_v11  ;;  %v911_v31 = vld [vmem:[%s844_s23 + $0x20] sm:$0xff]  ;;  %v1038_v29 = vmul.f32 0.65, %v909_v37  ;;  %v914_v20 = vld [vmem:[%s844_s23 + $0x38] sm:$0xff] }
  0xc2   : > { %3006 = vst.msk [vmem:[#allocation2 + $0x30] sm:$0xff] %vm882_vm0, %v2803_v7  ;;  %3014 = vst.msk [vmem:[#allocation3 + $0x30] sm:$0xff] %vm882_vm0, %v2779_v2  ;;  %v1041_v18 = vmul.f32 0.65, %v912_v4  ;;  %v913_v32 = vld [vmem:[%s844_s23 + $0x30] sm:$0xff]  ;;  %v928_v9 = vld [vmem:[%s5342_s18 + $0x28] sm:$0xff]  ;;  %v1044_v24 = vsub.f32 %v1036_v43, %v923_v21  ;;  %v1047_v26 = vsub.f32 %v1039_v30, %v926_v58 }
  0xc3   : > { %3041 = vst.msk [vmem:[%s5242_s15 + $0x30] sm:$0xff] %vm882_vm0, %v2803_v7  ;;  %3049 = vst.msk [vmem:[%s5248_s19 + $0x30] sm:$0xff] %vm882_vm0, %v2779_v2  ;;  %v925_v33 = vld [vmem:[%s5342_s18 + $0x10] sm:$0xff]  ;;  %v1040_v35 = vmul.f32 0.65, %v911_v31  ;;  %v927_v41 = vld [vmem:[%s5342_s18 + $0x20] sm:$0xff] }
  0xc4   : > { %3007 = vst.msk [vmem:[#allocation2 + $0x38] sm:$0xff] %vm882_vm0, %v2804_v15  ;;  %3015 = vst.msk [vmem:[#allocation3 + $0x38] sm:$0xff] %vm882_vm0, %v2780_v12  ;;  %4193 = vmatmul.mubr.msk.f32.gmra.mrb[30].mxu1 %vm882_vm0, %v2804_v15  ;;  %v1043_v46 = vmul.f32 0.65, %v914_v20  ;;  %v1042_v36 = vmul.f32 0.65, %v913_v32  ;;  %v1046_v44 = vsub.f32 %v1038_v29, %v925_v33  ;;  %v1049_v27 = vsub.f32 %v1041_v18, %v928_v9 }
  0xc5   : > { %3042 = vst.msk [vmem:[%s5242_s15 + $0x38] sm:$0xff] %vm882_vm0, %v2804_v15  ;;  %3050 = vst.msk [vmem:[%s5248_s19 + $0x38] sm:$0xff] %vm882_vm0, %v2780_v12  ;;  %v930_v23 = vld [vmem:[%s5342_s18 + $0x38] sm:$0xff]  ;;  %v929_v49 = vld [vmem:[%s5342_s18 + $0x30] sm:$0xff]  ;;  %v1294_v17 = vmul.f32 0.65, %v1045_v3  ;;  %v1048_v16 = vsub.f32 %v1040_v35, %v927_v41 }
  0xc6   : > { %v1293_v5 = vmul.f32 0.65, %v1044_v24  ;;  %v1296_v47 = vmul.f32 0.65, %v1047_v26  ;;  %v1295_v59 = vmul.f32 0.65, %v1046_v44  ;;  %v5366_v53 = vsub.f32 %v1043_v46, %v930_v23 }
  0xc7   : > { %v5359_v60 = vmul.f32 0.65, %v1049_v27  ;;  %v5368_v45 = vsub.f32 %v1042_v36, %v929_v49  ;;  %v4537_v56 = vmov 0.0   ;;  %v1297_v54 = vmul.f32 0.65, %v1048_v16  ;;  %s5374_s0 = scalar_lea.vmem [#allocation7], %s4838_s17 }
  0xc8   : > { %v5379_v11 = vmul.f32 0.65, %v5366_v53  ;;  %s3513_s17 = sshll.u32 %s4830_s27, 6 }
  0xc9   : > { %v5384_v10 = vmul.f32 0.65, %v5368_v45  ;;  %s5756_s29 = scalar_lea.vmem [#allocation11], %s3513_s17  ;;  %s5775_s28 = scalar_lea.vmem [#allocation12], %s3513_s17 }
 0x139   : > { %v3989_v34 = vpop.f32.mrb[0].mxu0 }
 0x13a   : > { %v1155_v39 = vadd.f32 %v3989_v34, %v5348_v14  ;;  %v1149_v40 = vpop.f32.mrb[1].mxu0 }
 0x13b   : > { %v1150_v42 = vadd.f32 %v5348_v14, %v1149_v40 }
 0x13c   : > { %v1189_v52 = vadd.f32 %v1155_v39, %v1045_v3 }
 0x13d   : > { %v1188_v50 = vadd.f32 %v1150_v42, %v1044_v24  ;;  %v3992_v51 = vpop.f32.mrb[2].mxu0 }
 0x13e   : > { %vm1197_vm1 = vcmp.gt.f32.partialorder %v1189_v52, 0.0  ;;  %1221 = vst [vmem:[%s5362_s20 + $0x8] sm:$0xff] %v1189_v52  ;;  %v1165_v61 = vadd.f32 %v3992_v51, %v5348_v14  ;;  %v1159_v62 = vpop.f32.mrb[3].mxu0 }
 0x13f   : > { %vm1196_vm2 = vcmp.gt.f32.partialorder %v1188_v50, 0.0  ;;  %1220 = vst [vmem:[%s5362_s20] sm:$0xff] %v1188_v50  ;;  %v1160_v57 = vadd.f32 %v5348_v14, %v1159_v62  ;;  %v3537_v63 = vsel %vm1197_vm1, 1.0, %v4537_v56  ;;  %v4017_v55 = vpop.f32.mrb[0].mxu1 }
 0x140   : > { %v1191_v28 = vadd.f32 %v1165_v61, %v1047_v26  ;;  %1229 = vst [vmem:[%s5374_s0 + $0x8] sm:$0xff] %v3537_v63  ;;  %v1302_v0 = vsub.f32 %v1294_v17, %v3537_v63  ;;  %v3536_v1 = vsel %vm1196_vm2, 1.0, %v4537_v56  ;;  %v1405_v6 = vadd.f32 %v4017_v55, %v5348_v14  ;;  %v1399_v7 = vpop.f32.mrb[1].mxu1 }
 0x141   : > { %v1190_v48 = vadd.f32 %v1160_v57, %v1046_v44  ;;  %1228 = vst [vmem:[%s5374_s0] sm:$0xff] %v3536_v1  ;;  %v1301_v2 = vsub.f32 %v1293_v5, %v3536_v1  ;;  %v3995_v8 = vpop.f32.mrb[4].mxu0  ;;  %v1400_v12 = vadd.f32 %v5348_v14, %v1399_v7 }
 0x142   : > { %vm1199_vm3 = vcmp.gt.f32.partialorder %v1191_v28, 0.0  ;;  %1223 = vst [vmem:[%s5362_s20 + $0x18] sm:$0xff] %v1191_v28  ;;  %v1175_v15 = vadd.f32 %v3995_v8, %v5348_v14  ;;  %v1169_v38 = vpop.f32.mrb[5].mxu0  ;;  %v1546_v19 = vmul.f32 0.65, %v1302_v0  ;;  %v1439_v22 = vadd.f32 %v1405_v6, %v1302_v0 }
 0x143   : > { %vm1198_vm4 = vcmp.gt.f32.partialorder %v1190_v48, 0.0  ;;  %1222 = vst [vmem:[%s5362_s20 + $0x10] sm:$0xff] %v1190_v48  ;;  %v1170_v13 = vadd.f32 %v5348_v14, %v1169_v38  ;;  %v3539_v37 = vsel %vm1199_vm3, 1.0, %v4537_v56  ;;  %v1438_v4 = vadd.f32 %v1400_v12, %v1301_v2 }
 0x144   : > { %v1193_v25 = vadd.f32 %v1175_v15, %v1049_v27  ;;  %1231 = vst [vmem:[%s5374_s0 + $0x18] sm:$0xff] %v3539_v37  ;;  %v1304_v43 = vsub.f32 %v1296_v47, %v3539_v37  ;;  %v3538_v21 = vsel %vm1198_vm4, 1.0, %v4537_v56  ;;  %vm1447_vm5 = vcmp.gt.f32.partialorder %v1439_v22, 0.0  ;;  %3569 = vst [vmem:[%s5362_s20 + $0x48] sm:$0xff] %v1439_v22  ;;  %v4020_v30 = vpop.f32.mrb[2].mxu1 }
 0x145   : > { %v1192_v58 = vadd.f32 %v1170_v13, %v1048_v16  ;;  %1230 = vst [vmem:[%s5374_s0 + $0x10] sm:$0xff] %v3538_v21  ;;  %v1303_v31 = vsub.f32 %v1295_v59, %v3538_v21  ;;  %v1545_v29 = vmul.f32 0.65, %v1301_v2  ;;  %vm1446_vm6 = vcmp.gt.f32.partialorder %v1438_v4, 0.0  ;;  %3568 = vst [vmem:[%s5362_s20 + $0x40] sm:$0xff] %v1438_v4  ;;  %v1409_v20 = vpop.f32.mrb[3].mxu1 }
 0x146   : > { %vm1201_vm7 = vcmp.gt.f32.partialorder %v1193_v25, 0.0  ;;  %1225 = vst [vmem:[%s5362_s20 + $0x28] sm:$0xff] %v1193_v25  ;;  %v1415_v18 = vadd.f32 %v4020_v30, %v5348_v14  ;;  %v3998_v32 = vpop.f32.mrb[6].mxu0  ;;  %v3561_v3 = vsel %vm1447_vm5, 1.0, %v4537_v56  ;;  %v1410_v33 = vadd.f32 %v5348_v14, %v1409_v20 }
 0x147   : > { %vm1200_vm8 = vcmp.gt.f32.partialorder %v1192_v58, 0.0  ;;  %1224 = vst [vmem:[%s5362_s20 + $0x20] sm:$0xff] %v1192_v58  ;;  %v1185_v9 = vadd.f32 %v3998_v32, %v5348_v14  ;;  %v1179_v34 = vpop.f32.mrb[7].mxu0  ;;  %v3541_v24 = vsel %vm1201_vm7, 1.0, %v4537_v56  ;;  %3577 = vst [vmem:[%s5374_s0 + $0x48] sm:$0xff] %v3561_v3  ;;  %v1554_v42 = vsub.f32 %v1546_v19, %v3561_v3 }
 0x148   : > { %v1441_v35 = vadd.f32 %v1415_v18, %v1304_v43  ;;  %v1180_v39 = vadd.f32 %v5348_v14, %v1179_v34  ;;  %1233 = vst [vmem:[%s5374_s0 + $0x28] sm:$0xff] %v3541_v24  ;;  %v1306_v40 = vsub.f32 %v5359_v60, %v3541_v24  ;;  %v3540_v26 = vsel %vm1200_vm8, 1.0, %v4537_v56 }
 0x149   : > { %v1440_v41 = vadd.f32 %v1410_v33, %v1303_v31  ;;  %v1195_v46 = vadd.f32 %v1185_v9, %v5366_v53  ;;  %1232 = vst [vmem:[%s5374_s0 + $0x20] sm:$0xff] %v3540_v26  ;;  %v5411_v36 = vsub.f32 %v1297_v54, %v3540_v26  ;;  %v3560_v27 = vsel %vm1446_vm6, 1.0, %v4537_v56 }
 0x14a   : > { %vm1449_vm9 = vcmp.gt.f32.partialorder %v1441_v35, 0.0  ;;  %3571 = vst [vmem:[%s5362_s20 + $0x58] sm:$0xff] %v1441_v35  ;;  %v1194_v44 = vadd.f32 %v1180_v39, %v5368_v45  ;;  %v1548_v23 = vmul.f32 0.65, %v1304_v43  ;;  %v4045_v49 = vpop.f32.mrb[8].mxu0  ;;  %3576 = vst [vmem:[%s5374_s0 + $0x40] sm:$0xff] %v3560_v27  ;;  %v1553_v52 = vsub.f32 %v1545_v29, %v3560_v27 }
 0x14b   : > { %vm1448_vm10 = vcmp.gt.f32.partialorder %v1440_v41, 0.0  ;;  %3570 = vst [vmem:[%s5362_s20 + $0x50] sm:$0xff] %v1440_v41  ;;  %vm1203_vm11 = vcmp.gt.f32.partialorder %v1195_v46, 0.0  ;;  %1227 = vst [vmem:[%s5362_s20 + $0x38] sm:$0xff] %v1195_v46  ;;  %v3563_v17 = vsel %vm1449_vm9, 1.0, %v4537_v56  ;;  %v1657_v47 = vadd.f32 %v4045_v49, %v5348_v14  ;;  %v1651_v51 = vpop.f32.mrb[9].mxu0 }
 0x14c   : > { %vm1202_vm12 = vcmp.gt.f32.partialorder %v1194_v44, 0.0  ;;  %1226 = vst [vmem:[%s5362_s20 + $0x30] sm:$0xff] %v1194_v44  ;;  %v4023_v5 = vpop.f32.mrb[4].mxu1  ;;  %v3543_v50 = vsel %vm1203_vm11, 1.0, %v4537_v56  ;;  %3579 = vst [vmem:[%s5374_s0 + $0x58] sm:$0xff] %v3563_v17  ;;  %v5425_v16 = vsub.f32 %v1548_v23, %v3563_v17  ;;  %v1652_v62 = vadd.f32 %v5348_v14, %v1651_v51 }
 0x14d   : > { %v1425_v59 = vadd.f32 %v4023_v5, %v5348_v14  ;;  %v1419_v60 = vpop.f32.mrb[5].mxu1  ;;  %1235 = vst [vmem:[%s5374_s0 + $0x38] sm:$0xff] %v3543_v50  ;;  %v5430_v61 = vsub.f32 %v5379_v11, %v3543_v50  ;;  %v3542_v53 = vsel %vm1202_vm12, 1.0, %v4537_v56  ;;  %v1691_v57 = vadd.f32 %v1657_v47, %v1554_v42 }
 0x14e   : > { %v1420_v45 = vadd.f32 %v5348_v14, %v1419_v60  ;;  %1234 = vst [vmem:[%s5374_s0 + $0x30] sm:$0xff] %v3542_v53  ;;  %v5437_v63 = vsub.f32 %v5384_v10, %v3542_v53  ;;  %v3562_v54 = vsel %vm1448_vm10, 1.0, %v4537_v56  ;;  %v1690_v0 = vadd.f32 %v1652_v62, %v1553_v52 }
 0x14f   : > { %v1443_v28 = vadd.f32 %v1425_v59, %v1306_v40  ;;  %3578 = vst [vmem:[%s5374_s0 + $0x50] sm:$0xff] %v3562_v54  ;;  %v1547_v55 = vmul.f32 0.65, %v1303_v31  ;;  %v1798_v1 = vmul.f32 0.65, %v1554_v42  ;;  %vm1699_vm13 = vcmp.gt.f32.partialorder %v1691_v57, 0.0 }
 0x150   : > { %v1442_v11 = vadd.f32 %v1420_v45, %v5411_v36  ;;  %3609 = vst [vmem:[%s5362_s20 + $0x88] sm:$0xff] %v1691_v57  ;;  %v4026_v48 = vpop.f32.mrb[6].mxu1  ;;  %v1797_v6 = vmul.f32 0.65, %v1553_v52  ;;  %v1550_v2 = vmul.f32 0.65, %v1306_v40 }
 0x151   : > { %vm1451_vm14 = vcmp.gt.f32.partialorder %v1443_v28, 0.0  ;;  %3573 = vst [vmem:[%s5362_s20 + $0x68] sm:$0xff] %v1443_v28  ;;  %v1435_v7 = vadd.f32 %v4026_v48, %v5348_v14  ;;  %vm1698_vm15 = vcmp.gt.f32.partialorder %v1690_v0, 0.0  ;;  %3608 = vst [vmem:[%s5362_s20 + $0x80] sm:$0xff] %v1690_v0  ;;  %v1429_v8 = vpop.f32.mrb[7].mxu1  ;;  %v4048_v10 = vpop.f32.mrb[10].mxu0  ;;  %v1555_v12 = vsub.f32 %v1547_v55, %v3562_v54 }
 0x152   : > { %vm1450_vm0 = vcmp.gt.f32.partialorder %v1442_v11, 0.0  ;;  %3572 = vst [vmem:[%s5362_s20 + $0x60] sm:$0xff] %v1442_v11  ;;  %v1430_v15 = vadd.f32 %v5348_v14, %v1429_v8  ;;  %v1667_v38 = vadd.f32 %v4048_v10, %v5348_v14  ;;  %v1661_v19 = vpop.f32.mrb[11].mxu0  ;;  %v3601_v22 = vsel %vm1699_vm13, 1.0, %v4537_v56 }
 0x153   : > { %v1445_v13 = vadd.f32 %v1435_v7, %v5430_v61  ;;  %v1662_v37 = vadd.f32 %v5348_v14, %v1661_v19  ;;  %3617 = vst [vmem:[%s5374_s0 + $0x88] sm:$0xff] %v3601_v22  ;;  %v5455_v4 = vsub.f32 %v1798_v1, %v3601_v22  ;;  %v3600_v25 = vsel %vm1698_vm15, 1.0, %v4537_v56 }
 0x154   : > { %v1444_v43 = vadd.f32 %v1430_v15, %v5437_v63  ;;  %v1693_v21 = vadd.f32 %v1667_v38, %v5425_v16  ;;  %v4073_v58 = vpop.f32.mrb[8].mxu1  ;;  %3616 = vst [vmem:[%s5374_s0 + $0x80] sm:$0xff] %v3600_v25  ;;  %v5461_v30 = vsub.f32 %v1797_v6, %v3600_v25  ;;  %v3565_v31 = vsel %vm1451_vm14, 1.0, %v4537_v56  ;;  %v4051_v3 = vpop.f32.mrb[12].mxu0 }
 0x155   : > { %vm1453_vm1 = vcmp.gt.f32.partialorder %v1445_v13, 0.0  ;;  %3575 = vst [vmem:[%s5362_s20 + $0x78] sm:$0xff] %v1445_v13  ;;  %v1692_v29 = vadd.f32 %v1662_v37, %v1555_v12  ;;  %v1909_v18 = vadd.f32 %v4073_v58, %v5348_v14  ;;  %v1903_v20 = vpop.f32.mrb[9].mxu1  ;;  %3581 = vst [vmem:[%s5374_s0 + $0x68] sm:$0xff] %v3565_v31  ;;  %v1558_v32 = vsub.f32 %v1550_v2, %v3565_v31  ;;  %v1671_v34 = vpop.f32.mrb[13].mxu0 }
 0x156   : > { %vm1452_vm2 = vcmp.gt.f32.partialorder %v1444_v43, 0.0  ;;  %3574 = vst [vmem:[%s5362_s20 + $0x70] sm:$0xff] %v1444_v43  ;;  %vm1701_vm3 = vcmp.gt.f32.partialorder %v1693_v21, 0.0  ;;  %3611 = vst [vmem:[%s5362_s20 + $0x98] sm:$0xff] %v1693_v21  ;;  %v1904_v33 = vadd.f32 %v5348_v14, %v1903_v20  ;;  %v1677_v9 = vadd.f32 %v4051_v3, %v5348_v14 }
 0x157   : > { %vm1700_vm4 = vcmp.gt.f32.partialorder %v1692_v29, 0.0  ;;  %3610 = vst [vmem:[%s5362_s20 + $0x90] sm:$0xff] %v1692_v29  ;;  %v1943_v24 = vadd.f32 %v1909_v18, %v5455_v4  ;;  %v3564_v35 = vsel %vm1450_vm0, 1.0, %v4537_v56  ;;  %v1549_v39 = vmul.f32 0.65, %v5411_v36 }
 0x158   : > { %v5478_v40 = vadd.f32 %v1904_v33, %v5461_v30  ;;  %v1695_v26 = vadd.f32 %v1677_v9, %v1558_v32  ;;  %3580 = vst [vmem:[%s5374_s0 + $0x60] sm:$0xff] %v3564_v35  ;;  %v1672_v41 = vadd.f32 %v5348_v14, %v1671_v34  ;;  %v3603_v46 = vsel %vm1701_vm3, 1.0, %v4537_v56  ;;  %v4076_v42 = vpop.f32.mrb[10].mxu1 }
 0x159   : > { %vm1951_vm5 = vcmp.gt.f32.partialorder %v1943_v24, 0.0  ;;  %3649 = vst [vmem:[%s5362_s20 + $0xc8] sm:$0xff] %v1943_v24  ;;  %v1557_v44 = vsub.f32 %v1549_v39, %v3564_v35  ;;  %3619 = vst [vmem:[%s5374_s0 + $0x98] sm:$0xff] %v3603_v46  ;;  %v1800_v27 = vmul.f32 0.65, %v5425_v16  ;;  %v1919_v36 = vadd.f32 %v4076_v42, %v5348_v14  ;;  %v1913_v23 = vpop.f32.mrb[11].mxu1 }
 0x15a   : > { %vm1950_vm6 = vcmp.gt.f32.partialorder %v5478_v40, 0.0  ;;  %3648 = vst [vmem:[%s5362_s20 + $0xc0] sm:$0xff] %v5478_v40  ;;  %vm1703_vm7 = vcmp.gt.f32.partialorder %v1695_v26, 0.0  ;;  %3613 = vst [vmem:[%s5362_s20 + $0xa8] sm:$0xff] %v1695_v26  ;;  %v3602_v49 = vsel %vm1700_vm4, 1.0, %v4537_v56  ;;  %v1914_v47 = vadd.f32 %v5348_v14, %v1913_v23  ;;  %v4054_v51 = vpop.f32.mrb[14].mxu0 }
 0x15b   : > { %v1799_v52 = vmul.f32 0.65, %v1555_v12  ;;  %v1694_v17 = vadd.f32 %v1672_v41, %v1557_v44  ;;  %v5493_v5 = vsub.f32 %v1800_v27, %v3603_v46  ;;  %3618 = vst [vmem:[%s5374_s0 + $0x90] sm:$0xff] %v3602_v49  ;;  %v3567_v50 = vsel %vm1453_vm1, 1.0, %v4537_v56  ;;  %v1681_v53 = vpop.f32.mrb[15].mxu0 }
 0x15c   : > { %3583 = vst [vmem:[%s5374_s0 + $0x78] sm:$0xff] %v3567_v50  ;;  %v1552_v59 = vmul.f32 0.65, %v5430_v61  ;;  %v1687_v60 = vadd.f32 %v4054_v51, %v5348_v14  ;;  %v3566_v62 = vsel %vm1452_vm2, 1.0, %v4537_v56  ;;  %v1551_v57 = vmul.f32 0.65, %v5437_v63 }
 0x15d   : > { %v5499_v16 = vsub.f32 %v1799_v52, %v3602_v49  ;;  %vm1702_vm8 = vcmp.gt.f32.partialorder %v1694_v17, 0.0  ;;  %3612 = vst [vmem:[%s5362_s20 + $0xa0] sm:$0xff] %v1694_v17  ;;  %v5508_v45 = vadd.f32 %v1919_v36, %v5493_v5  ;;  %3582 = vst [vmem:[%s5374_s0 + $0x70] sm:$0xff] %v3566_v62  ;;  %v1682_v54 = vadd.f32 %v5348_v14, %v1681_v53 }
 0x15e   : > { %v1560_v28 = vsub.f32 %v1552_v59, %v3567_v50  ;;  %v3605_v0 = vsel %vm1703_vm7, 1.0, %v4537_v56  ;;  %v1802_v55 = vmul.f32 0.65, %v1558_v32  ;;  %v4079_v1 = vpop.f32.mrb[12].mxu1  ;;  %v1559_v11 = vsub.f32 %v1551_v57, %v3566_v62 }
 0x15f   : > { %v5514_v61 = vadd.f32 %v1914_v47, %v5499_v16  ;;  %vm1953_vm9 = vcmp.gt.f32.partialorder %v5508_v45, 0.0  ;;  %3651 = vst [vmem:[%s5362_s20 + $0xd8] sm:$0xff] %v5508_v45  ;;  %3621 = vst [vmem:[%s5374_s0 + $0xa8] sm:$0xff] %v3605_v0  ;;  %v1929_v63 = vadd.f32 %v4079_v1, %v5348_v14  ;;  %v3604_v48 = vsel %vm1702_vm8, 1.0, %v4537_v56  ;;  %v1923_v6 = vpop.f32.mrb[13].mxu1 }
 0x160   : > { %v1697_v2 = vadd.f32 %v1687_v60, %v1560_v28  ;;  %v5528_v7 = vsub.f32 %v1802_v55, %v3605_v0  ;;  %3620 = vst [vmem:[%s5374_s0 + $0xa0] sm:$0xff] %v3604_v48  ;;  %v1801_v8 = vmul.f32 0.65, %v1557_v44  ;;  %v1696_v10 = vadd.f32 %v1682_v54, %v1559_v11 }
 0x161   : > { %vm1952_vm10 = vcmp.gt.f32.partialorder %v5514_v61, 0.0  ;;  %3650 = vst [vmem:[%s5362_s20 + $0xd0] sm:$0xff] %v5514_v61  ;;  %v1924_v12 = vadd.f32 %v5348_v14, %v1923_v6  ;;  %v3641_v15 = vsel %vm1951_vm5, 1.0, %v4537_v56  ;;  %v2050_v38 = vmul.f32 0.65, %v5455_v4  ;;  %v4101_v13 = vpop.f32.mrb[16].mxu0 }
 0x162   : > { %vm1705_vm11 = vcmp.gt.f32.partialorder %v1697_v2, 0.0  ;;  %3615 = vst [vmem:[%s5362_s20 + $0xb8] sm:$0xff] %v1697_v2  ;;  %v5537_v19 = vadd.f32 %v1929_v63, %v5528_v7  ;;  %v5539_v22 = vsub.f32 %v1801_v8, %v3604_v48  ;;  %3657 = vst [vmem:[%s5374_s0 + $0xc8] sm:$0xff] %v3641_v15  ;;  %v1804_v37 = vmul.f32 0.65, %v1560_v28  ;;  %v2155_v58 = vpop.f32.mrb[17].mxu0 }
 0x163   : > { %vm1704_vm12 = vcmp.gt.f32.partialorder %v1696_v10, 0.0  ;;  %3614 = vst [vmem:[%s5362_s20 + $0xb0] sm:$0xff] %v1696_v10  ;;  %v2058_v25 = vsub.f32 %v2050_v38, %v3641_v15  ;;  %v2161_v43 = vadd.f32 %v4101_v13, %v5348_v14  ;;  %v3607_v4 = vsel %vm1705_vm11, 1.0, %v4537_v56  ;;  %v4082_v21 = vpop.f32.mrb[14].mxu1 }
 0x164   : > { %vm1955_vm13 = vcmp.gt.f32.partialorder %v5537_v19, 0.0  ;;  %3653 = vst [vmem:[%s5362_s20 + $0xe8] sm:$0xff] %v5537_v19  ;;  %v5549_v31 = vadd.f32 %v1924_v12, %v5539_v22  ;;  %3623 = vst [vmem:[%s5374_s0 + $0xb8] sm:$0xff] %v3607_v4  ;;  %v5552_v29 = vsub.f32 %v1804_v37, %v3607_v4  ;;  %v1939_v18 = vadd.f32 %v4082_v21, %v5348_v14  ;;  %v1933_v20 = vpop.f32.mrb[15].mxu1 }
 0x165   : > { %v2195_v32 = vadd.f32 %v2161_v43, %v2058_v25  ;;  %v3640_v3 = vsel %vm1950_vm6, 1.0, %v4537_v56  ;;  %v2049_v33 = vmul.f32 0.65, %v5461_v30  ;;  %v2156_v9 = vadd.f32 %v5348_v14, %v2155_v58 }
 0x166   : > { %vm1954_vm14 = vcmp.gt.f32.partialorder %v5549_v31, 0.0  ;;  %3652 = vst [vmem:[%s5362_s20 + $0xe0] sm:$0xff] %v5549_v31  ;;  %v5564_v34 = vadd.f32 %v1939_v18, %v5552_v29  ;;  %3656 = vst [vmem:[%s5374_s0 + $0xc0] sm:$0xff] %v3640_v3  ;;  %v3606_v24 = vsel %vm1704_vm12, 1.0, %v4537_v56  ;;  %v1803_v35 = vmul.f32 0.65, %v1559_v11 }
 0x167   : > { %vm2203_vm15 = vcmp.gt.f32.partialorder %v2195_v32, 0.0  ;;  %3689 = vst [vmem:[%s5362_s20 + $0x108] sm:$0xff] %v2195_v32  ;;  %v2057_v39 = vsub.f32 %v2049_v33, %v3640_v3  ;;  %3622 = vst [vmem:[%s5374_s0 + $0xb0] sm:$0xff] %v3606_v24  ;;  %v1934_v30 = vadd.f32 %v5348_v14, %v1933_v20  ;;  %v3643_v40 = vsel %vm1953_vm9, 1.0, %v4537_v56  ;;  %v4104_v26 = vpop.f32.mrb[18].mxu0 }
 0x168   : > { %vm1957_vm0 = vcmp.gt.f32.partialorder %v5564_v34, 0.0  ;;  %3655 = vst [vmem:[%s5362_s20 + $0xf8] sm:$0xff] %v5564_v34  ;;  %v5578_v41 = vsub.f32 %v1803_v35, %v3606_v24  ;;  %3659 = vst [vmem:[%s5374_s0 + $0xd8] sm:$0xff] %v3643_v40  ;;  %v2052_v46 = vmul.f32 0.65, %v5493_v5  ;;  %v2171_v42 = vadd.f32 %v4104_v26, %v5348_v14  ;;  %v2165_v44 = vpop.f32.mrb[19].mxu0 }
 0x169   : > { %v2194_v27 = vadd.f32 %v2156_v9, %v2057_v39  ;;  %v3642_v36 = vsel %vm1952_vm10, 1.0, %v4537_v56  ;;  %v2051_v23 = vmul.f32 0.65, %v5499_v16  ;;  %v2166_v49 = vadd.f32 %v5348_v14, %v2165_v44  ;;  %v4129_v50 = vpop.f32.mrb[16].mxu1 }
 0x16a   : > { %v5589_v52 = vadd.f32 %v1934_v30, %v5578_v41  ;;  %v2060_v17 = vsub.f32 %v2052_v46, %v3643_v40  ;;  %3658 = vst [vmem:[%s5374_s0 + $0xd0] sm:$0xff] %v3642_v36  ;;  %v3681_v5 = vsel %vm2203_vm15, 1.0, %v4537_v56  ;;  %v2302_v47 = vmul.f32 0.65, %v2058_v25  ;;  %v2407_v60 = vpop.f32.mrb[17].mxu1 }
 0x16b   : > { %vm2202_vm1 = vcmp.gt.f32.partialorder %v2194_v27, 0.0  ;;  %3688 = vst [vmem:[%s5362_s20 + $0x100] sm:$0xff] %v2194_v27  ;;  %v2059_v51 = vsub.f32 %v2051_v23, %v3642_v36  ;;  %3697 = vst [vmem:[%s5374_s0 + $0x108] sm:$0xff] %v3681_v5  ;;  %v2413_v16 = vadd.f32 %v4129_v50, %v5348_v14  ;;  %v2301_v59 = vmul.f32 0.65, %v2057_v39 }
 0x16c   : > { %vm1956_vm2 = vcmp.gt.f32.partialorder %v5589_v52, 0.0  ;;  %3654 = vst [vmem:[%s5362_s20 + $0xf0] sm:$0xff] %v5589_v52  ;;  %v2197_v62 = vadd.f32 %v2171_v42, %v2060_v17  ;;  %v5600_v53 = vsub.f32 %v2302_v47, %v3681_v5  ;;  %v3680_v45 = vsel %vm2202_vm1, 1.0, %v4537_v56  ;;  %v4107_v0 = vpop.f32.mrb[20].mxu0 }
 0x16d   : > { %v2196_v57 = vadd.f32 %v2166_v49, %v2059_v51  ;;  %3696 = vst [vmem:[%s5374_s0 + $0x100] sm:$0xff] %v3680_v45  ;;  %v5604_v54 = vsub.f32 %v2301_v59, %v3680_v45  ;;  %v2408_v61 = vadd.f32 %v5348_v14, %v2407_v60  ;;  %v3645_v28 = vsel %vm1955_vm13, 1.0, %v4537_v56  ;;  %v2175_v63 = vpop.f32.mrb[21].mxu0 }
 0x16e   : > { %vm2205_vm3 = vcmp.gt.f32.partialorder %v2197_v62, 0.0  ;;  %3691 = vst [vmem:[%s5362_s20 + $0x118] sm:$0xff] %v2197_v62  ;;  %v5612_v55 = vadd.f32 %v2413_v16, %v5600_v53  ;;  %3661 = vst [vmem:[%s5374_s0 + $0xe8] sm:$0xff] %v3645_v28  ;;  %v2054_v1 = vmul.f32 0.65, %v5528_v7  ;;  %v2181_v11 = vadd.f32 %v4107_v0, %v5348_v14 }
 0x16f   : > { %vm2204_vm4 = vcmp.gt.f32.partialorder %v2196_v57, 0.0  ;;  %3690 = vst [vmem:[%s5362_s20 + $0x110] sm:$0xff] %v2196_v57  ;;  %v5619_v48 = vadd.f32 %v2408_v61, %v5604_v54  ;;  %v3644_v6 = vsel %vm1954_vm14, 1.0, %v4537_v56  ;;  %v2053_v2 = vmul.f32 0.65, %v5539_v22  ;;  %v4132_v12 = vpop.f32.mrb[18].mxu1 }
 0x170   : > { %vm2455_vm5 = vcmp.gt.f32.partialorder %v5612_v55, 0.0  ;;  %3729 = vst [vmem:[%s5362_s20 + $0x148] sm:$0xff] %v5612_v55  ;;  %v2062_v7 = vsub.f32 %v2054_v1, %v3645_v28  ;;  %3660 = vst [vmem:[%s5374_s0 + $0xe0] sm:$0xff] %v3644_v6  ;;  %v2176_v8 = vadd.f32 %v5348_v14, %v2175_v63  ;;  %v3683_v10 = vsel %vm2205_vm3, 1.0, %v4537_v56  ;;  %v2417_v22 = vpop.f32.mrb[19].mxu1 }
 0x171   : > { %vm2454_vm6 = vcmp.gt.f32.partialorder %v5619_v48, 0.0  ;;  %3728 = vst [vmem:[%s5362_s20 + $0x140] sm:$0xff] %v5619_v48  ;;  %v2061_v15 = vsub.f32 %v2053_v2, %v3644_v6  ;;  %3699 = vst [vmem:[%s5374_s0 + $0x118] sm:$0xff] %v3683_v10  ;;  %v2304_v38 = vmul.f32 0.65, %v2060_v17  ;;  %v2423_v19 = vadd.f32 %v4132_v12, %v5348_v14 }
 0x172   : > { %v2199_v13 = vadd.f32 %v2181_v11, %v2062_v7  ;;  %v3682_v37 = vsel %vm2204_vm4, 1.0, %v4537_v56  ;;  %v2303_v25 = vmul.f32 0.65, %v2059_v51  ;;  %v2418_v43 = vadd.f32 %v5348_v14, %v2417_v22  ;;  %v4110_v18 = vpop.f32.mrb[22].mxu0 }
 0x173   : > { %v2198_v4 = vadd.f32 %v2176_v8, %v2061_v15  ;;  %v5640_v21 = vsub.f32 %v2304_v38, %v3683_v10  ;;  %3698 = vst [vmem:[%s5374_s0 + $0x110] sm:$0xff] %v3682_v37  ;;  %v3647_v58 = vsel %vm1957_vm0, 1.0, %v4537_v56  ;;  %v2056_v31 = vmul.f32 0.65, %v5552_v29  ;;  %v2185_v33 = vpop.f32.mrb[23].mxu0 }
 0x174   : > { %vm2207_vm7 = vcmp.gt.f32.partialorder %v2199_v13, 0.0  ;;  %3693 = vst [vmem:[%s5362_s20 + $0x128] sm:$0xff] %v2199_v13  ;;  %v5648_v20 = vsub.f32 %v2303_v25, %v3682_v37  ;;  %3663 = vst [vmem:[%s5374_s0 + $0xf8] sm:$0xff] %v3647_v58  ;;  %v2191_v32 = vadd.f32 %v4110_v18, %v5348_v14  ;;  %v3646_v3 = vsel %vm1956_vm2, 1.0, %v4537_v56 }
 0x175   : > { %vm2206_vm8 = vcmp.gt.f32.partialorder %v2198_v4, 0.0  ;;  %3692 = vst [vmem:[%s5362_s20 + $0x120] sm:$0xff] %v2198_v4  ;;  %v2449_v9 = vadd.f32 %v2423_v19, %v5640_v21  ;;  %v2064_v29 = vsub.f32 %v2056_v31, %v3647_v58  ;;  %3662 = vst [vmem:[%s5374_s0 + $0xf0] sm:$0xff] %v3646_v3  ;;  %v2055_v34 = vmul.f32 0.65, %v5578_v41  ;;  %v4135_v40 = vpop.f32.mrb[20].mxu1 }
 0x176   : > { %v5660_v24 = vadd.f32 %v2418_v43, %v5648_v20  ;;  %v2186_v35 = vadd.f32 %v5348_v14, %v2185_v33  ;;  %v3685_v39 = vsel %vm2207_vm7, 1.0, %v4537_v56  ;;  %v2306_v30 = vmul.f32 0.65, %v2062_v7  ;;  %v2427_v41 = vpop.f32.mrb[21].mxu1 }
 0x177   : > { %vm2457_vm9 = vcmp.gt.f32.partialorder %v2449_v9, 0.0  ;;  %3731 = vst [vmem:[%s5362_s20 + $0x158] sm:$0xff] %v2449_v9  ;;  %v2201_v26 = vadd.f32 %v2191_v32, %v2064_v29  ;;  %v2063_v46 = vsub.f32 %v2055_v34, %v3646_v3  ;;  %3701 = vst [vmem:[%s5374_s0 + $0x128] sm:$0xff] %v3685_v39  ;;  %v2433_v42 = vadd.f32 %v4135_v40, %v5348_v14 }
 0x178   : > { %vm2456_vm10 = vcmp.gt.f32.partialorder %v5660_v24, 0.0  ;;  %3730 = vst [vmem:[%s5362_s20 + $0x150] sm:$0xff] %v5660_v24  ;;  %v5670_v44 = vsub.f32 %v2306_v30, %v3685_v39  ;;  %v3684_v27 = vsel %vm2206_vm8, 1.0, %v4537_v56  ;;  %v2305_v36 = vmul.f32 0.65, %v2061_v15 }
 0x179   : > { %vm2209_vm11 = vcmp.gt.f32.partialorder %v2201_v26, 0.0  ;;  %3695 = vst [vmem:[%s5362_s20 + $0x138] sm:$0xff] %v2201_v26  ;;  %v2200_v23 = vadd.f32 %v2186_v35, %v2063_v46  ;;  %3700 = vst [vmem:[%s5374_s0 + $0x120] sm:$0xff] %v3684_v27  ;;  %v2428_v49 = vadd.f32 %v5348_v14, %v2427_v41  ;;  %v3721_v52 = vsel %vm2455_vm5, 1.0, %v4537_v56  ;;  %v4157_v50 = vpop.f32.mrb[24].mxu0 }
 0x17a   : > { %v5681_v17 = vadd.f32 %v2433_v42, %v5670_v44  ;;  %v5683_v5 = vsub.f32 %v2305_v36, %v3684_v27  ;;  %3737 = vst [vmem:[%s5374_s0 + $0x148] sm:$0xff] %v3721_v52  ;;  %v2554_v47 = vmul.f32 0.65, %v5600_v53  ;;  %v3687_v51 = vsel %vm2209_vm11, 1.0, %v4537_v56  ;;  %v2659_v62 = vpop.f32.mrb[25].mxu0 }
 0x17b   : > { %vm2208_vm12 = vcmp.gt.f32.partialorder %v2200_v23, 0.0  ;;  %3694 = vst [vmem:[%s5362_s20 + $0x130] sm:$0xff] %v2200_v23  ;;  %v2665_v16 = vadd.f32 %v4157_v50, %v5348_v14  ;;  %3703 = vst [vmem:[%s5374_s0 + $0x138] sm:$0xff] %v3687_v51  ;;  %v2308_v59 = vmul.f32 0.65, %v2064_v29  ;;  %v3720_v60 = vsel %vm2454_vm6, 1.0, %v4537_v56 }
 0x17c   : > { %vm2459_vm13 = vcmp.gt.f32.partialorder %v5681_v17, 0.0  ;;  %3733 = vst [vmem:[%s5362_s20 + $0x168] sm:$0xff] %v5681_v17  ;;  %v2450_v53 = vadd.f32 %v2428_v49, %v5683_v5  ;;  %v2562_v45 = vsub.f32 %v2554_v47, %v3721_v52  ;;  %v4138_v57 = vpop.f32.mrb[22].mxu1  ;;  %3736 = vst [vmem:[%s5374_s0 + $0x140] sm:$0xff] %v3720_v60  ;;  %v2553_v61 = vmul.f32 0.65, %v5604_v54 }
 0x17d   : > { %v5700_v28 = vsub.f32 %v2308_v59, %v3687_v51  ;;  %v2443_v0 = vadd.f32 %v4138_v57, %v5348_v14  ;;  %v2660_v55 = vadd.f32 %v5348_v14, %v2659_v62  ;;  %v3686_v1 = vsel %vm2208_vm12, 1.0, %v4537_v56  ;;  %v2437_v11 = vpop.f32.mrb[23].mxu1 }
 0x17e   : > { %vm2458_vm14 = vcmp.gt.f32.partialorder %v2450_v53, 0.0  ;;  %3732 = vst [vmem:[%s5362_s20 + $0x160] sm:$0xff] %v2450_v53  ;;  %v2699_v63 = vadd.f32 %v2665_v16, %v2562_v45  ;;  %v2561_v48 = vsub.f32 %v2553_v61, %v3720_v60  ;;  %3702 = vst [vmem:[%s5374_s0 + $0x130] sm:$0xff] %v3686_v1  ;;  %v2307_v6 = vmul.f32 0.65, %v2063_v46  ;;  %v4160_v10 = vpop.f32.mrb[26].mxu0 }
 0x17f   : > { %v5709_v54 = vadd.f32 %v2443_v0, %v5700_v28  ;;  %v2438_v2 = vadd.f32 %v5348_v14, %v2437_v11  ;;  %v3723_v7 = vsel %vm2457_vm9, 1.0, %v4537_v56  ;;  %v2556_v8 = vmul.f32 0.65, %v5640_v21  ;;  %v2669_v19 = vpop.f32.mrb[27].mxu0  ;;  %v5782_v60 = vld [vmem:[%s5995_s6] ss:$0 sm:$0xff] }
 0x180   : > { %vm2707_vm15 = vcmp.gt.f32.partialorder %v2699_v63, 0.0  ;;  %3769 = vst [vmem:[%s5362_s20 + $0x188] sm:$0xff] %v2699_v63  ;;  %v2698_v12 = vadd.f32 %v2660_v55, %v2561_v48  ;;  %v5716_v15 = vsub.f32 %v2307_v6, %v3686_v1  ;;  %3739 = vst [vmem:[%s5374_s0 + $0x158] sm:$0xff] %v3723_v7  ;;  %v2675_v38 = vadd.f32 %v4160_v10, %v5348_v14 }
 0x181   : > { %vm2461_vm0 = vcmp.gt.f32.partialorder %v5709_v54, 0.0  ;;  %3735 = vst [vmem:[%s5362_s20 + $0x178] sm:$0xff] %v5709_v54  ;;  %v2564_v22 = vsub.f32 %v2556_v8, %v3723_v7  ;;  %v3722_v13 = vsel %vm2456_vm10, 1.0, %v4537_v56  ;;  %v2555_v37 = vmul.f32 0.65, %v5648_v20  ;;  %v4185_v21 = vpop.f32.mrb[24].mxu1 }
 0x182   : > { %vm2706_vm1 = vcmp.gt.f32.partialorder %v2698_v12, 0.0  ;;  %3768 = vst [vmem:[%s5362_s20 + $0x180] sm:$0xff] %v2698_v12  ;;  %v5730_v25 = vadd.f32 %v2438_v2, %v5716_v15  ;;  %3738 = vst [vmem:[%s5374_s0 + $0x150] sm:$0xff] %v3722_v13  ;;  %v2670_v43 = vadd.f32 %v5348_v14, %v2669_v19  ;;  %v3761_v4 = vsel %vm2707_vm15, 1.0, %v4537_v56  ;;  %v2911_v32 = vpop.f32.mrb[25].mxu1 }
 0x183   : > { %v2701_v58 = vadd.f32 %v2675_v38, %v2564_v22  ;;  %v2563_v31 = vsub.f32 %v2555_v37, %v3722_v13  ;;  %3777 = vst [vmem:[%s5374_s0 + $0x188] sm:$0xff] %v3761_v4  ;;  %v2806_v18 = vmul.f32 0.65, %v2562_v45  ;;  %v2917_v20 = vadd.f32 %v4185_v21, %v5348_v14 }
 0x184   : > { %vm2460_vm2 = vcmp.gt.f32.partialorder %v5730_v25, 0.0  ;;  %3734 = vst [vmem:[%s5362_s20 + $0x170] sm:$0xff] %v5730_v25  ;;  %v3760_v3 = vsel %vm2706_vm1, 1.0, %v4537_v56  ;;  %v2805_v33 = vmul.f32 0.65, %v2561_v48  ;;  %v2912_v9 = vadd.f32 %v5348_v14, %v2911_v32 }
 0x185   : > { %vm2709_vm3 = vcmp.gt.f32.partialorder %v2701_v58, 0.0  ;;  %3771 = vst [vmem:[%s5362_s20 + $0x198] sm:$0xff] %v2701_v58  ;;  %v2700_v29 = vadd.f32 %v2670_v43, %v2563_v31  ;;  %v2814_v34 = vsub.f32 %v2806_v18, %v3761_v4  ;;  %3776 = vst [vmem:[%s5374_s0 + $0x180] sm:$0xff] %v3760_v3  ;;  %v3725_v24 = vsel %vm2459_vm13, 1.0, %v4537_v56 }
 0x186   : > { %v2813_v35 = vsub.f32 %v2805_v33, %v3760_v3  ;;  %3741 = vst [vmem:[%s5374_s0 + $0x168] sm:$0xff] %v3725_v24  ;;  %v2558_v39 = vmul.f32 0.65, %v5670_v44  ;;  %v3724_v30 = vsel %vm2458_vm14, 1.0, %v4537_v56  ;;  %v2557_v40 = vmul.f32 0.65, %v5683_v5 }
 0x187   : > { %vm2708_vm4 = vcmp.gt.f32.partialorder %v2700_v29, 0.0  ;;  %3770 = vst [vmem:[%s5362_s20 + $0x190] sm:$0xff] %v2700_v29  ;;  %v2951_v26 = vadd.f32 %v2917_v20, %v2814_v34  ;;  %3052 = vst [vmem:[%s5756_s29 + $0x8] sm:$0xff] %v2814_v34  ;;  %v4163_v46 = vpop.f32.mrb[28].mxu0  ;;  %v3763_v42 = vsel %vm2709_vm3, 1.0, %v4537_v56  ;;  %v3727_v45 = vsel %vm2461_vm0, 1.0, %v4537_v56 }
 0x188   : > { %3740 = vst [vmem:[%s5374_s0 + $0x160] sm:$0xff] %v3724_v30  ;;  %v2808_v41 = vmul.f32 0.65, %v2564_v22  ;;  %v2950_v44 = vadd.f32 %v2912_v9, %v2813_v35  ;;  %3051 = vst [vmem:[%s5756_s29] sm:$0xff] %v2813_v35  ;;  %v2566_v27 = vsub.f32 %v2558_v39, %v3725_v24  ;;  %v2685_v36 = vadd.f32 %v4163_v46, %v5348_v14  ;;  %v2679_v49 = vpop.f32.mrb[29].mxu0 }
 0x189   : > { %v2565_v23 = vsub.f32 %v2557_v40, %v3724_v30  ;;  %3779 = vst [vmem:[%s5374_s0 + $0x198] sm:$0xff] %v3763_v42  ;;  %vm2959_vm5 = vcmp.gt.f32.partialorder %v2951_v26, 0.0  ;;  %3809 = vst [vmem:[%s5362_s20 + $0x1c8] sm:$0xff] %v2951_v26  ;;  %v2680_v52 = vadd.f32 %v5348_v14, %v2679_v49  ;;  %v3762_v5 = vsel %vm2708_vm4, 1.0, %v4537_v56 }
 0x18a   : > { %v2816_v17 = vsub.f32 %v2808_v41, %v3763_v42  ;;  %v3801_v47 = vsel %vm2959_vm5, 1.0, %v4537_v56  ;;  %vm2958_vm6 = vcmp.gt.f32.partialorder %v2950_v44, 0.0  ;;  %3808 = vst [vmem:[%s5362_s20 + $0x1c0] sm:$0xff] %v2950_v44  ;;  %v2703_v50 = vadd.f32 %v2685_v36, %v2566_v27  ;;  %v4188_v51 = vpop.f32.mrb[26].mxu1  ;;  %3778 = vst [vmem:[%s5374_s0 + $0x190] sm:$0xff] %v3762_v5 }
 0x18b   : > { %v2807_v16 = vmul.f32 0.65, %v2563_v31  ;;  %3817 = vst [vmem:[%s5374_s0 + $0x1c8] sm:$0xff] %v3801_v47  ;;  %3060 = vst [vmem:[%s5775_s28 + $0x8] sm:$0xff] %v3801_v47  ;;  %v3800_v14 = vsel %vm2958_vm6, 1.0, %v4537_v56  ;;  %v2702_v59 = vadd.f32 %v2680_v52, %v2565_v23  ;;  %v2927_v62 = vadd.f32 %v5782_v60, %v4188_v51  ;;  %v2921_v53 = vpop.f32.mrb[27].mxu1 }
 0x18c   : > { %3054 = vst [vmem:[%s5756_s29 + $0x18] sm:$0xff] %v2816_v17  ;;  %3816 = vst [vmem:[%s5374_s0 + $0x1c0] sm:$0xff] %v3800_v14  ;;  %vm2711_vm7 = vcmp.gt.f32.partialorder %v2703_v50, 0.0  ;;  %v2922_v61 = vadd.f32 %v5782_v60, %v2921_v53  ;;  %v2560_v0 = vmul.f32 0.65, %v5700_v28  ;;  %v3726_v11 = vsel %vm2460_vm2, 1.0, %v4537_v56 }
 0x18d   : > { %3059 = vst [vmem:[%s5775_s28] sm:$0xff] %v3800_v14  ;;  %3773 = vst [vmem:[%s5362_s20 + $0x1a8] sm:$0xff] %v2703_v50  ;;  %v2815_v57 = vsub.f32 %v2807_v16, %v3762_v5  ;;  %vm2710_vm8 = vcmp.gt.f32.partialorder %v2702_v59, 0.0  ;;  %v2953_v55 = vadd.f32 %v2927_v62, %v2816_v17  ;;  %v4166_v1 = vpop.f32.mrb[30].mxu0  ;;  %v2559_v63 = vmul.f32 0.65, %v5716_v15 }
 0x18e   : > { %3743 = vst [vmem:[%s5374_s0 + $0x178] sm:$0xff] %v3727_v45  ;;  %3772 = vst [vmem:[%s5362_s20 + $0x1a0] sm:$0xff] %v2702_v59  ;;  %v2568_v6 = vsub.f32 %v2560_v0, %v3727_v45  ;;  %v2695_v54 = vadd.f32 %v5782_v60, %v4166_v1  ;;  %v2689_v28 = vpop.f32.mrb[31].mxu0  ;;  %v3765_v2 = vsel %vm2711_vm7, 1.0, %v4537_v56  ;;  %v2810_v10 = vmul.f32 0.65, %v2566_v27 }
 0x18f   : > { %v2952_v48 = vadd.f32 %v2922_v61, %v2815_v57  ;;  %3053 = vst [vmem:[%s5756_s29 + $0x10] sm:$0xff] %v2815_v57  ;;  %3742 = vst [vmem:[%s5374_s0 + $0x170] sm:$0xff] %v3726_v11  ;;  %vm2961_vm9 = vcmp.gt.f32.partialorder %v2953_v55, 0.0  ;;  %v2567_v7 = vsub.f32 %v2559_v63, %v3726_v11  ;;  %v2690_v8 = vadd.f32 %v5782_v60, %v2689_v28 }
 0x190   : > { %3811 = vst [vmem:[%s5362_s20 + $0x1d8] sm:$0xff] %v2953_v55  ;;  %3781 = vst [vmem:[%s5374_s0 + $0x1a8] sm:$0xff] %v3765_v2  ;;  %v3803_v12 = vsel %vm2961_vm9, 1.0, %v4537_v56  ;;  %v2705_v15 = vadd.f32 %v2695_v54, %v2568_v6  ;;  %v3764_v38 = vsel %vm2710_vm8, 1.0, %v4537_v56  ;;  %v2818_v13 = vsub.f32 %v2810_v10, %v3765_v2 }
 0x191   : > { %vm2960_vm10 = vcmp.gt.f32.partialorder %v2952_v48, 0.0  ;;  %3810 = vst [vmem:[%s5362_s20 + $0x1d0] sm:$0xff] %v2952_v48  ;;  %3819 = vst [vmem:[%s5374_s0 + $0x1d8] sm:$0xff] %v3803_v12  ;;  %v2704_v22 = vadd.f32 %v2690_v8, %v2567_v7  ;;  %v2809_v37 = vmul.f32 0.65, %v2565_v23 }
 0x192   : > { %3062 = vst [vmem:[%s5775_s28 + $0x18] sm:$0xff] %v3803_v12  ;;  %v3802_v19 = vsel %vm2960_vm10, 1.0, %v4537_v56  ;;  %3780 = vst [vmem:[%s5374_s0 + $0x1a0] sm:$0xff] %v3764_v38  ;;  %vm2713_vm11 = vcmp.gt.f32.partialorder %v2705_v15, 0.0  ;;  %v2812_v43 = vmul.f32 0.65, %v2568_v6 }
 0x193   : > { %3818 = vst [vmem:[%s5374_s0 + $0x1d0] sm:$0xff] %v3802_v19  ;;  %3061 = vst [vmem:[%s5775_s28 + $0x10] sm:$0xff] %v3802_v19  ;;  %v4191_v25 = vpop.f32.mrb[28].mxu1  ;;  %v2811_v4 = vmul.f32 0.65, %v2567_v7  ;;  %vm2712_vm12 = vcmp.gt.f32.partialorder %v2704_v22, 0.0  ;;  %v2817_v58 = vsub.f32 %v2809_v37, %v3764_v38 }
 0x194   : > { %3775 = vst [vmem:[%s5362_s20 + $0x1b8] sm:$0xff] %v2705_v15  ;;  %3774 = vst [vmem:[%s5362_s20 + $0x1b0] sm:$0xff] %v2704_v22  ;;  %v2937_v21 = vadd.f32 %v5782_v60, %v4191_v25  ;;  %v2931_v31 = vpop.f32.mrb[29].mxu1  ;;  %v3767_v18 = vsel %vm2713_vm11, 1.0, %v4537_v56  ;;  %v3766_v3 = vsel %vm2712_vm12, 1.0, %v4537_v56 }
 0x195   : > { %3056 = vst [vmem:[%s5756_s29 + $0x28] sm:$0xff] %v2818_v13  ;;  %v2932_v20 = vadd.f32 %v5782_v60, %v2931_v31  ;;  %3783 = vst [vmem:[%s5374_s0 + $0x1b8] sm:$0xff] %v3767_v18  ;;  %v2820_v32 = vsub.f32 %v2812_v43, %v3767_v18  ;;  %v2819_v9 = vsub.f32 %v2811_v4, %v3766_v3 }
 0x196   : > { %v2955_v33 = vadd.f32 %v2937_v21, %v2818_v13  ;;  %3055 = vst [vmem:[%s5756_s29 + $0x20] sm:$0xff] %v2817_v58  ;;  %3782 = vst [vmem:[%s5374_s0 + $0x1b0] sm:$0xff] %v3766_v3 }
 0x197   : > { %v2954_v29 = vadd.f32 %v2932_v20, %v2817_v58  ;;  %v4194_v34 = vpop.f32.mrb[30].mxu1  ;;  %3058 = vst [vmem:[%s5756_s29 + $0x38] sm:$0xff] %v2820_v32  ;;  %3057 = vst [vmem:[%s5756_s29 + $0x30] sm:$0xff] %v2819_v9 }
 0x198   : > { %vm2963_vm13 = vcmp.gt.f32.partialorder %v2955_v33, 0.0  ;;  %3813 = vst [vmem:[%s5362_s20 + $0x1e8] sm:$0xff] %v2955_v33  ;;  %v2947_v24 = vadd.f32 %v5782_v60, %v4194_v34  ;;  %v2941_v35 = vpop.f32.mrb[31].mxu1 }
 0x199   : > { %v3805_v39 = vsel %vm2963_vm13, 1.0, %v4537_v56  ;;  %vm2962_vm14 = vcmp.gt.f32.partialorder %v2954_v29, 0.0  ;;  %3812 = vst [vmem:[%s5362_s20 + $0x1e0] sm:$0xff] %v2954_v29  ;;  %v2942_v30 = vadd.f32 %v5782_v60, %v2941_v35 }
 0x19a   : > { %3821 = vst [vmem:[%s5374_s0 + $0x1e8] sm:$0xff] %v3805_v39  ;;  %3064 = vst [vmem:[%s5775_s28 + $0x28] sm:$0xff] %v3805_v39  ;;  %v3804_v40 = vsel %vm2962_vm14, 1.0, %v4537_v56  ;;  %v2957_v26 = vadd.f32 %v2947_v24, %v2820_v32 }
 0x19b   : > { %3820 = vst [vmem:[%s5374_s0 + $0x1e0] sm:$0xff] %v3804_v40  ;;  %3063 = vst [vmem:[%s5775_s28 + $0x20] sm:$0xff] %v3804_v40  ;;  %v2956_v46 = vadd.f32 %v2942_v30, %v2819_v9 }
 0x19c   : > { %vm2965_vm15 = vcmp.gt.f32.partialorder %v2957_v26, 0.0  ;;  %3815 = vst [vmem:[%s5362_s20 + $0x1f8] sm:$0xff] %v2957_v26 }
 0x19d   : > { %v3807_v42 = vsel %vm2965_vm15, 1.0, %v4537_v56  ;;  %vm2964_vm0 = vcmp.gt.f32.partialorder %v2956_v46, 0.0  ;;  %3814 = vst [vmem:[%s5362_s20 + $0x1f0] sm:$0xff] %v2956_v46 }
 0x19e   : > { %3823 = vst [vmem:[%s5374_s0 + $0x1f8] sm:$0xff] %v3807_v42  ;;  %3066 = vst [vmem:[%s5775_s28 + $0x38] sm:$0xff] %v3807_v42  ;;  %v3806_v41 = vsel %vm2964_vm0, 1.0, %v4537_v56 }
 0x19f   : > { %3822 = vst [vmem:[%s5374_s0 + $0x1f0] sm:$0xff] %v3806_v41  ;;  %3065 = vst [vmem:[%s5775_s28 + $0x30] sm:$0xff] %v3806_v41 }
 0x1a0   : > { %s5852_s19 = sshll.u32 %s4527_s24, 10  ;;  %s3125_s17 = sshll.u32 %s5374_s0, 4  ;;  %s3126_s17 = int_to_ptr.vmem [resolvable:$true] %s3125_s17 }
 0x1a1   : > { %s3108_s1 = scalar_lea.hbm %s5996_s7, %s5852_s19  ;;  %s4538_s18 = smov 1024  }
 0x1a2   : > { %4323 = sst [smem:[#allocation15]] (%p4660_p5), %s4538_s18  ;;  %s4539_s15 = smov 2048  }
 0x1a3   : > { %4324 = sst [smem:[#allocation15 + $0x1]] (%p4660_p5), %s4539_s15  ;;  %s4540_s2 = smov 8  }
 0x1a4   : > { %4325 = sst [smem:[#allocation15 + $0x2]] (%p4660_p5), %s4540_s2  ;;  %s4541_s3 = smov 128  }
 0x1a5   : > { %4326 = sst [smem:[#allocation15 + $0x3]] (%p4660_p5), %s4541_s3  ;;  %s4542_s24 = smov [#allocation14]  }
 0x1a6   : > { %4327 = sst [smem:[#allocation15 + $0x4]] (%p4660_p5), %s4541_s3  ;;  %s4543_s0 = smov 0  }
 0x1a7   : > { %4328 = sst [smem:[#allocation15 + $0x5]] (%p4660_p5), %s4540_s2 }
 0x1a8   : > { %4329 = dma.general (%p4660_p5), %s3126_s17, 8192, %s3108_s1, %s3068_s30, %s4542_s24, [#allocation15], %s4543_s0, 0  }
 0x1a9   : > { %s3156_s3 = scalar_lea.hbm %s5997_s8, %s5852_s19  ;;  %s3173_s15 = sshll.u32 %s5362_s20, 4  ;;  %s3174_s15 = int_to_ptr.vmem [resolvable:$true] %s3173_s15 }
 0x1aa   : > { %s4544_s2 = smov 1024   ;;  %s4545_s1 = smov 2048  }
 0x1ab   : > { %4330 = sst [smem:[#allocation17]] (%p4660_p5), %s4544_s2  ;;  %s4546_s30 = smov 8  }
 0x1ac   : > { %4331 = sst [smem:[#allocation17 + $0x1]] (%p4660_p5), %s4545_s1  ;;  %s4547_s17 = smov 128  }
 0x1ad   : > { %4332 = sst [smem:[#allocation17 + $0x2]] (%p4660_p5), %s4546_s30  ;;  %s4548_s25 = smov [#allocation16]  }
 0x1ae   : > { %4333 = sst [smem:[#allocation17 + $0x3]] (%p4660_p5), %s4547_s17  ;;  %s4549_s24 = smov 0  }
 0x1af   : > { %4334 = sst [smem:[#allocation17 + $0x4]] (%p4660_p5), %s4547_s17  ;;  %s6022_s20 = scalar_lea.sflag [#allocation10], %s5332_s14 }
 0x1b0   : > { %4335 = sst [smem:[#allocation17 + $0x5]] (%p4660_p5), %s4546_s30  ;;  %s5898_s18 = scalar_lea.hbm %s6000_s11, %s5852_s19 }
 0x1b1   : > { %4336 = dma.general (%p4660_p5), %s3174_s15, 8192, %s3156_s3, %s6022_s20, %s4548_s25, [#allocation17], %s4549_s24, 0  }
 0x1b2   : > { %s3210_s2 = sshll.u32 %s5756_s29, 4  ;;  %s5907_s30 = scalar_lea.hbm %s6001_s12, %s5852_s19  ;;  %s5901_s2 = int_to_ptr.vmem [resolvable:$true] %s3210_s2 }
 0x1b3   : > { %s4421_s3 = scalar_lea.vmem %s5901_s2, 1024  ;;  %s4550_s15 = smov [#allocation11]  }
 0x1b4   : > { %p4422_p1 = scmp.ne.s32.totalorder %s5901_s2, %s4421_s3  ;;  %s4425_s25 = sshll.u32 %s4550_s15, 4  ;;  %s4426_s25 = int_to_ptr.vmem [resolvable:$false] %s4425_s25 }
 0x1b5   : > { %s4427_s24 = scalar_lea.vmem %s4426_s25, 2048  ;;  %p4428_p4 = scmp.lt.s32.totalorder %s5901_s2, %s4426_s25 }
 0x1b6   : > { %p4423_p2 = pnand %p4422_p1, %p4660_p5  ;;  %p4429_p6 = scmp.lt.s32.totalorder %s4427_s24, %s4421_s3 }
 0x1b8   : > { %p4424_p3 = pneg %p4423_p2  ;;  %p4430_p7 = por %p4429_p6, %p4428_p4 }
 0x1ba   : > { %p4431_p8 = pnand %p4430_p7, %p4424_p3 }
 0x1bc   : > { %4434 = shalt.err (!%p4431_p8)
}
 0x1bd   : > { %s4435_s29 = scalar_lea.hbm %s5898_s18, 1024  ;;  %s4439_s0 = scalar_lea.hbm %s6000_s11, 2048 }
 0x1be   : > { %p4436_p11 = scmp.ne.s32.totalorder %s5898_s18, %s4435_s29  ;;  %p4440_p0 = scmp.lt.u32.totalorder %s5898_s18, %s6000_s11 }
 0x1bf   : > { %p4441_p1 = scmp.lt.u32.totalorder %s4439_s0, %s4435_s29  ;;  %p4443_p3 = scmp.lt.u32.totalorder %s4435_s29, %s5898_s18 }
 0x1c0   : > { %p4437_p12 = pnand %p4436_p11, %p4660_p5 }
 0x1c1   : > { %p4442_p2 = por %p4441_p1, %p4440_p0 }
 0x1c2   : > { %p4438_p13 = pneg %p4437_p12 }
 0x1c3   : > { %p4444_p4 = por %p4443_p3, %p4442_p2 }
 0x1c5   : > { %p4445_p6 = pnand %p4444_p4, %p4438_p13 }
 0x1c7   : > { %4448 = shalt.err (!%p4445_p6)
}
 0x1c8   : > { %s4551_s17 = smov 128   ;;  %s4552_s3 = smov 8  }
 0x1c9   : > { %s6023_s15 = scalar_lea.sflag [#allocation10], %s5332_s14  ;;  %s3226_s25 = sshll.u32 %s5775_s28, 4  ;;  %s5936_s25 = int_to_ptr.vmem [resolvable:$true] %s3226_s25 }
 0x1ca   : > { %4337 = dma.vmem_to_hbm [thread:$0]  (%p4660_p5), %s5901_s2, 1024, %s5898_s18, %s6023_s15, %s4551_s17, %s4551_s17, %s4552_s3  }
 0x1cb   : > { %s4449_s24 = scalar_lea.vmem %s5936_s25, 1024  ;;  %s4553_s29 = smov [#allocation12]  }
 0x1cc   : > { %p4450_p7 = scmp.ne.s32.totalorder %s5936_s25, %s4449_s24  ;;  %s4453_s19 = sshll.u32 %s4553_s29, 4  ;;  %s4454_s19 = int_to_ptr.vmem [resolvable:$false] %s4453_s19 }
 0x1cd   : > { %s4455_s20 = scalar_lea.vmem %s4454_s19, 2048  ;;  %p4456_p12 = scmp.lt.s32.totalorder %s5936_s25, %s4454_s19 }
 0x1ce   : > { %p4451_p8 = pnand %p4450_p7, %p4660_p5  ;;  %p4457_p13 = scmp.lt.s32.totalorder %s4455_s20, %s4449_s24 }
 0x1d0   : > { %p4452_p11 = pneg %p4451_p8  ;;  %p4458_p0 = por %p4457_p13, %p4456_p12 }
 0x1d2   : > { %p4459_p1 = pnand %p4458_p0, %p4452_p11 }
 0x1d4   : > { %4462 = shalt.err (!%p4459_p1)
}
 0x1d5   : > { %s4463_s14 = scalar_lea.hbm %s5907_s30, 1024  ;;  %s4467_s2 = scalar_lea.hbm %s6001_s12, 2048 }
 0x1d6   : > { %p4464_p2 = scmp.ne.s32.totalorder %s5907_s30, %s4463_s14  ;;  %p4468_p6 = scmp.lt.u32.totalorder %s5907_s30, %s6001_s12 }
 0x1d7   : > { %p4469_p7 = scmp.lt.u32.totalorder %s4467_s2, %s4463_s14  ;;  %p4471_p11 = scmp.lt.u32.totalorder %s4463_s14, %s5907_s30 }
 0x1d8   : > { %p4465_p3 = pnand %p4464_p2, %p4660_p5 }
 0x1d9   : > { %p4470_p8 = por %p4469_p7, %p4468_p6 }
 0x1da   : > { %p4466_p4 = pneg %p4465_p3 }
 0x1db   : > { %p4472_p12 = por %p4471_p11, %p4470_p8 }
 0x1dd   : > { %p4473_p13 = pnand %p4472_p12, %p4466_p4 }
 0x1df   : > { %4476 = shalt.err (!%p4473_p13)
}
 0x1e0   : > { %s6024_s1 = scalar_lea.sflag [#allocation13], %s4830_s27 }
 0x1e1   : > { %4338 = dma.vmem_to_hbm [thread:$0]  (%p4660_p5), %s5936_s25, 1024, %s5907_s30, %s6024_s1, %s4551_s17, %s4551_s17, %s4552_s3  }
 0x1e2 PF: > { %s3241_s15 = sand.u32 1, %s4515_s21   ;;  %p4344_p0 = pnand %p3505_p10, %p4673_p9 }
 0x1e3   : > { %s3242_s24 = scalar_lea.sflag [#allocation8], %s3241_s15 }
 0x1e4   : > { %4502 = dma.done.wait (!%p4344_p0), %s3242_s24, 8192  }
 0x1e5   : > { %4504 = vsyncadd (!%p4344_p0), %s3242_s24, 4294959104  ;;  %s6025_s13 = sadd.s32 4294967294, %s4535_s26  }
 0x1e6   : > { %s3250_s29 = sand.u32 1, %s6025_s13  }
 0x1e7   : > { %s3251_s19 = scalar_lea.sflag [#allocation10], %s3250_s29 }
 0x1e8   : > { %4506 = dma.done.wait (!%p4344_p0), %s3251_s19, 9216  }
 0x1e9   : > { %4508 = vsyncadd (!%p4344_p0), %s3251_s19, 4294958080  ;;  %s3285_s27 = scalar_lea.sflag [#allocation13], %s3241_s15 }
 0x1ea   : > { %4510 = dma.done.wait (!%p4344_p0), %s3285_s27, 1024  }
 0x1eb   : > { %4512 = vsyncadd (!%p4344_p0), %s3285_s27, 4294966272  ;;  %s32_s26 = sadd.s32 1, %s4535_s26   ;;  %s6026_s30 = sld [smem:[#allocation21_spill]] }
 0x1ec   : > { %p29_p5 = scmp.ge.s32.totalorder %s32_s26, 4   ;;  %s6027_s23 = sld [smem:[#allocation24_spill]] }
 0x1ed   : > { %s6028_s24 = sld [smem:[#allocation22_spill]]  ;;  %s6029_s25 = sld [smem:[#allocation23_spill]] }
 0x1ee   : > { %s6030_s21 = smov %s4519_s22  ;;  %31 = sbr.rel (!%p29_p5) target bundleno = 13 (0xd), region = 250 }
 0x1f1   : > { %s6031_s22 = smov %s6026_s30 }
 0x1f5   :  { %3290 = vsyncpa [#allocation8], 1 }
 0x1f6   :  { %3292 = vsyncpa [#allocation8 + $0x1], 1 }
 0x1f7   :  { %3293 = vsyncpa [#allocation10], 1 }
 0x1f8   :  { %3295 = vsyncpa [#allocation10 + $0x1], 1 }
 0x1f9   :  { %3296 = vsyncpa [#allocation13], 1 }
 0x1fa   :  { %3298 = vsyncpa [#allocation13 + $0x1], 1 }

</bundles_post_ra>
